<compile_context>
chip_gen: v7x
topology: tpu7x:2x2x1
jax: 0.10.0
libtpu: 0.0.40
codegen_flags: <defaults>
</compile_context>

<pallas_src>
import functools
import math

import jax
import jax.numpy as jnp
import numpy as np
from jax.experimental import pallas as pl
from jax.experimental.pallas import tpu as pltpu

BN_EPS = 1e-5
_LANE = 128
_MAX_ROWS_PER_STEP = 4096


def _round_up(a, b):
    return (a + b - 1) // b * b


@functools.lru_cache(maxsize=None)
def _vmem_limit_bytes():
    """Generation-aware scoped-VMEM limit: 128 MiB parts (v5e/v6e) -> 112 MiB, v7x 64 -> 48."""
    cap_mib = 64
    try:
        info = pltpu.get_tpu_info()
        cap_mib = int(getattr(info, "vmem_capacity_bytes", cap_mib << 20)) >> 20
    except Exception:
        pass
    return int(min(max(cap_mib - 16, 32), 112)) << 20


def _vmem_budget():
    # streaming budget for tile sizing; leaves room for Mosaic scratch + resident weights
    return _vmem_limit_bytes() // 3


def _cparams(sems):
    return pltpu.CompilerParams(dimension_semantics=sems,
                                vmem_limit_bytes=_vmem_limit_bytes())


# ----------------------------- Pallas kernels ------------------------------ #

def _partial_row_sums(y):
    """(m, c) -> (8, c) partial column sums using only VPU adds (m % 8 == 0 fast path)."""
    m, c = y.shape
    if m % 8 == 0:
        return jnp.sum(y.reshape(m // 8, 8, c), axis=0)
    return jnp.pad(jnp.sum(y, axis=0, keepdims=True), ((0, 7), (0, 0)))


def _make_conv_stats_kernel(stride, Ho, Wo, IB, Cin, Cp, with_sc):
    """3x3 conv as 9 shifted matmuls over phase tiles + BN sum / sum-of-squares stats.
    Optionally also computes the fused 1x1 downsampling shortcut conv and its stats."""
    Mo = IB * Ho * Wo
    nph = stride * stride

    def kernel(*refs):
        pos = 0
        x_refs = refs[pos:pos + nph]; pos += nph
        w_ref = refs[pos]; pos += 1
        if with_sc:
            xsc_ref, wsc_ref = refs[pos], refs[pos + 1]; pos += 2
        y_ref = refs[pos]; pos += 1
        if with_sc:
            ysc_ref = refs[pos]; pos += 1
        s_ref, q_ref = refs[pos], refs[pos + 1]; pos += 2
        if with_sc:
            ssc_ref, qsc_ref = refs[pos], refs[pos + 1]

        @pl.when(pl.program_id(1) == 0)
        def _init():
            s_ref[...] = jnp.zeros_like(s_ref)
            q_ref[...] = jnp.zeros_like(q_ref)
            if with_sc:
                ssc_ref[...] = jnp.zeros_like(ssc_ref)
                qsc_ref[...] = jnp.zeros_like(qsc_ref)

        # out(r, c) = sum_{i,j} xp[r*s + i, c*s + j, :] @ W[i, j]
        acc = jnp.zeros((Mo, Cp), jnp.float32)
        for i in range(3):
            for j in range(3):
                ph = x_refs[(i % stride) * stride + (j % stride)]
                a0, b0 = i // stride, j // stride
                a = ph[:, a0:a0 + Ho, b0:b0 + Wo, :].reshape(Mo, Cin)
                acc = acc + jnp.dot(a, w_ref[3 * i + j],
                                    preferred_element_type=jnp.float32)
        y_ref[...] = acc
        s_ref[...] += _partial_row_sums(acc)
        q_ref[...] += _partial_row_sums(acc * acc)

        if with_sc:
            xsc = xsc_ref[...].reshape(Mo, Cin)
            ysc = jnp.dot(xsc, wsc_ref[...], preferred_element_type=jnp.float32)
            ysc_ref[...] = ysc
            ssc_ref[...] += _partial_row_sums(ysc)
            qsc_ref[...] += _partial_row_sums(ysc * ysc)

    return kernel


def _apply_kernel(y_ref, sc_ref, bi_ref, res_ref, o_ref):
    """out = hardtanh(y*scale + bias + residual); no matmul, pure streaming/VPU pass."""
    o_ref[...] = jnp.clip(y_ref[...] * sc_ref[...] + bi_ref[...] + res_ref[...],
                          -1.0, 1.0)


def _apply_ds_kernel(y_ref, sc_ref, bi_ref, ysc_ref, scsc_ref, bisc_ref, o_ref):
    """Downsample block: residual = BN(shortcut conv) folded from its precomputed y_sc."""
    r = ysc_ref[...] * scsc_ref[...] + bisc_ref[...]
    o_ref[...] = jnp.clip(y_ref[...] * sc_ref[...] + bi_ref[...] + r, -1.0, 1.0)


# --------------------------- pallas_call wrappers --------------------------- #

def _conv_stats_call(phases, w, x_sc, w_sc, *, stride, Ho, Wo, IB, G):
    N, A, B, Cin = phases[0].shape
    Cp = w.shape[-1]
    with_sc = x_sc is not None
    npg = N // (G * IB)
    Mo = IB * Ho * Wo
    M = N * Ho * Wo

    img4 = lambda g, i: (g * npg + i, 0, 0, 0)
    row2 = lambda g, i: (g * npg + i, 0)
    stat2 = lambda g, i: (g, 0)
    const3 = lambda g, i: (0, 0, 0)
    const2 = lambda g, i: (0, 0)

    ins = list(phases) + [w]
    in_specs = [pl.BlockSpec((IB, A, B, Cin), img4) for _ in phases]
    in_specs.append(pl.BlockSpec(w.shape, const3))
    if with_sc:
        ins += [x_sc, w_sc]
        in_specs += [pl.BlockSpec((IB, Ho, Wo, Cin), img4),
                     pl.BlockSpec(w_sc.shape, const2)]

    n_y = 2 if with_sc else 1
    n_stat = 4 if with_sc else 2
    out_shape = ([jax.ShapeDtypeStruct((M, Cp), jnp.float32)] * n_y
                 + [jax.ShapeDtypeStruct((8 * G, Cp), jnp.float32)] * n_stat)
    out_specs = ([pl.BlockSpec((Mo, Cp), row2)] * n_y
                 + [pl.BlockSpec((8, Cp), stat2)] * n_stat)

    kern = _make_conv_stats_kernel(stride, Ho, Wo, IB, Cin, Cp, with_sc)
    return pl.pallas_call(
        kern,
        out_shape=out_shape,
        grid=(G, npg),
        in_specs=in_specs,
        out_specs=out_specs,
        compiler_params=_cparams(("parallel", "arbitrary")),
    )(*ins)


def _apply_call(y, scale, bias, res, rows):
    M, Cp = y.shape
    row = pl.BlockSpec((rows, Cp), lambda r: (r, 0))
    const = pl.BlockSpec((1, Cp), lambda r: (0, 0))
    return pl.pallas_call(
        _apply_kernel,
        out_shape=jax.ShapeDtypeStruct((M, Cp), jnp.float32),
        grid=(M // rows,),
        in_specs=[row, const, const, row],
        out_specs=row,
        compiler_params=_cparams(("parallel",)),
    )(y, scale, bias, res)


def _apply_ds_call(y, scale, bias, y_sc, scale_sc, bias_sc, rows):
    M, Cp = y.shape
    row = pl.BlockSpec((rows, Cp), lambda r: (r, 0))
    const = pl.BlockSpec((1, Cp), lambda r: (0, 0))
    return pl.pallas_call(
        _apply_ds_kernel,
        out_shape=jax.ShapeDtypeStruct((M, Cp), jnp.float32),
        grid=(M // rows,),
        in_specs=[row, const, const, row, const, const],
        out_specs=row,
        compiler_params=_cparams(("parallel",)),
    )(y, scale, bias, y_sc, scale_sc, bias_sc)


# ------------------------------- JAX glue ---------------------------------- #

def preprocess_ir_weight(w):
    """IRConv2d weight transform (forward semantics):
       bw = (w - mean) / std_unbiased ; sw = 2^round(log2(mean|bw|)) ; bw = sign(bw) * sw."""
    co = w.shape[0]
    wf = w.reshape(co, -1)
    bw = wf - wf.mean(axis=-1, keepdims=True)
    std = jnp.std(bw, axis=-1, keepdims=True, ddof=1)          # torch.std is unbiased
    bw = bw / jnp.maximum(std, 1e-12)
    mabs = jnp.maximum(jnp.mean(jnp.abs(bw), axis=-1), 1e-12)
    sw = 2.0 ** jnp.round(jnp.log(mabs) / math.log(2.0))
    return (jnp.sign(bw) * sw[:, None]).reshape(w.shape)


def _pack_weight_taps(w, Cp):
    """OIHW (Cout,Cin,3,3) -> (9, Cin, Cp) tap-major bf16 weights, zero-padded out channels."""
    Cout, Cin = w.shape[0], w.shape[1]
    wt = jnp.transpose(w, (2, 3, 1, 0)).reshape(9, Cin, Cout)
    return jnp.pad(wt, ((0, 0), (0, 0), (0, Cp - Cout))).astype(jnp.bfloat16)


def _pad_gamma_beta(g, b, Cp):
    g = jnp.asarray(g, jnp.float32).reshape(1, -1)
    b = jnp.asarray(b, jnp.float32).reshape(1, -1)
    c = g.shape[1]
    # gamma padded with 0 so padded BN lanes fold to scale=0, bias=0 (stay exactly zero).
    return (jnp.pad(g, ((0, 0), (0, Cp - c))),
            jnp.pad(b, ((0, 0), (0, Cp - c))))


def _bn_affine(s8, q8, m, gamma, beta):
    """Fold train-mode (biased-var) BatchNorm into y*scale + bias from partial sums."""
    # TODO(synk): one-pass q/m - mean^2 can lose precision for very large m; switch to
    # mean-shifted accumulation if production batch*spatial counts get large.
    s = jnp.sum(s8, axis=0, keepdims=True)
    q = jnp.sum(q8, axis=0, keepdims=True)
    mean = s / m
    var = jnp.maximum(q / m - mean * mean, 0.0)
    scale = gamma * jax.lax.rsqrt(var + BN_EPS)
    return scale, beta - mean * scale


def _make_phases(xb, Ho, Wo, stride):
    """Spatially pad (conv pad=1) and split into stride*stride phase arrays so every
       3x3 tap inside the kernel is a contiguous (no-stride) window."""
    N, H, W, C = xb.shape
    A = Ho + 2 // stride
    B = Wo + 2 // stride
    Hp, Wp = stride * A, stride * B
    xp = jnp.pad(xb, ((0, 0), (1, Hp - H - 1), (1, Wp - W - 1), (0, 0)))
    return [xp[:, p:p + stride * A:stride, q:q + stride * B:stride, :]
            for p in range(stride) for q in range(stride)]


def _choose_images_per_step(per_core, Mo, stream_bytes_per_img, resident_bytes, budget):
    ib = 1
    for cand in range(1, per_core + 1):
        if per_core % cand:
            continue
        if cand * Mo > _MAX_ROWS_PER_STEP:
            break
        if (cand * Mo) % 8:
            continue
        if 2 * cand * stream_bytes_per_img + resident_bytes <= budget:
            ib = cand
    return ib


def _choose_apply_rows(N, Mo, Cp, n_row_streams, budget):
    rows = Mo
    for cand in range(1, N + 1):
        if N % cand:
            continue
        r = cand * Mo
        if r > _MAX_ROWS_PER_STEP:
            break
        if 2 * n_row_streams * r * Cp * 4 <= budget:
            rows = r
    return rows


def basic_block_forward(x, params, *, stride):
    N, Cin, H, W = x.shape
    w1, w2 = params["w1"], params["w2"]
    Cout = w1.shape[0]
    Cp = _round_up(Cout, _LANE)                 # lane-dense channel axis (mult of 128)
    downsample = (stride != 1 or Cin != Cout)

    Ho = (H + 2 - 3) // stride + 1
    Wo = (W + 2 - 3) // stride + 1
    Mo = Ho * Wo
    M = N * Mo
    x_nhwc = jnp.transpose(x, (0, 2, 3, 1))

    budget = _vmem_budget()
    G = 2 if N % 2 == 0 else 1      # image-axis core split (v7x dual-TC); harmless on 1-TC chips
    per_core = N // G

    # --------------- stage 1: conv1 -> bn1 -> (+shortcut) -> hardtanh ---------------
    phases1 = _make_phases(jnp.sign(x_nhwc).astype(jnp.bfloat16), Ho, Wo, stride)
    w1t = _pack_weight_taps(preprocess_ir_weight(w1), Cp)
    g1, b1 = _pad_gamma_beta(params["g1"], params["b1"], Cp)

    stream1 = sum(p.shape[1] * p.shape[2] for p in phases1) * Cin * 2 + 2 * Mo * Cp * 4
    resident1 = 2 * 9 * Cin * Cp * 2
    if downsample:
        stream1 += Mo * Cin * 4 + 2 * Mo * Cp * 4
        resident1 += 2 * Cin * Cp * 4
    ib1 = _choose_images_per_step(per_core, Mo, stream1, resident1, budget)

    if downsample:
        # 1x1 stride-s shortcut conv (not binarized) stays f32: a sign() of the block
        # output follows, so bf16 rounding here could flip near-zero activations.
        x_sc = x_nhwc[:, ::stride, ::stride, :][:, :Ho, :Wo, :]
        w_sc = jnp.pad(params["w_sc"].reshape(Cout, Cin).T.astype(jnp.float32),
                       ((0, 0), (0, Cp - Cout)))
        g_sc, b_sc = _pad_gamma_beta(params["g_sc"], params["b_sc"], Cp)
        y1, y_sc, s1, q1, ssc, qsc = _conv_stats_call(
            phases1, w1t, x_sc, w_sc, stride=stride, Ho=Ho, Wo=Wo, IB=ib1, G=G)
        scale1, bias1 = _bn_affine(s1, q1, M, g1, b1)
        scale_sc, bias_sc = _bn_affine(ssc, qsc, M, g_sc, b_sc)
        rows = _choose_apply_rows(N, Mo, Cp, 3, budget)
        out1 = _apply_ds_call(y1, scale1, bias1, y_sc, scale_sc, bias_sc, rows)
    else:
        res1 = jnp.pad(x_nhwc.reshape(M, Cin), ((0, 0), (0, Cp - Cin)))
        y1, s1, q1 = _conv_stats_call(
            phases1, w1t, None, None, stride=stride, Ho=Ho, Wo=Wo, IB=ib1, G=G)
        scale1, bias1 = _bn_affine(s1, q1, M, g1, b1)
        rows = _choose_apply_rows(N, Mo, Cp, 3, budget)
        out1 = _apply_call(y1, scale1, bias1, res1, rows)

    # --------------- stage 2: conv2 -> bn2 -> (+out1) -> hardtanh ---------------
    out1_img = out1[:, :Cout].reshape(N, Ho, Wo, Cout)
    phases2 = _make_phases(jnp.sign(out1_img).astype(jnp.bfloat16), Ho, Wo, 1)
    w2t = _pack_weight_taps(preprocess_ir_weight(w2), Cp)
    g2, b2 = _pad_gamma_beta(params["g2"], params["b2"], Cp)

    stream2 = phases2[0].shape[1] * phases2[0].shape[2] * Cout * 2 + 2 * Mo * Cp * 4
    resident2 = 2 * 9 * Cout * Cp * 2
    ib2 = _choose_images_per_step(per_core, Mo, stream2, resident2, budget)

    y2, s2, q2 = _conv_stats_call(phases2, w2t, None, None,
                                  stride=1, Ho=Ho, Wo=Wo, IB=ib2, G=G)
    scale2, bias2 = _bn_affine(s2, q2, M, g2, b2)
    out2 = _apply_call(y2, scale2, bias2, out1, rows)

    return out2[:, :Cout].reshape(N, Ho, Wo, Cout).transpose(0, 3, 1, 2)


# ---------------------------- pure-JAX reference ---------------------------- #

def reference_basic_block(x, params, stride):
    def bn(y, gamma, beta):
        mean = y.mean(axis=(0, 2, 3), keepdims=True)
        var = ((y - mean) ** 2).mean(axis=(0, 2, 3), keepdims=True)
        return (y - mean) / jnp.sqrt(var + BN_EPS) * gamma.reshape(1, -1, 1, 1) \
            + beta.reshape(1, -1, 1, 1)

    def irconv(a, w, s):
        return jax.lax.conv_general_dilated(
            jnp.sign(a), preprocess_ir_weight(w), (s, s), ((1, 1), (1, 1)),
            dimension_numbers=("NCHW", "OIHW", "NCHW"))

    Cin, Cout = x.shape[1], params["w1"].shape[0]
    out = bn(irconv(x, params["w1"], stride), params["g1"], params["b1"])
    if stride != 1 or Cin != Cout:
        sc = jax.lax.conv_general_dilated(
            x, params["w_sc"], (stride, stride), ((0, 0), (0, 0)),
            dimension_numbers=("NCHW", "OIHW", "NCHW"))
        sc = bn(sc, params["g_sc"], params["b_sc"])
    else:
        sc = x
    out = jnp.clip(out + sc, -1.0, 1.0)
    residual = out
    out = bn(irconv(out, params["w2"], 1), params["g2"], params["b2"])
    return jnp.clip(out + residual, -1.0, 1.0)


# ----------------------------------- main ----------------------------------- #

if __name__ == "__main__":
    # TODO(synk): only the forward pass is implemented; BinaryQuantize's straight-through
    # backward (k*t*(1-tanh(x*t)^2)) is autograd-only and has no forward-pass equivalent.
    fwd = jax.jit(basic_block_forward, static_argnames="stride")

    # ---- config A: stride-2 block exercising the fused downsampling 1x1-conv+BN shortcut ----
    key = jax.random.PRNGKey(0)
    N, Cin, H, W = 2, 4, 16, 16
    planes, stride = 8, 2
    ks = jax.random.split(key, 10)
    x = jax.random.normal(ks[0], (N, Cin, H, W), jnp.float32)
    params = {
        "w1": jax.random.normal(ks[1], (planes, Cin, 3, 3), jnp.float32) * 0.1,
        "w2": jax.random.normal(ks[2], (planes, planes, 3, 3), jnp.float32) * 0.1,
        "w_sc": jax.random.normal(ks[3], (planes, Cin, 1, 1), jnp.float32) * 0.1,
        "g1": 1.0 + 0.1 * jax.random.normal(ks[4], (1, planes), jnp.float32),
        "b1": 0.1 * jax.random.normal(ks[5], (1, planes), jnp.float32),
        "g2": 1.0 + 0.1 * jax.random.normal(ks[6], (1, planes), jnp.float32),
        "b2": 0.1 * jax.random.normal(ks[7], (1, planes), jnp.float32),
        "g_sc": 1.0 + 0.1 * jax.random.normal(ks[8], (1, planes), jnp.float32),
        "b_sc": 0.1 * jax.random.normal(ks[9], (1, planes), jnp.float32),
    }
    out = jax.block_until_ready(fwd(x, params, stride=stride))
    assert out.shape == (N, planes, H // stride, W // stride), out.shape
    ref = reference_basic_block(x, params, stride)
    np.testing.assert_allclose(np.asarray(out), np.asarray(ref), rtol=1e-3, atol=3e-3)

    # ---- config B: stride-1 block exercising the identity shortcut ----
    ks2 = jax.random.split(jax.random.PRNGKey(1), 7)
    x2 = jax.random.normal(ks2[0], (N, planes, H, W), jnp.float32)
    params2 = {
        "w1": jax.random.normal(ks2[1], (planes, planes, 3, 3), jnp.float32) * 0.1,
        "w2": jax.random.normal(ks2[2], (planes, planes, 3, 3), jnp.float32) * 0.1,
        "g1": 1.0 + 0.1 * jax.random.normal(ks2[3], (1, planes), jnp.float32),
        "b1": 0.1 * jax.random.normal(ks2[4], (1, planes), jnp.float32),
        "g2": 1.0 + 0.1 * jax.random.normal(ks2[5], (1, planes), jnp.float32),
        "b2": 0.1 * jax.random.normal(ks2[6], (1, planes), jnp.float32),
    }
    out2 = jax.block_until_ready(fwd(x2, params2, stride=1))
    assert out2.shape == (N, planes, H, W), out2.shape
    ref2 = reference_basic_block(x2, params2, 1)
    np.testing.assert_allclose(np.asarray(out2), np.asarray(ref2), rtol=1e-3, atol=3e-3)

    print("KERNEL_OK")
</pallas_src>

<mosaic_0001>
module attributes {stable_mosaic.version = 11 : i64} {
  func.func @kernel(%arg0: i32, %arg1: i32, %arg2: memref<1x9x9x4xbf16, #tpu.memory_space<vmem>>, %arg3: memref<1x9x9x4xbf16, #tpu.memory_space<vmem>>, %arg4: memref<1x9x9x4xbf16, #tpu.memory_space<vmem>>, %arg5: memref<1x9x9x4xbf16, #tpu.memory_space<vmem>>, %arg6: memref<9x4x128xbf16, #tpu.memory_space<vmem>>, %arg7: memref<1x8x8x4xf32, #tpu.memory_space<vmem>>, %arg8: memref<4x128xf32, #tpu.memory_space<vmem>>, %arg9: memref<64x128xf32, #tpu.memory_space<vmem>>, %arg10: memref<64x128xf32, #tpu.memory_space<vmem>>, %arg11: memref<8x128xf32, #tpu.memory_space<vmem>>, %arg12: memref<8x128xf32, #tpu.memory_space<vmem>>, %arg13: memref<8x128xf32, #tpu.memory_space<vmem>>, %arg14: memref<8x128xf32, #tpu.memory_space<vmem>>) attributes {dimension_semantics = [#tpu.dimension_semantics<parallel>, #tpu.dimension_semantics<arbitrary>], iteration_bounds = array<i64: 2, 1>, scalar_prefetch = 0 : i64, scratch_operands = 0 : i64, tpu.core_type = #tpu.core_type<tc>, window_params = [{transform_indices = @transform_0, window_bounds = array<i64: 1, 9, 9, 4>}, {transform_indices = @transform_1, window_bounds = array<i64: 1, 9, 9, 4>}, {transform_indices = @transform_2, window_bounds = array<i64: 1, 9, 9, 4>}, {transform_indices = @transform_3, window_bounds = array<i64: 1, 9, 9, 4>}, {pipeline_mode = #tpu.pipeline_mode<synchronous>, transform_indices = @transform_4, window_bounds = array<i64: 9, 4, 128>}, {transform_indices = @transform_5, window_bounds = array<i64: 1, 8, 8, 4>}, {pipeline_mode = #tpu.pipeline_mode<synchronous>, transform_indices = @transform_6, window_bounds = array<i64: 4, 128>}, {transform_indices = @transform_7, window_bounds = array<i64: 64, 128>}, {transform_indices = @transform_8, window_bounds = array<i64: 64, 128>}, {transform_indices = @transform_9, window_bounds = array<i64: 8, 128>}, {transform_indices = @transform_10, window_bounds = array<i64: 8, 128>}, {transform_indices = @transform_11, window_bounds = array<i64: 8, 128>}, {transform_indices = @transform_12, window_bounds = array<i64: 8, 128>}]} {
    %c0_i32 = arith.constant 0 : i32
    %0 = arith.cmpi eq, %arg1, %c0_i32 : i32
    %1 = arith.extui %0 : i1 to i32
    %c0_i32_0 = arith.constant 0 : i32
    %2 = arith.cmpi ne, %1, %c0_i32_0 : i32
    scf.if %2 {
      %cst_95 = arith.constant 0.000000e+00 : f32
      %86 = vector.broadcast %cst_95 : f32 to vector<8x128xf32>
      %c0_96 = arith.constant 0 : index
      %c0_97 = arith.constant 0 : index
      %87 = vector.load %arg11[%c0_96, %c0_97] : memref<8x128xf32, #tpu.memory_space<vmem>>, vector<8x128xf32>
      tpu.vector_store %arg11[%c0_96, %c0_97], %86 {strides = array<i32>} : memref<8x128xf32, #tpu.memory_space<vmem>>, vector<8x128xf32>,
      %cst_98 = arith.constant 0.000000e+00 : f32
      %88 = vector.broadcast %cst_98 : f32 to vector<8x128xf32>
      %c0_99 = arith.constant 0 : index
      %c0_100 = arith.constant 0 : index
      %89 = vector.load %arg12[%c0_99, %c0_100] : memref<8x128xf32, #tpu.memory_space<vmem>>, vector<8x128xf32>
      tpu.vector_store %arg12[%c0_99, %c0_100], %88 {strides = array<i32>} : memref<8x128xf32, #tpu.memory_space<vmem>>, vector<8x128xf32>,
      %cst_101 = arith.constant 0.000000e+00 : f32
      %90 = vector.broadcast %cst_101 : f32 to vector<8x128xf32>
      %c0_102 = arith.constant 0 : index
      %c0_103 = arith.constant 0 : index
      %91 = vector.load %arg13[%c0_102, %c0_103] : memref<8x128xf32, #tpu.memory_space<vmem>>, vector<8x128xf32>
      tpu.vector_store %arg13[%c0_102, %c0_103], %90 {strides = array<i32>} : memref<8x128xf32, #tpu.memory_space<vmem>>, vector<8x128xf32>,
      %cst_104 = arith.constant 0.000000e+00 : f32
      %92 = vector.broadcast %cst_104 : f32 to vector<8x128xf32>
      %c0_105 = arith.constant 0 : index
      %c0_106 = arith.constant 0 : index
      %93 = vector.load %arg14[%c0_105, %c0_106] : memref<8x128xf32, #tpu.memory_space<vmem>>, vector<8x128xf32>
      tpu.vector_store %arg14[%c0_105, %c0_106], %92 {strides = array<i32>} : memref<8x128xf32, #tpu.memory_space<vmem>>, vector<8x128xf32>,
    } else {
    }
    %cst = arith.constant 0.000000e+00 : f32
    %3 = vector.broadcast %cst : f32 to vector<64x128xf32>
    %c0 = arith.constant 0 : index
    %c0_1 = arith.constant 0 : index
    %c0_2 = arith.constant 0 : index
    %c0_3 = arith.constant 0 : index
    %4 = vector.load %arg2[%c0, %c0_1, %c0_2, %c0_3] : memref<1x9x9x4xbf16, #tpu.memory_space<vmem>>, vector<1x8x8x4xbf16>
    %5 = vector.shape_cast %4 : vector<1x8x8x4xbf16> to vector<64x4xbf16>
    %c0_4 = arith.constant 0 : index
    %c0_5 = arith.constant 0 : index
    %c0_6 = arith.constant 0 : index
    %6 = vector.load %arg6[%c0_4, %c0_5, %c0_6] : memref<9x4x128xbf16, #tpu.memory_space<vmem>>, vector<1x4x128xbf16>
    %7 = vector.shape_cast %6 : vector<1x4x128xbf16> to vector<4x128xbf16>
    %cst_7 = arith.constant dense<0.000000e+00> : vector<64x128xf32>
    %8 = tpu.matmul %5, %7, %cst_7 {dimension_numbers = #tpu.dot_dimension_numbers<[1], [0], [0], [1], [0, 0, 1, 1], [], []>} : vector<64x4xbf16>, vector<4x128xbf16>, vector<64x128xf32> -> vector<64x128xf32>
    %9 = arith.addf %3, %8 : vector<64x128xf32>
    %c0_8 = arith.constant 0 : index
    %c0_9 = arith.constant 0 : index
    %c0_10 = arith.constant 0 : index
    %c0_11 = arith.constant 0 : index
    %10 = vector.load %arg3[%c0_8, %c0_9, %c0_10, %c0_11] : memref<1x9x9x4xbf16, #tpu.memory_space<vmem>>, vector<1x8x8x4xbf16>
    %11 = vector.shape_cast %10 : vector<1x8x8x4xbf16> to vector<64x4xbf16>
    %c1 = arith.constant 1 : index
    %c0_12 = arith.constant 0 : index
    %c0_13 = arith.constant 0 : index
    %12 = vector.load %arg6[%c1, %c0_12, %c0_13] : memref<9x4x128xbf16, #tpu.memory_space<vmem>>, vector<1x4x128xbf16>
    %13 = vector.shape_cast %12 : vector<1x4x128xbf16> to vector<4x128xbf16>
    %cst_14 = arith.constant dense<0.000000e+00> : vector<64x128xf32>
    %14 = tpu.matmul %11, %13, %cst_14 {dimension_numbers = #tpu.dot_dimension_numbers<[1], [0], [0], [1], [0, 0, 1, 1], [], []>} : vector<64x4xbf16>, vector<4x128xbf16>, vector<64x128xf32> -> vector<64x128xf32>
    %15 = arith.addf %9, %14 : vector<64x128xf32>
    %c0_15 = arith.constant 0 : index
    %c0_16 = arith.constant 0 : index
    %c1_17 = arith.constant 1 : index
    %c0_18 = arith.constant 0 : index
    %16 = vector.load %arg2[%c0_15, %c0_16, %c1_17, %c0_18] : memref<1x9x9x4xbf16, #tpu.memory_space<vmem>>, vector<1x8x8x4xbf16>
    %17 = vector.shape_cast %16 : vector<1x8x8x4xbf16> to vector<64x4xbf16>
    %c2 = arith.constant 2 : index
    %c0_19 = arith.constant 0 : index
    %c0_20 = arith.constant 0 : index
    %18 = vector.load %arg6[%c2, %c0_19, %c0_20] : memref<9x4x128xbf16, #tpu.memory_space<vmem>>, vector<1x4x128xbf16>
    %19 = vector.shape_cast %18 : vector<1x4x128xbf16> to vector<4x128xbf16>
    %cst_21 = arith.constant dense<0.000000e+00> : vector<64x128xf32>
    %20 = tpu.matmul %17, %19, %cst_21 {dimension_numbers = #tpu.dot_dimension_numbers<[1], [0], [0], [1], [0, 0, 1, 1], [], []>} : vector<64x4xbf16>, vector<4x128xbf16>, vector<64x128xf32> -> vector<64x128xf32>
    %21 = arith.addf %15, %20 : vector<64x128xf32>
    %c0_22 = arith.constant 0 : index
    %c0_23 = arith.constant 0 : index
    %c0_24 = arith.constant 0 : index
    %c0_25 = arith.constant 0 : index
    %22 = vector.load %arg4[%c0_22, %c0_23, %c0_24, %c0_25] : memref<1x9x9x4xbf16, #tpu.memory_space<vmem>>, vector<1x8x8x4xbf16>
    %23 = vector.shape_cast %22 : vector<1x8x8x4xbf16> to vector<64x4xbf16>
    %c3 = arith.constant 3 : index
    %c0_26 = arith.constant 0 : index
    %c0_27 = arith.constant 0 : index
    %24 = vector.load %arg6[%c3, %c0_26, %c0_27] : memref<9x4x128xbf16, #tpu.memory_space<vmem>>, vector<1x4x128xbf16>
    %25 = vector.shape_cast %24 : vector<1x4x128xbf16> to vector<4x128xbf16>
    %cst_28 = arith.constant dense<0.000000e+00> : vector<64x128xf32>
    %26 = tpu.matmul %23, %25, %cst_28 {dimension_numbers = #tpu.dot_dimension_numbers<[1], [0], [0], [1], [0, 0, 1, 1], [], []>} : vector<64x4xbf16>, vector<4x128xbf16>, vector<64x128xf32> -> vector<64x128xf32>
    %27 = arith.addf %21, %26 : vector<64x128xf32>
    %c0_29 = arith.constant 0 : index
    %c0_30 = arith.constant 0 : index
    %c0_31 = arith.constant 0 : index
    %c0_32 = arith.constant 0 : index
    %28 = vector.load %arg5[%c0_29, %c0_30, %c0_31, %c0_32] : memref<1x9x9x4xbf16, #tpu.memory_space<vmem>>, vector<1x8x8x4xbf16>
    %29 = vector.shape_cast %28 : vector<1x8x8x4xbf16> to vector<64x4xbf16>
    %c4 = arith.constant 4 : index
    %c0_33 = arith.constant 0 : index
    %c0_34 = arith.constant 0 : index
    %30 = vector.load %arg6[%c4, %c0_33, %c0_34] : memref<9x4x128xbf16, #tpu.memory_space<vmem>>, vector<1x4x128xbf16>
    %31 = vector.shape_cast %30 : vector<1x4x128xbf16> to vector<4x128xbf16>
    %cst_35 = arith.constant dense<0.000000e+00> : vector<64x128xf32>
    %32 = tpu.matmul %29, %31, %cst_35 {dimension_numbers = #tpu.dot_dimension_numbers<[1], [0], [0], [1], [0, 0, 1, 1], [], []>} : vector<64x4xbf16>, vector<4x128xbf16>, vector<64x128xf32> -> vector<64x128xf32>
    %33 = arith.addf %27, %32 : vector<64x128xf32>
    %c0_36 = arith.constant 0 : index
    %c0_37 = arith.constant 0 : index
    %c1_38 = arith.constant 1 : index
    %c0_39 = arith.constant 0 : index
    %34 = vector.load %arg4[%c0_36, %c0_37, %c1_38, %c0_39] : memref<1x9x9x4xbf16, #tpu.memory_space<vmem>>, vector<1x8x8x4xbf16>
    %35 = vector.shape_cast %34 : vector<1x8x8x4xbf16> to vector<64x4xbf16>
    %c5 = arith.constant 5 : index
    %c0_40 = arith.constant 0 : index
    %c0_41 = arith.constant 0 : index
    %36 = vector.load %arg6[%c5, %c0_40, %c0_41] : memref<9x4x128xbf16, #tpu.memory_space<vmem>>, vector<1x4x128xbf16>
    %37 = vector.shape_cast %36 : vector<1x4x128xbf16> to vector<4x128xbf16>
    %cst_42 = arith.constant dense<0.000000e+00> : vector<64x128xf32>
    %38 = tpu.matmul %35, %37, %cst_42 {dimension_numbers = #tpu.dot_dimension_numbers<[1], [0], [0], [1], [0, 0, 1, 1], [], []>} : vector<64x4xbf16>, vector<4x128xbf16>, vector<64x128xf32> -> vector<64x128xf32>
    %39 = arith.addf %33, %38 : vector<64x128xf32>
    %c0_43 = arith.constant 0 : index
    %c1_44 = arith.constant 1 : index
    %c0_45 = arith.constant 0 : index
    %c0_46 = arith.constant 0 : index
    %40 = vector.load %arg2[%c0_43, %c1_44, %c0_45, %c0_46] : memref<1x9x9x4xbf16, #tpu.memory_space<vmem>>, vector<1x8x8x4xbf16>
    %41 = vector.shape_cast %40 : vector<1x8x8x4xbf16> to vector<64x4xbf16>
    %c6 = arith.constant 6 : index
    %c0_47 = arith.constant 0 : index
    %c0_48 = arith.constant 0 : index
    %42 = vector.load %arg6[%c6, %c0_47, %c0_48] : memref<9x4x128xbf16, #tpu.memory_space<vmem>>, vector<1x4x128xbf16>
    %43 = vector.shape_cast %42 : vector<1x4x128xbf16> to vector<4x128xbf16>
    %cst_49 = arith.constant dense<0.000000e+00> : vector<64x128xf32>
    %44 = tpu.matmul %41, %43, %cst_49 {dimension_numbers = #tpu.dot_dimension_numbers<[1], [0], [0], [1], [0, 0, 1, 1], [], []>} : vector<64x4xbf16>, vector<4x128xbf16>, vector<64x128xf32> -> vector<64x128xf32>
    %45 = arith.addf %39, %44 : vector<64x128xf32>
    %c0_50 = arith.constant 0 : index
    %c1_51 = arith.constant 1 : index
    %c0_52 = arith.constant 0 : index
    %c0_53 = arith.constant 0 : index
    %46 = vector.load %arg3[%c0_50, %c1_51, %c0_52, %c0_53] : memref<1x9x9x4xbf16, #tpu.memory_space<vmem>>, vector<1x8x8x4xbf16>
    %47 = vector.shape_cast %46 : vector<1x8x8x4xbf16> to vector<64x4xbf16>
    %c7 = arith.constant 7 : index
    %c0_54 = arith.constant 0 : index
    %c0_55 = arith.constant 0 : index
    %48 = vector.load %arg6[%c7, %c0_54, %c0_55] : memref<9x4x128xbf16, #tpu.memory_space<vmem>>, vector<1x4x128xbf16>
    %49 = vector.shape_cast %48 : vector<1x4x128xbf16> to vector<4x128xbf16>
    %cst_56 = arith.constant dense<0.000000e+00> : vector<64x128xf32>
    %50 = tpu.matmul %47, %49, %cst_56 {dimension_numbers = #tpu.dot_dimension_numbers<[1], [0], [0], [1], [0, 0, 1, 1], [], []>} : vector<64x4xbf16>, vector<4x128xbf16>, vector<64x128xf32> -> vector<64x128xf32>
    %51 = arith.addf %45, %50 : vector<64x128xf32>
    %c0_57 = arith.constant 0 : index
    %c1_58 = arith.constant 1 : index
    %c1_59 = arith.constant 1 : index
    %c0_60 = arith.constant 0 : index
    %52 = vector.load %arg2[%c0_57, %c1_58, %c1_59, %c0_60] : memref<1x9x9x4xbf16, #tpu.memory_space<vmem>>, vector<1x8x8x4xbf16>
    %53 = vector.shape_cast %52 : vector<1x8x8x4xbf16> to vector<64x4xbf16>
    %c8 = arith.constant 8 : index
    %c0_61 = arith.constant 0 : index
    %c0_62 = arith.constant 0 : index
    %54 = vector.load %arg6[%c8, %c0_61, %c0_62] : memref<9x4x128xbf16, #tpu.memory_space<vmem>>, vector<1x4x128xbf16>
    %55 = vector.shape_cast %54 : vector<1x4x128xbf16> to vector<4x128xbf16>
    %cst_63 = arith.constant dense<0.000000e+00> : vector<64x128xf32>
    %56 = tpu.matmul %53, %55, %cst_63 {dimension_numbers = #tpu.dot_dimension_numbers<[1], [0], [0], [1], [0, 0, 1, 1], [], []>} : vector<64x4xbf16>, vector<4x128xbf16>, vector<64x128xf32> -> vector<64x128xf32>
    %57 = arith.addf %51, %56 : vector<64x128xf32>
    %c0_64 = arith.constant 0 : index
    %c0_65 = arith.constant 0 : index
    %58 = vector.load %arg9[%c0_64, %c0_65] : memref<64x128xf32, #tpu.memory_space<vmem>>, vector<64x128xf32>
    tpu.vector_store %arg9[%c0_64, %c0_65], %57 {strides = array<i32>} : memref<64x128xf32, #tpu.memory_space<vmem>>, vector<64x128xf32>,
    %c0_66 = arith.constant 0 : index
    %c0_67 = arith.constant 0 : index
    %59 = vector.load %arg11[%c0_66, %c0_67] : memref<8x128xf32, #tpu.memory_space<vmem>>, vector<8x128xf32>
    %60 = vector.shape_cast %57 : vector<64x128xf32> to vector<8x8x128xf32>
    %cst_68 = arith.constant dense<0.000000e+00> : vector<8x128xf32>
    %61 = vector.multi_reduction <add>, %60, %cst_68 [0] : vector<8x8x128xf32> to vector<8x128xf32>
    %62 = arith.addf %59, %61 : vector<8x128xf32>
    %c0_69 = arith.constant 0 : index
    %c0_70 = arith.constant 0 : index
    %63 = vector.load %arg11[%c0_69, %c0_70] : memref<8x128xf32, #tpu.memory_space<vmem>>, vector<8x128xf32>
    tpu.vector_store %arg11[%c0_69, %c0_70], %62 {strides = array<i32>} : memref<8x128xf32, #tpu.memory_space<vmem>>, vector<8x128xf32>,
    %c0_71 = arith.constant 0 : index
    %c0_72 = arith.constant 0 : index
    %64 = vector.load %arg12[%c0_71, %c0_72] : memref<8x128xf32, #tpu.memory_space<vmem>>, vector<8x128xf32>
    %65 = arith.mulf %57, %57 : vector<64x128xf32>
    %66 = vector.shape_cast %65 : vector<64x128xf32> to vector<8x8x128xf32>
    %cst_73 = arith.constant dense<0.000000e+00> : vector<8x128xf32>
    %67 = vector.multi_reduction <add>, %66, %cst_73 [0] : vector<8x8x128xf32> to vector<8x128xf32>
    %68 = arith.addf %64, %67 : vector<8x128xf32>
    %c0_74 = arith.constant 0 : index
    %c0_75 = arith.constant 0 : index
    %69 = vector.load %arg12[%c0_74, %c0_75] : memref<8x128xf32, #tpu.memory_space<vmem>>, vector<8x128xf32>
    tpu.vector_store %arg12[%c0_74, %c0_75], %68 {strides = array<i32>} : memref<8x128xf32, #tpu.memory_space<vmem>>, vector<8x128xf32>,
    %c0_76 = arith.constant 0 : index
    %c0_77 = arith.constant 0 : index
    %c0_78 = arith.constant 0 : index
    %c0_79 = arith.constant 0 : index
    %70 = vector.load %arg7[%c0_76, %c0_77, %c0_78, %c0_79] : memref<1x8x8x4xf32, #tpu.memory_space<vmem>>, vector<1x8x8x4xf32>
    %71 = vector.shape_cast %70 : vector<1x8x8x4xf32> to vector<64x4xf32>
    %c0_80 = arith.constant 0 : index
    %c0_81 = arith.constant 0 : index
    %72 = vector.load %arg8[%c0_80, %c0_81] : memref<4x128xf32, #tpu.memory_space<vmem>>, vector<4x128xf32>
    %cst_82 = arith.constant dense<0.000000e+00> : vector<64x128xf32>
    %73 = tpu.matmul %71, %72, %cst_82 {dimension_numbers = #tpu.dot_dimension_numbers<[1], [0], [0], [1], [0, 0, 1, 1], [], []>} : vector<64x4xf32>, vector<4x128xf32>, vector<64x128xf32> -> vector<64x128xf32>
    %c0_83 = arith.constant 0 : index
    %c0_84 = arith.constant 0 : index
    %74 = vector.load %arg10[%c0_83, %c0_84] : memref<64x128xf32, #tpu.memory_space<vmem>>, vector<64x128xf32>
    tpu.vector_store %arg10[%c0_83, %c0_84], %73 {strides = array<i32>} : memref<64x128xf32, #tpu.memory_space<vmem>>, vector<64x128xf32>,
    %c0_85 = arith.constant 0 : index
    %c0_86 = arith.constant 0 : index
    %75 = vector.load %arg13[%c0_85, %c0_86] : memref<8x128xf32, #tpu.memory_space<vmem>>, vector<8x128xf32>
    %76 = vector.shape_cast %73 : vector<64x128xf32> to vector<8x8x128xf32>
    %cst_87 = arith.constant dense<0.000000e+00> : vector<8x128xf32>
    %77 = vector.multi_reduction <add>, %76, %cst_87 [0] : vector<8x8x128xf32> to vector<8x128xf32>
    %78 = arith.addf %75, %77 : vector<8x128xf32>
    %c0_88 = arith.constant 0 : index
    %c0_89 = arith.constant 0 : index
    %79 = vector.load %arg13[%c0_88, %c0_89] : memref<8x128xf32, #tpu.memory_space<vmem>>, vector<8x128xf32>
    tpu.vector_store %arg13[%c0_88, %c0_89], %78 {strides = array<i32>} : memref<8x128xf32, #tpu.memory_space<vmem>>, vector<8x128xf32>,
    %c0_90 = arith.constant 0 : index
    %c0_91 = arith.constant 0 : index
    %80 = vector.load %arg14[%c0_90, %c0_91] : memref<8x128xf32, #tpu.memory_space<vmem>>, vector<8x128xf32>
    %81 = arith.mulf %73, %73 : vector<64x128xf32>
    %82 = vector.shape_cast %81 : vector<64x128xf32> to vector<8x8x128xf32>
    %cst_92 = arith.constant dense<0.000000e+00> : vector<8x128xf32>
    %83 = vector.multi_reduction <add>, %82, %cst_92 [0] : vector<8x8x128xf32> to vector<8x128xf32>
    %84 = arith.addf %80, %83 : vector<8x128xf32>
    %c0_93 = arith.constant 0 : index
    %c0_94 = arith.constant 0 : index
    %85 = vector.load %arg14[%c0_93, %c0_94] : memref<8x128xf32, #tpu.memory_space<vmem>>, vector<8x128xf32>
    tpu.vector_store %arg14[%c0_93, %c0_94], %84 {strides = array<i32>} : memref<8x128xf32, #tpu.memory_space<vmem>>, vector<8x128xf32>,
    return
  }
  func.func @transform_0(%arg0: i32, %arg1: i32) -> (i32, i32, i32, i32) {
    %c1_i32 = arith.constant 1 : i32
    %0 = arith.muli %arg0, %c1_i32 : i32
    %1 = arith.addi %0, %arg1 : i32
    %c0_i32 = arith.constant 0 : i32
    %c0_i32_0 = arith.constant 0 : i32
    %c0_i32_1 = arith.constant 0 : i32
    %c0_i32_2 = arith.constant 0 : i32
    return %1, %c0_i32, %c0_i32_0, %c0_i32_1 : i32, i32, i32, i32
  }
  func.func @transform_1(%arg0: i32, %arg1: i32) -> (i32, i32, i32, i32) {
    %c1_i32 = arith.constant 1 : i32
    %0 = arith.muli %arg0, %c1_i32 : i32
    %1 = arith.addi %0, %arg1 : i32
    %c0_i32 = arith.constant 0 : i32
    %c0_i32_0 = arith.constant 0 : i32
    %c0_i32_1 = arith.constant 0 : i32
    %c0_i32_2 = arith.constant 0 : i32
    return %1, %c0_i32, %c0_i32_0, %c0_i32_1 : i32, i32, i32, i32
  }
  func.func @transform_2(%arg0: i32, %arg1: i32) -> (i32, i32, i32, i32) {
    %c1_i32 = arith.constant 1 : i32
    %0 = arith.muli %arg0, %c1_i32 : i32
    %1 = arith.addi %0, %arg1 : i32
    %c0_i32 = arith.constant 0 : i32
    %c0_i32_0 = arith.constant 0 : i32
    %c0_i32_1 = arith.constant 0 : i32
    %c0_i32_2 = arith.constant 0 : i32
    return %1, %c0_i32, %c0_i32_0, %c0_i32_1 : i32, i32, i32, i32
  }
  func.func @transform_3(%arg0: i32, %arg1: i32) -> (i32, i32, i32, i32) {
    %c1_i32 = arith.constant 1 : i32
    %0 = arith.muli %arg0, %c1_i32 : i32
    %1 = arith.addi %0, %arg1 : i32
    %c0_i32 = arith.constant 0 : i32
    %c0_i32_0 = arith.constant 0 : i32
    %c0_i32_1 = arith.constant 0 : i32
    %c0_i32_2 = arith.constant 0 : i32
    return %1, %c0_i32, %c0_i32_0, %c0_i32_1 : i32, i32, i32, i32
  }
  func.func @transform_4(%arg0: i32, %arg1: i32) -> (i32, i32, i32) {
    %c0_i32 = arith.constant 0 : i32
    %c0_i32_0 = arith.constant 0 : i32
    %c0_i32_1 = arith.constant 0 : i32
    %c0_i32_2 = arith.constant 0 : i32
    return %c0_i32, %c0_i32_0, %c0_i32_1 : i32, i32, i32
  }
  func.func @transform_5(%arg0: i32, %arg1: i32) -> (i32, i32, i32, i32) {
    %c1_i32 = arith.constant 1 : i32
    %0 = arith.muli %arg0, %c1_i32 : i32
    %1 = arith.addi %0, %arg1 : i32
    %c0_i32 = arith.constant 0 : i32
    %c0_i32_0 = arith.constant 0 : i32
    %c0_i32_1 = arith.constant 0 : i32
    %c0_i32_2 = arith.constant 0 : i32
    return %1, %c0_i32, %c0_i32_0, %c0_i32_1 : i32, i32, i32, i32
  }
  func.func @transform_6(%arg0: i32, %arg1: i32) -> (i32, i32) {
    %c0_i32 = arith.constant 0 : i32
    %c0_i32_0 = arith.constant 0 : i32
    %c0_i32_1 = arith.constant 0 : i32
    return %c0_i32, %c0_i32_0 : i32, i32
  }
  func.func @transform_7(%arg0: i32, %arg1: i32) -> (i32, i32) {
    %c1_i32 = arith.constant 1 : i32
    %0 = arith.muli %arg0, %c1_i32 : i32
    %1 = arith.addi %0, %arg1 : i32
    %c0_i32 = arith.constant 0 : i32
    %c0_i32_0 = arith.constant 0 : i32
    return %1, %c0_i32 : i32, i32
  }
  func.func @transform_8(%arg0: i32, %arg1: i32) -> (i32, i32) {
    %c1_i32 = arith.constant 1 : i32
    %0 = arith.muli %arg0, %c1_i32 : i32
    %1 = arith.addi %0, %arg1 : i32
    %c0_i32 = arith.constant 0 : i32
    %c0_i32_0 = arith.constant 0 : i32
    return %1, %c0_i32 : i32, i32
  }
  func.func @transform_9(%arg0: i32, %arg1: i32) -> (i32, i32) {
    %c0_i32 = arith.constant 0 : i32
    %c0_i32_0 = arith.constant 0 : i32
    return %arg0, %c0_i32 : i32, i32
  }
  func.func @transform_10(%arg0: i32, %arg1: i32) -> (i32, i32) {
    %c0_i32 = arith.constant 0 : i32
    %c0_i32_0 = arith.constant 0 : i32
    return %arg0, %c0_i32 : i32, i32
  }
  func.func @transform_11(%arg0: i32, %arg1: i32) -> (i32, i32) {
    %c0_i32 = arith.constant 0 : i32
    %c0_i32_0 = arith.constant 0 : i32
    return %arg0, %c0_i32 : i32, i32
  }
  func.func @transform_12(%arg0: i32, %arg1: i32) -> (i32, i32) {
    %c0_i32 = arith.constant 0 : i32
    %c0_i32_0 = arith.constant 0 : i32
    return %arg0, %c0_i32 : i32, i32
  }
}

module attributes {stable_mosaic.version = 11 : i64} {
  func.func @_apply_ds_kernel(%arg0: i32, %arg1: memref<128x128xf32, #tpu.memory_space<vmem>>, %arg2: memref<1x128xf32, #tpu.memory_space<vmem>>, %arg3: memref<1x128xf32, #tpu.memory_space<vmem>>, %arg4: memref<128x128xf32, #tpu.memory_space<vmem>>, %arg5: memref<1x128xf32, #tpu.memory_space<vmem>>, %arg6: memref<1x128xf32, #tpu.memory_space<vmem>>, %arg7: memref<128x128xf32, #tpu.memory_space<vmem>>) attributes {dimension_semantics = [#tpu.dimension_semantics<parallel>], iteration_bounds = array<i64: 1>, scalar_prefetch = 0 : i64, scratch_operands = 0 : i64, tpu.core_type = #tpu.core_type<tc>, window_params = [{transform_indices = @transform_0, window_bounds = array<i64: 128, 128>}, {pipeline_mode = #tpu.pipeline_mode<synchronous>, transform_indices = @transform_1, window_bounds = array<i64: 1, 128>}, {pipeline_mode = #tpu.pipeline_mode<synchronous>, transform_indices = @transform_2, window_bounds = array<i64: 1, 128>}, {transform_indices = @transform_3, window_bounds = array<i64: 128, 128>}, {pipeline_mode = #tpu.pipeline_mode<synchronous>, transform_indices = @transform_4, window_bounds = array<i64: 1, 128>}, {pipeline_mode = #tpu.pipeline_mode<synchronous>, transform_indices = @transform_5, window_bounds = array<i64: 1, 128>}, {transform_indices = @transform_6, window_bounds = array<i64: 128, 128>}]} {
    %c0 = arith.constant 0 : index
    %c0_0 = arith.constant 0 : index
    %0 = vector.load %arg4[%c0, %c0_0] : memref<128x128xf32, #tpu.memory_space<vmem>>, vector<128x128xf32>
    %c0_1 = arith.constant 0 : index
    %c0_2 = arith.constant 0 : index
    %1 = vector.load %arg5[%c0_1, %c0_2] : memref<1x128xf32, #tpu.memory_space<vmem>>, vector<1x128xf32>
    %2 = vector.broadcast %1 : vector<1x128xf32> to vector<128x128xf32>
    %3 = arith.mulf %0, %2 : vector<128x128xf32>
    %c0_3 = arith.constant 0 : index
    %c0_4 = arith.constant 0 : index
    %4 = vector.load %arg6[%c0_3, %c0_4] : memref<1x128xf32, #tpu.memory_space<vmem>>, vector<1x128xf32>
    %5 = vector.broadcast %4 : vector<1x128xf32> to vector<128x128xf32>
    %6 = arith.addf %3, %5 : vector<128x128xf32>
    %c0_5 = arith.constant 0 : index
    %c0_6 = arith.constant 0 : index
    %7 = vector.load %arg1[%c0_5, %c0_6] : memref<128x128xf32, #tpu.memory_space<vmem>>, vector<128x128xf32>
    %c0_7 = arith.constant 0 : index
    %c0_8 = arith.constant 0 : index
    %8 = vector.load %arg2[%c0_7, %c0_8] : memref<1x128xf32, #tpu.memory_space<vmem>>, vector<1x128xf32>
    %9 = vector.broadcast %8 : vector<1x128xf32> to vector<128x128xf32>
    %10 = arith.mulf %7, %9 : vector<128x128xf32>
    %c0_9 = arith.constant 0 : index
    %c0_10 = arith.constant 0 : index
    %11 = vector.load %arg3[%c0_9, %c0_10] : memref<1x128xf32, #tpu.memory_space<vmem>>, vector<1x128xf32>
    %12 = vector.broadcast %11 : vector<1x128xf32> to vector<128x128xf32>
    %13 = arith.addf %10, %12 : vector<128x128xf32>
    %14 = arith.addf %13, %6 : vector<128x128xf32>
    %cst = arith.constant -1.000000e+00 : f32
    %cst_11 = arith.constant 1.000000e+00 : f32
    %15 = vector.broadcast %cst : f32 to vector<128x128xf32>
    %16 = arith.maximumf %15, %14 : vector<128x128xf32>
    %17 = vector.broadcast %cst_11 : f32 to vector<128x128xf32>
    %18 = arith.minimumf %17, %16 : vector<128x128xf32>
    %c0_12 = arith.constant 0 : index
    %c0_13 = arith.constant 0 : index
    %19 = vector.load %arg7[%c0_12, %c0_13] : memref<128x128xf32, #tpu.memory_space<vmem>>, vector<128x128xf32>
    tpu.vector_store %arg7[%c0_12, %c0_13], %18 {strides = array<i32>} : memref<128x128xf32, #tpu.memory_space<vmem>>, vector<128x128xf32>,
    return
  }
  func.func @transform_0(%arg0: i32) -> (i32, i32) {
    %c0_i32 = arith.constant 0 : i32
    %c0_i32_0 = arith.constant 0 : i32
    return %arg0, %c0_i32 : i32, i32
  }
  func.func @transform_1(%arg0: i32) -> (i32, i32) {
    %c0_i32 = arith.constant 0 : i32
    %c0_i32_0 = arith.constant 0 : i32
    %c0_i32_1 = arith.constant 0 : i32
    return %c0_i32, %c0_i32_0 : i32, i32
  }
  func.func @transform_2(%arg0: i32) -> (i32, i32) {
    %c0_i32 = arith.constant 0 : i32
    %c0_i32_0 = arith.constant 0 : i32
    %c0_i32_1 = arith.constant 0 : i32
    return %c0_i32, %c0_i32_0 : i32, i32
  }
  func.func @transform_3(%arg0: i32) -> (i32, i32) {
    %c0_i32 = arith.constant 0 : i32
    %c0_i32_0 = arith.constant 0 : i32
    return %arg0, %c0_i32 : i32, i32
  }
  func.func @transform_4(%arg0: i32) -> (i32, i32) {
    %c0_i32 = arith.constant 0 : i32
    %c0_i32_0 = arith.constant 0 : i32
    %c0_i32_1 = arith.constant 0 : i32
    return %c0_i32, %c0_i32_0 : i32, i32
  }
  func.func @transform_5(%arg0: i32) -> (i32, i32) {
    %c0_i32 = arith.constant 0 : i32
    %c0_i32_0 = arith.constant 0 : i32
    %c0_i32_1 = arith.constant 0 : i32
    return %c0_i32, %c0_i32_0 : i32, i32
  }
  func.func @transform_6(%arg0: i32) -> (i32, i32) {
    %c0_i32 = arith.constant 0 : i32
    %c0_i32_0 = arith.constant 0 : i32
    return %arg0, %c0_i32 : i32, i32
  }
}

module attributes {stable_mosaic.version = 11 : i64} {
  func.func @kernel(%arg0: i32, %arg1: i32, %arg2: memref<1x10x10x8xbf16, #tpu.memory_space<vmem>>, %arg3: memref<9x8x128xbf16, #tpu.memory_space<vmem>>, %arg4: memref<64x128xf32, #tpu.memory_space<vmem>>, %arg5: memref<8x128xf32, #tpu.memory_space<vmem>>, %arg6: memref<8x128xf32, #tpu.memory_space<vmem>>) attributes {dimension_semantics = [#tpu.dimension_semantics<parallel>, #tpu.dimension_semantics<arbitrary>], iteration_bounds = array<i64: 2, 1>, scalar_prefetch = 0 : i64, scratch_operands = 0 : i64, tpu.core_type = #tpu.core_type<tc>, window_params = [{transform_indices = @transform_0, window_bounds = array<i64: 1, 10, 10, 8>}, {pipeline_mode = #tpu.pipeline_mode<synchronous>, transform_indices = @transform_1, window_bounds = array<i64: 9, 8, 128>}, {transform_indices = @transform_2, window_bounds = array<i64: 64, 128>}, {transform_indices = @transform_3, window_bounds = array<i64: 8, 128>}, {transform_indices = @transform_4, window_bounds = array<i64: 8, 128>}]} {
    %c0_i32 = arith.constant 0 : i32
    %0 = arith.cmpi eq, %arg1, %c0_i32 : i32
    %1 = arith.extui %0 : i1 to i32
    %c0_i32_0 = arith.constant 0 : i32
    %2 = arith.cmpi ne, %1, %c0_i32_0 : i32
    scf.if %2 {
      %cst_76 = arith.constant 0.000000e+00 : f32
      %70 = vector.broadcast %cst_76 : f32 to vector<8x128xf32>
      %c0_77 = arith.constant 0 : index
      %c0_78 = arith.constant 0 : index
      %71 = vector.load %arg5[%c0_77, %c0_78] : memref<8x128xf32, #tpu.memory_space<vmem>>, vector<8x128xf32>
      tpu.vector_store %arg5[%c0_77, %c0_78], %70 {strides = array<i32>} : memref<8x128xf32, #tpu.memory_space<vmem>>, vector<8x128xf32>,
      %cst_79 = arith.constant 0.000000e+00 : f32
      %72 = vector.broadcast %cst_79 : f32 to vector<8x128xf32>
      %c0_80 = arith.constant 0 : index
      %c0_81 = arith.constant 0 : index
      %73 = vector.load %arg6[%c0_80, %c0_81] : memref<8x128xf32, #tpu.memory_space<vmem>>, vector<8x128xf32>
      tpu.vector_store %arg6[%c0_80, %c0_81], %72 {strides = array<i32>} : memref<8x128xf32, #tpu.memory_space<vmem>>, vector<8x128xf32>,
    } else {
    }
    %cst = arith.constant 0.000000e+00 : f32
    %3 = vector.broadcast %cst : f32 to vector<64x128xf32>
    %c0 = arith.constant 0 : index
    %c0_1 = arith.constant 0 : index
    %c0_2 = arith.constant 0 : index
    %c0_3 = arith.constant 0 : index
    %4 = vector.load %arg2[%c0, %c0_1, %c0_2, %c0_3] : memref<1x10x10x8xbf16, #tpu.memory_space<vmem>>, vector<1x8x8x8xbf16>
    %5 = vector.shape_cast %4 : vector<1x8x8x8xbf16> to vector<64x8xbf16>
    %c0_4 = arith.constant 0 : index
    %c0_5 = arith.constant 0 : index
    %c0_6 = arith.constant 0 : index
    %6 = vector.load %arg3[%c0_4, %c0_5, %c0_6] : memref<9x8x128xbf16, #tpu.memory_space<vmem>>, vector<1x8x128xbf16>
    %7 = vector.shape_cast %6 : vector<1x8x128xbf16> to vector<8x128xbf16>
    %cst_7 = arith.constant dense<0.000000e+00> : vector<64x128xf32>
    %8 = tpu.matmul %5, %7, %cst_7 {dimension_numbers = #tpu.dot_dimension_numbers<[1], [0], [0], [1], [0, 0, 1, 1], [], []>} : vector<64x8xbf16>, vector<8x128xbf16>, vector<64x128xf32> -> vector<64x128xf32>
    %9 = arith.addf %3, %8 : vector<64x128xf32>
    %c0_8 = arith.constant 0 : index
    %c0_9 = arith.constant 0 : index
    %c1 = arith.constant 1 : index
    %c0_10 = arith.constant 0 : index
    %10 = vector.load %arg2[%c0_8, %c0_9, %c1, %c0_10] : memref<1x10x10x8xbf16, #tpu.memory_space<vmem>>, vector<1x8x8x8xbf16>
    %11 = vector.shape_cast %10 : vector<1x8x8x8xbf16> to vector<64x8xbf16>
    %c1_11 = arith.constant 1 : index
    %c0_12 = arith.constant 0 : index
    %c0_13 = arith.constant 0 : index
    %12 = vector.load %arg3[%c1_11, %c0_12, %c0_13] : memref<9x8x128xbf16, #tpu.memory_space<vmem>>, vector<1x8x128xbf16>
    %13 = vector.shape_cast %12 : vector<1x8x128xbf16> to vector<8x128xbf16>
    %cst_14 = arith.constant dense<0.000000e+00> : vector<64x128xf32>
    %14 = tpu.matmul %11, %13, %cst_14 {dimension_numbers = #tpu.dot_dimension_numbers<[1], [0], [0], [1], [0, 0, 1, 1], [], []>} : vector<64x8xbf16>, vector<8x128xbf16>, vector<64x128xf32> -> vector<64x128xf32>
    %15 = arith.addf %9, %14 : vector<64x128xf32>
    %c0_15 = arith.constant 0 : index
    %c0_16 = arith.constant 0 : index
    %c2 = arith.constant 2 : index
    %c0_17 = arith.constant 0 : index
    %16 = vector.load %arg2[%c0_15, %c0_16, %c2, %c0_17] : memref<1x10x10x8xbf16, #tpu.memory_space<vmem>>, vector<1x8x8x8xbf16>
    %17 = vector.shape_cast %16 : vector<1x8x8x8xbf16> to vector<64x8xbf16>
    %c2_18 = arith.constant 2 : index
    %c0_19 = arith.constant 0 : index
    %c0_20 = arith.constant 0 : index
    %18 = vector.load %arg3[%c2_18, %c0_19, %c0_20] : memref<9x8x128xbf16, #tpu.memory_space<vmem>>, vector<1x8x128xbf16>
    %19 = vector.shape_cast %18 : vector<1x8x128xbf16> to vector<8x128xbf16>
    %cst_21 = arith.constant dense<0.000000e+00> : vector<64x128xf32>
    %20 = tpu.matmul %17, %19, %cst_21 {dimension_numbers = #tpu.dot_dimension_numbers<[1], [0], [0], [1], [0, 0, 1, 1], [], []>} : vector<64x8xbf16>, vector<8x128xbf16>, vector<64x128xf32> -> vector<64x128xf32>
    %21 = arith.addf %15, %20 : vector<64x128xf32>
    %c0_22 = arith.constant 0 : index
    %c1_23 = arith.constant 1 : index
    %c0_24 = arith.constant 0 : index
    %c0_25 = arith.constant 0 : index
    %22 = vector.load %arg2[%c0_22, %c1_23, %c0_24, %c0_25] : memref<1x10x10x8xbf16, #tpu.memory_space<vmem>>, vector<1x8x8x8xbf16>
    %23 = vector.shape_cast %22 : vector<1x8x8x8xbf16> to vector<64x8xbf16>
    %c3 = arith.constant 3 : index
    %c0_26 = arith.constant 0 : index
    %c0_27 = arith.constant 0 : index
    %24 = vector.load %arg3[%c3, %c0_26, %c0_27] : memref<9x8x128xbf16, #tpu.memory_space<vmem>>, vector<1x8x128xbf16>
    %25 = vector.shape_cast %24 : vector<1x8x128xbf16> to vector<8x128xbf16>
    %cst_28 = arith.constant dense<0.000000e+00> : vector<64x128xf32>
    %26 = tpu.matmul %23, %25, %cst_28 {dimension_numbers = #tpu.dot_dimension_numbers<[1], [0], [0], [1], [0, 0, 1, 1], [], []>} : vector<64x8xbf16>, vector<8x128xbf16>, vector<64x128xf32> -> vector<64x128xf32>
    %27 = arith.addf %21, %26 : vector<64x128xf32>
    %c0_29 = arith.constant 0 : index
    %c1_30 = arith.constant 1 : index
    %c1_31 = arith.constant 1 : index
    %c0_32 = arith.constant 0 : index
    %28 = vector.load %arg2[%c0_29, %c1_30, %c1_31, %c0_32] : memref<1x10x10x8xbf16, #tpu.memory_space<vmem>>, vector<1x8x8x8xbf16>
    %29 = vector.shape_cast %28 : vector<1x8x8x8xbf16> to vector<64x8xbf16>
    %c4 = arith.constant 4 : index
    %c0_33 = arith.constant 0 : index
    %c0_34 = arith.constant 0 : index
    %30 = vector.load %arg3[%c4, %c0_33, %c0_34] : memref<9x8x128xbf16, #tpu.memory_space<vmem>>, vector<1x8x128xbf16>
    %31 = vector.shape_cast %30 : vector<1x8x128xbf16> to vector<8x128xbf16>
    %cst_35 = arith.constant dense<0.000000e+00> : vector<64x128xf32>
    %32 = tpu.matmul %29, %31, %cst_35 {dimension_numbers = #tpu.dot_dimension_numbers<[1], [0], [0], [1], [0, 0, 1, 1], [], []>} : vector<64x8xbf16>, vector<8x128xbf16>, vector<64x128xf32> -> vector<64x128xf32>
    %33 = arith.addf %27, %32 : vector<64x128xf32>
    %c0_36 = arith.constant 0 : index
    %c1_37 = arith.constant 1 : index
    %c2_38 = arith.constant 2 : index
    %c0_39 = arith.constant 0 : index
    %34 = vector.load %arg2[%c0_36, %c1_37, %c2_38, %c0_39] : memref<1x10x10x8xbf16, #tpu.memory_space<vmem>>, vector<1x8x8x8xbf16>
    %35 = vector.shape_cast %34 : vector<1x8x8x8xbf16> to vector<64x8xbf16>
    %c5 = arith.constant 5 : index
    %c0_40 = arith.constant 0 : index
    %c0_41 = arith.constant 0 : index
    %36 = vector.load %arg3[%c5, %c0_40, %c0_41] : memref<9x8x128xbf16, #tpu.memory_space<vmem>>, vector<1x8x128xbf16>
    %37 = vector.shape_cast %36 : vector<1x8x128xbf16> to vector<8x128xbf16>
    %cst_42 = arith.constant dense<0.000000e+00> : vector<64x128xf32>
    %38 = tpu.matmul %35, %37, %cst_42 {dimension_numbers = #tpu.dot_dimension_numbers<[1], [0], [0], [1], [0, 0, 1, 1], [], []>} : vector<64x8xbf16>, vector<8x128xbf16>, vector<64x128xf32> -> vector<64x128xf32>
    %39 = arith.addf %33, %38 : vector<64x128xf32>
    %c0_43 = arith.constant 0 : index
    %c2_44 = arith.constant 2 : index
    %c0_45 = arith.constant 0 : index
    %c0_46 = arith.constant 0 : index
    %40 = vector.load %arg2[%c0_43, %c2_44, %c0_45, %c0_46] : memref<1x10x10x8xbf16, #tpu.memory_space<vmem>>, vector<1x8x8x8xbf16>
    %41 = vector.shape_cast %40 : vector<1x8x8x8xbf16> to vector<64x8xbf16>
    %c6 = arith.constant 6 : index
    %c0_47 = arith.constant 0 : index
    %c0_48 = arith.constant 0 : index
    %42 = vector.load %arg3[%c6, %c0_47, %c0_48] : memref<9x8x128xbf16, #tpu.memory_space<vmem>>, vector<1x8x128xbf16>
    %43 = vector.shape_cast %42 : vector<1x8x128xbf16> to vector<8x128xbf16>
    %cst_49 = arith.constant dense<0.000000e+00> : vector<64x128xf32>
    %44 = tpu.matmul %41, %43, %cst_49 {dimension_numbers = #tpu.dot_dimension_numbers<[1], [0], [0], [1], [0, 0, 1, 1], [], []>} : vector<64x8xbf16>, vector<8x128xbf16>, vector<64x128xf32> -> vector<64x128xf32>
    %45 = arith.addf %39, %44 : vector<64x128xf32>
    %c0_50 = arith.constant 0 : index
    %c2_51 = arith.constant 2 : index
    %c1_52 = arith.constant 1 : index
    %c0_53 = arith.constant 0 : index
    %46 = vector.load %arg2[%c0_50, %c2_51, %c1_52, %c0_53] : memref<1x10x10x8xbf16, #tpu.memory_space<vmem>>, vector<1x8x8x8xbf16>
    %47 = vector.shape_cast %46 : vector<1x8x8x8xbf16> to vector<64x8xbf16>
    %c7 = arith.constant 7 : index
    %c0_54 = arith.constant 0 : index
    %c0_55 = arith.constant 0 : index
    %48 = vector.load %arg3[%c7, %c0_54, %c0_55] : memref<9x8x128xbf16, #tpu.memory_space<vmem>>, vector<1x8x128xbf16>
    %49 = vector.shape_cast %48 : vector<1x8x128xbf16> to vector<8x128xbf16>
    %cst_56 = arith.constant dense<0.000000e+00> : vector<64x128xf32>
    %50 = tpu.matmul %47, %49, %cst_56 {dimension_numbers = #tpu.dot_dimension_numbers<[1], [0], [0], [1], [0, 0, 1, 1], [], []>} : vector<64x8xbf16>, vector<8x128xbf16>, vector<64x128xf32> -> vector<64x128xf32>
    %51 = arith.addf %45, %50 : vector<64x128xf32>
    %c0_57 = arith.constant 0 : index
    %c2_58 = arith.constant 2 : index
    %c2_59 = arith.constant 2 : index
    %c0_60 = arith.constant 0 : index
    %52 = vector.load %arg2[%c0_57, %c2_58, %c2_59, %c0_60] : memref<1x10x10x8xbf16, #tpu.memory_space<vmem>>, vector<1x8x8x8xbf16>
    %53 = vector.shape_cast %52 : vector<1x8x8x8xbf16> to vector<64x8xbf16>
    %c8 = arith.constant 8 : index
    %c0_61 = arith.constant 0 : index
    %c0_62 = arith.constant 0 : index
    %54 = vector.load %arg3[%c8, %c0_61, %c0_62] : memref<9x8x128xbf16, #tpu.memory_space<vmem>>, vector<1x8x128xbf16>
    %55 = vector.shape_cast %54 : vector<1x8x128xbf16> to vector<8x128xbf16>
    %cst_63 = arith.constant dense<0.000000e+00> : vector<64x128xf32>
    %56 = tpu.matmul %53, %55, %cst_63 {dimension_numbers = #tpu.dot_dimension_numbers<[1], [0], [0], [1], [0, 0, 1, 1], [], []>} : vector<64x8xbf16>, vector<8x128xbf16>, vector<64x128xf32> -> vector<64x128xf32>
    %57 = arith.addf %51, %56 : vector<64x128xf32>
    %c0_64 = arith.constant 0 : index
    %c0_65 = arith.constant 0 : index
    %58 = vector.load %arg4[%c0_64, %c0_65] : memref<64x128xf32, #tpu.memory_space<vmem>>, vector<64x128xf32>
    tpu.vector_store %arg4[%c0_64, %c0_65], %57 {strides = array<i32>} : memref<64x128xf32, #tpu.memory_space<vmem>>, vector<64x128xf32>,
    %c0_66 = arith.constant 0 : index
    %c0_67 = arith.constant 0 : index
    %59 = vector.load %arg5[%c0_66, %c0_67] : memref<8x128xf32, #tpu.memory_space<vmem>>, vector<8x128xf32>
    %60 = vector.shape_cast %57 : vector<64x128xf32> to vector<8x8x128xf32>
    %cst_68 = arith.constant dense<0.000000e+00> : vector<8x128xf32>
    %61 = vector.multi_reduction <add>, %60, %cst_68 [0] : vector<8x8x128xf32> to vector<8x128xf32>
    %62 = arith.addf %59, %61 : vector<8x128xf32>
    %c0_69 = arith.constant 0 : index
    %c0_70 = arith.constant 0 : index
    %63 = vector.load %arg5[%c0_69, %c0_70] : memref<8x128xf32, #tpu.memory_space<vmem>>, vector<8x128xf32>
    tpu.vector_store %arg5[%c0_69, %c0_70], %62 {strides = array<i32>} : memref<8x128xf32, #tpu.memory_space<vmem>>, vector<8x128xf32>,
    %c0_71 = arith.constant 0 : index
    %c0_72 = arith.constant 0 : index
    %64 = vector.load %arg6[%c0_71, %c0_72] : memref<8x128xf32, #tpu.memory_space<vmem>>, vector<8x128xf32>
    %65 = arith.mulf %57, %57 : vector<64x128xf32>
    %66 = vector.shape_cast %65 : vector<64x128xf32> to vector<8x8x128xf32>
    %cst_73 = arith.constant dense<0.000000e+00> : vector<8x128xf32>
    %67 = vector.multi_reduction <add>, %66, %cst_73 [0] : vector<8x8x128xf32> to vector<8x128xf32>
    %68 = arith.addf %64, %67 : vector<8x128xf32>
    %c0_74 = arith.constant 0 : index
    %c0_75 = arith.constant 0 : index
    %69 = vector.load %arg6[%c0_74, %c0_75] : memref<8x128xf32, #tpu.memory_space<vmem>>, vector<8x128xf32>
    tpu.vector_store %arg6[%c0_74, %c0_75], %68 {strides = array<i32>} : memref<8x128xf32, #tpu.memory_space<vmem>>, vector<8x128xf32>,
    return
  }
  func.func @transform_0(%arg0: i32, %arg1: i32) -> (i32, i32, i32, i32) {
    %c1_i32 = arith.constant 1 : i32
    %0 = arith.muli %arg0, %c1_i32 : i32
    %1 = arith.addi %0, %arg1 : i32
    %c0_i32 = arith.constant 0 : i32
    %c0_i32_0 = arith.constant 0 : i32
    %c0_i32_1 = arith.constant 0 : i32
    %c0_i32_2 = arith.constant 0 : i32
    return %1, %c0_i32, %c0_i32_0, %c0_i32_1 : i32, i32, i32, i32
  }
  func.func @transform_1(%arg0: i32, %arg1: i32) -> (i32, i32, i32) {
    %c0_i32 = arith.constant 0 : i32
    %c0_i32_0 = arith.constant 0 : i32
    %c0_i32_1 = arith.constant 0 : i32
    %c0_i32_2 = arith.constant 0 : i32
    return %c0_i32, %c0_i32_0, %c0_i32_1 : i32, i32, i32
  }
  func.func @transform_2(%arg0: i32, %arg1: i32) -> (i32, i32) {
    %c1_i32 = arith.constant 1 : i32
    %0 = arith.muli %arg0, %c1_i32 : i32
    %1 = arith.addi %0, %arg1 : i32
    %c0_i32 = arith.constant 0 : i32
    %c0_i32_0 = arith.constant 0 : i32
    return %1, %c0_i32 : i32, i32
  }
  func.func @transform_3(%arg0: i32, %arg1: i32) -> (i32, i32) {
    %c0_i32 = arith.constant 0 : i32
    %c0_i32_0 = arith.constant 0 : i32
    return %arg0, %c0_i32 : i32, i32
  }
  func.func @transform_4(%arg0: i32, %arg1: i32) -> (i32, i32) {
    %c0_i32 = arith.constant 0 : i32
    %c0_i32_0 = arith.constant 0 : i32
    return %arg0, %c0_i32 : i32, i32
  }
}

module attributes {stable_mosaic.version = 11 : i64} {
  func.func @_apply_kernel(%arg0: i32, %arg1: memref<128x128xf32, #tpu.memory_space<vmem>>, %arg2: memref<1x128xf32, #tpu.memory_space<vmem>>, %arg3: memref<1x128xf32, #tpu.memory_space<vmem>>, %arg4: memref<128x128xf32, #tpu.memory_space<vmem>>, %arg5: memref<128x128xf32, #tpu.memory_space<vmem>>) attributes {dimension_semantics = [#tpu.dimension_semantics<parallel>], iteration_bounds = array<i64: 1>, scalar_prefetch = 0 : i64, scratch_operands = 0 : i64, tpu.core_type = #tpu.core_type<tc>, window_params = [{transform_indices = @transform_0, window_bounds = array<i64: 128, 128>}, {pipeline_mode = #tpu.pipeline_mode<synchronous>, transform_indices = @transform_1, window_bounds = array<i64: 1, 128>}, {pipeline_mode = #tpu.pipeline_mode<synchronous>, transform_indices = @transform_2, window_bounds = array<i64: 1, 128>}, {transform_indices = @transform_3, window_bounds = array<i64: 128, 128>}, {transform_indices = @transform_4, window_bounds = array<i64: 128, 128>}]} {
    %c0 = arith.constant 0 : index
    %c0_0 = arith.constant 0 : index
    %0 = vector.load %arg1[%c0, %c0_0] : memref<128x128xf32, #tpu.memory_space<vmem>>, vector<128x128xf32>
    %c0_1 = arith.constant 0 : index
    %c0_2 = arith.constant 0 : index
    %1 = vector.load %arg2[%c0_1, %c0_2] : memref<1x128xf32, #tpu.memory_space<vmem>>, vector<1x128xf32>
    %2 = vector.broadcast %1 : vector<1x128xf32> to vector<128x128xf32>
    %3 = arith.mulf %0, %2 : vector<128x128xf32>
    %c0_3 = arith.constant 0 : index
    %c0_4 = arith.constant 0 : index
    %4 = vector.load %arg3[%c0_3, %c0_4] : memref<1x128xf32, #tpu.memory_space<vmem>>, vector<1x128xf32>
    %5 = vector.broadcast %4 : vector<1x128xf32> to vector<128x128xf32>
    %6 = arith.addf %3, %5 : vector<128x128xf32>
    %c0_5 = arith.constant 0 : index
    %c0_6 = arith.constant 0 : index
    %7 = vector.load %arg4[%c0_5, %c0_6] : memref<128x128xf32, #tpu.memory_space<vmem>>, vector<128x128xf32>
    %8 = arith.addf %6, %7 : vector<128x128xf32>
    %cst = arith.constant -1.000000e+00 : f32
    %cst_7 = arith.constant 1.000000e+00 : f32
    %9 = vector.broadcast %cst : f32 to vector<128x128xf32>
    %10 = arith.maximumf %9, %8 : vector<128x128xf32>
    %11 = vector.broadcast %cst_7 : f32 to vector<128x128xf32>
    %12 = arith.minimumf %11, %10 : vector<128x128xf32>
    %c0_8 = arith.constant 0 : index
    %c0_9 = arith.constant 0 : index
    %13 = vector.load %arg5[%c0_8, %c0_9] : memref<128x128xf32, #tpu.memory_space<vmem>>, vector<128x128xf32>
    tpu.vector_store %arg5[%c0_8, %c0_9], %12 {strides = array<i32>} : memref<128x128xf32, #tpu.memory_space<vmem>>, vector<128x128xf32>,
    return
  }
  func.func @transform_0(%arg0: i32) -> (i32, i32) {
    %c0_i32 = arith.constant 0 : i32
    %c0_i32_0 = arith.constant 0 : i32
    return %arg0, %c0_i32 : i32, i32
  }
  func.func @transform_1(%arg0: i32) -> (i32, i32) {
    %c0_i32 = arith.constant 0 : i32
    %c0_i32_0 = arith.constant 0 : i32
    %c0_i32_1 = arith.constant 0 : i32
    return %c0_i32, %c0_i32_0 : i32, i32
  }
  func.func @transform_2(%arg0: i32) -> (i32, i32) {
    %c0_i32 = arith.constant 0 : i32
    %c0_i32_0 = arith.constant 0 : i32
    %c0_i32_1 = arith.constant 0 : i32
    return %c0_i32, %c0_i32_0 : i32, i32
  }
  func.func @transform_3(%arg0: i32) -> (i32, i32) {
    %c0_i32 = arith.constant 0 : i32
    %c0_i32_0 = arith.constant 0 : i32
    return %arg0, %c0_i32 : i32, i32
  }
  func.func @transform_4(%arg0: i32) -> (i32, i32) {
    %c0_i32 = arith.constant 0 : i32
    %c0_i32_0 = arith.constant 0 : i32
    return %arg0, %c0_i32 : i32, i32
  }
}

</mosaic_0001>

<bundles_post_ra>
// kernel: basic_block_forward.5
= control target key start
LH: loop header
LB: loop body
LE: loop exit
PB: predicated region body
PF: predicated region fallthrough
CT: control target
= control target key end

     0   :  { %s498_s0 = inlined_call_operand.vmem [shape: f32[128,128], index: 0, kind: input, shape index: {}]   ;;  %s499_s1 = inlined_call_operand.vmem [shape: f32[1,128], index: 1, kind: input, shape index: {}]   ;;  %s500_s2 = inlined_call_operand.vmem [shape: f32[1,128], index: 2, kind: input, shape index: {}]   ;;  %s501_s3 = inlined_call_operand.vmem [shape: f32[128,128], index: 3, kind: input, shape index: {}]   ;;  %s502_s4 = inlined_call_operand.vmem [shape: f32[1,128], index: 4, kind: input, shape index: {}]   ;;  %s503_s5 = inlined_call_operand.vmem [shape: f32[1,128], index: 5, kind: input, shape index: {}]   ;;  %s504_s6 = inlined_call_operand.vmem [shape: f32[128,128], index: 6, kind: output, shape index: {}]  }
   0x1   :  { %v23_v0 = vld [vmem:[%s501_s3] sm:$0xff]  ;;  %v24_v8 = vld [vmem:[%s501_s3 + $0x8] sm:$0xff]  ;;  %v25_v10 = vld [vmem:[%s501_s3 + $0x10] sm:$0xff] }
   0x2   :  { %v276_v1 = vld [vmem:[%s502_s4] ss:$0 sm:$0xff]  ;;  %v86_v9 = vld [vmem:[%s498_s0 + $0x8] sm:$0xff]  ;;  %v87_v15 = vld [vmem:[%s498_s0 + $0x10] sm:$0xff] }
   0x3   :  { %v281_v2 = vld [vmem:[%s503_s5] ss:$0 sm:$0xff]  ;;  %v46_v3 = vmul.f32 %v276_v1, %v23_v0  ;;  %v47_v12 = vmul.f32 %v276_v1, %v24_v8  ;;  %v48_v14 = vmul.f32 %v276_v1, %v25_v10  ;;  %v26_v16 = vld [vmem:[%s501_s3 + $0x18] sm:$0xff]  ;;  %v28_v24 = vld [vmem:[%s501_s3 + $0x28] sm:$0xff] }
   0x4   :  { %v85_v4 = vld [vmem:[%s498_s0] sm:$0xff]  ;;  %v88_v17 = vld [vmem:[%s498_s0 + $0x18] sm:$0xff]  ;;  %v49_v20 = vmul.f32 %v276_v1, %v26_v16  ;;  %v90_v29 = vld [vmem:[%s498_s0 + $0x28] sm:$0xff]  ;;  %v51_v38 = vmul.f32 %v276_v1, %v28_v24 }
   0x5   :  { %v290_v5 = vld [vmem:[%s499_s1] ss:$0 sm:$0xff]  ;;  %v69_v11 = vadd.f32 %v281_v2, %v46_v3  ;;  %v70_v25 = vadd.f32 %v281_v2, %v47_v12  ;;  %v71_v27 = vadd.f32 %v281_v2, %v48_v14  ;;  %v29_v34 = vld [vmem:[%s501_s3 + $0x30] sm:$0xff]  ;;  %v30_v44 = vld [vmem:[%s501_s3 + $0x38] sm:$0xff] }
   0x6   :  { %v295_v6 = vld [vmem:[%s500_s2] ss:$0 sm:$0xff]  ;;  %v108_v7 = vmul.f32 %v290_v5, %v85_v4  ;;  %v109_v13 = vmul.f32 %v290_v5, %v86_v9  ;;  %v110_v19 = vmul.f32 %v290_v5, %v87_v15  ;;  %v111_v21 = vmul.f32 %v290_v5, %v88_v17  ;;  %v91_v39 = vld [vmem:[%s498_s0 + $0x30] sm:$0xff]  ;;  %v92_v45 = vld [vmem:[%s498_s0 + $0x38] sm:$0xff] }
   0x7   :  { %v27_v22 = vld [vmem:[%s501_s3 + $0x20] sm:$0xff]  ;;  %v72_v32 = vadd.f32 %v281_v2, %v49_v20  ;;  %v113_v43 = vmul.f32 %v290_v5, %v90_v29  ;;  %v74_v48 = vadd.f32 %v281_v2, %v51_v38  ;;  %v52_v49 = vmul.f32 %v276_v1, %v29_v34  ;;  %v32_v56 = vld [vmem:[%s501_s3 + $0x48] sm:$0xff]  ;;  %v33_v4 = vld [vmem:[%s501_s3 + $0x50] sm:$0xff] }
   0x8   :  { %v131_v18 = vadd.f32 %v295_v6, %v108_v7  ;;  %v89_v23 = vld [vmem:[%s498_s0 + $0x20] sm:$0xff]  ;;  %v132_v26 = vadd.f32 %v295_v6, %v109_v13  ;;  %v50_v28 = vmul.f32 %v276_v1, %v27_v22  ;;  %v133_v31 = vadd.f32 %v295_v6, %v110_v19  ;;  %v94_v3 = vld [vmem:[%s498_s0 + $0x48] sm:$0xff]  ;;  %v34_v12 = vld [vmem:[%s501_s3 + $0x58] sm:$0xff] }
   0x9   :  { %v134_v33 = vadd.f32 %v295_v6, %v111_v21  ;;  %v112_v37 = vmul.f32 %v290_v5, %v89_v23  ;;  %v31_v50 = vld [vmem:[%s501_s3 + $0x40] sm:$0xff]  ;;  %v136_v54 = vadd.f32 %v295_v6, %v113_v43  ;;  %v114_v55 = vmul.f32 %v290_v5, %v91_v39  ;;  %v96_v17 = vld [vmem:[%s498_s0 + $0x58] sm:$0xff]  ;;  %v37_v34 = vld [vmem:[%s501_s3 + $0x70] sm:$0xff] }
   0xa   :  { %v147_v30 = vadd.f32 %v131_v18, %v69_v11  ;;  %v148_v35 = vadd.f32 %v132_v26, %v70_v25  ;;  %v73_v36 = vadd.f32 %v281_v2, %v50_v28  ;;  %v149_v41 = vadd.f32 %v133_v31, %v71_v27  ;;  %v93_v51 = vld [vmem:[%s498_s0 + $0x40] sm:$0xff]  ;;  %v95_v11 = vld [vmem:[%s498_s0 + $0x50] sm:$0xff]  ;;  %v36_v28 = vld [vmem:[%s501_s3 + $0x68] sm:$0xff] }
   0xb   :  { %v150_v42 = vadd.f32 %v134_v33, %v72_v32  ;;  %v135_v47 = vadd.f32 %v295_v6, %v112_v37  ;;  %v75_v58 = vadd.f32 %v281_v2, %v52_v49  ;;  %v53_v59 = vmul.f32 %v276_v1, %v30_v44  ;;  %v35_v22 = vld [vmem:[%s501_s3 + $0x60] sm:$0xff]  ;;  %v98_v33 = vld [vmem:[%s498_s0 + $0x68] sm:$0xff]  ;;  %v99_v43 = vld [vmem:[%s498_s0 + $0x70] sm:$0xff] }
   0xc   :  { %v219_v40 = vclamps-f32 %v147_v30, 1.0  ;;  %v220_v46 = vclamps-f32 %v148_v35, 1.0  ;;  %v221_v52 = vclamps-f32 %v149_v41, 1.0  ;;  %v115_v60 = vmul.f32 %v290_v5, %v92_v45  ;;  %v97_v27 = vld [vmem:[%s498_s0 + $0x60] sm:$0xff]  ;;  %v100_v49 = vld [vmem:[%s498_s0 + $0x78] sm:$0xff] }
   0xd   :  { %v222_v53 = vclamps-f32 %v150_v42, 1.0  ;;  %v151_v57 = vadd.f32 %v135_v47, %v73_v36  ;;  %v152_v61 = vadd.f32 %v136_v54, %v74_v48  ;;  %v137_v62 = vadd.f32 %v295_v6, %v114_v55  ;;  %v38_v48 = vld [vmem:[%s501_s3 + $0x78] sm:$0xff] }
   0xe   :  { %195 = vst [vmem:[%s504_s6] sm:$0xff] %v219_v40  ;;  %196 = vst [vmem:[%s504_s6 + $0x8] sm:$0xff] %v220_v46  ;;  %v54_v63 = vmul.f32 %v276_v1, %v31_v50  ;;  %v116_v0 = vmul.f32 %v290_v5, %v93_v51  ;;  %v76_v8 = vadd.f32 %v281_v2, %v53_v59 }
   0xf   :  { %197 = vst [vmem:[%s504_s6 + $0x10] sm:$0xff] %v221_v52  ;;  %198 = vst [vmem:[%s504_s6 + $0x18] sm:$0xff] %v222_v53  ;;  %v223_v7 = vclamps-f32 %v151_v57, 1.0  ;;  %v138_v9 = vadd.f32 %v295_v6, %v115_v60  ;;  %v55_v10 = vmul.f32 %v276_v1, %v32_v56  ;;  %v224_v13 = vclamps-f32 %v152_v61, 1.0 }
  0x10   :  { %v153_v14 = vadd.f32 %v137_v62, %v75_v58  ;;  %v77_v15 = vadd.f32 %v281_v2, %v54_v63  ;;  %v139_v16 = vadd.f32 %v295_v6, %v116_v0  ;;  %v117_v20 = vmul.f32 %v290_v5, %v94_v3 }
  0x11   :  { %199 = vst [vmem:[%s504_s6 + $0x20] sm:$0xff] %v223_v7  ;;  %v154_v18 = vadd.f32 %v138_v9, %v76_v8  ;;  %v78_v19 = vadd.f32 %v281_v2, %v55_v10  ;;  %v56_v21 = vmul.f32 %v276_v1, %v33_v4  ;;  %200 = vst [vmem:[%s504_s6 + $0x28] sm:$0xff] %v224_v13 }
  0x12   :  { %v225_v23 = vclamps-f32 %v153_v14, 1.0  ;;  %v155_v24 = vadd.f32 %v139_v16, %v77_v15  ;;  %v118_v25 = vmul.f32 %v290_v5, %v95_v11  ;;  %v57_v26 = vmul.f32 %v276_v1, %v34_v12 }
  0x13   :  { %v226_v29 = vclamps-f32 %v154_v18, 1.0  ;;  %v140_v30 = vadd.f32 %v295_v6, %v117_v20  ;;  %v79_v31 = vadd.f32 %v281_v2, %v56_v21  ;;  %v119_v32 = vmul.f32 %v290_v5, %v96_v17 }
  0x14   :  { %201 = vst [vmem:[%s504_s6 + $0x30] sm:$0xff] %v225_v23  ;;  %v227_v35 = vclamps-f32 %v155_v24, 1.0  ;;  %v141_v36 = vadd.f32 %v295_v6, %v118_v25  ;;  %v80_v37 = vadd.f32 %v281_v2, %v57_v26  ;;  %v58_v38 = vmul.f32 %v276_v1, %v35_v22 }
  0x15   :  { %202 = vst [vmem:[%s504_s6 + $0x38] sm:$0xff] %v226_v29  ;;  %v156_v39 = vadd.f32 %v140_v30, %v78_v19  ;;  %v142_v40 = vadd.f32 %v295_v6, %v119_v32  ;;  %v120_v41 = vmul.f32 %v290_v5, %v97_v27  ;;  %v59_v42 = vmul.f32 %v276_v1, %v36_v28 }
  0x16   :  { %203 = vst [vmem:[%s504_s6 + $0x40] sm:$0xff] %v227_v35  ;;  %v157_v44 = vadd.f32 %v141_v36, %v79_v31  ;;  %v81_v45 = vadd.f32 %v281_v2, %v58_v38  ;;  %v121_v46 = vmul.f32 %v290_v5, %v98_v33  ;;  %v60_v47 = vmul.f32 %v276_v1, %v37_v34 }
  0x17   :  { %v228_v50 = vclamps-f32 %v156_v39, 1.0  ;;  %v158_v51 = vadd.f32 %v142_v40, %v80_v37  ;;  %v143_v52 = vadd.f32 %v295_v6, %v120_v41  ;;  %v82_v53 = vadd.f32 %v281_v2, %v59_v42 }
  0x18   :  { %v229_v54 = vclamps-f32 %v157_v44, 1.0  ;;  %v144_v55 = vadd.f32 %v295_v6, %v121_v46  ;;  %v83_v56 = vadd.f32 %v281_v2, %v60_v47  ;;  %v122_v57 = vmul.f32 %v290_v5, %v99_v43 }
  0x19   :  { %204 = vst [vmem:[%s504_s6 + $0x48] sm:$0xff] %v228_v50  ;;  %v230_v58 = vclamps-f32 %v158_v51, 1.0  ;;  %v159_v59 = vadd.f32 %v143_v52, %v81_v45  ;;  %v61_v60 = vmul.f32 %v276_v1, %v38_v48  ;;  %v123_v61 = vmul.f32 %v290_v5, %v100_v49 }
  0x1a   :  { %205 = vst [vmem:[%s504_s6 + $0x50] sm:$0xff] %v229_v54  ;;  %v160_v62 = vadd.f32 %v144_v55, %v82_v53  ;;  %v145_v63 = vadd.f32 %v295_v6, %v122_v57 }
  0x1b   :  { %206 = vst [vmem:[%s504_s6 + $0x58] sm:$0xff] %v230_v58  ;;  %v231_v0 = vclamps-f32 %v159_v59, 1.0  ;;  %v84_v3 = vadd.f32 %v281_v2, %v61_v60  ;;  %v146_v4 = vadd.f32 %v295_v6, %v123_v61 }
  0x1c   :  { %v232_v7 = vclamps-f32 %v160_v62, 1.0  ;;  %v161_v1 = vadd.f32 %v145_v63, %v83_v56 }
  0x1d   :  { %207 = vst [vmem:[%s504_s6 + $0x60] sm:$0xff] %v231_v0  ;;  %v162_v5 = vadd.f32 %v146_v4, %v84_v3 }
  0x1e   :  { %208 = vst [vmem:[%s504_s6 + $0x68] sm:$0xff] %v232_v7  ;;  %v233_v8 = vclamps-f32 %v161_v1, 1.0 }
  0x1f   :  { %v234_v9 = vclamps-f32 %v162_v5, 1.0 }
  0x20   :  { %209 = vst [vmem:[%s504_s6 + $0x70] sm:$0xff] %v233_v8 }
  0x21   :  { %210 = vst [vmem:[%s504_s6 + $0x78] sm:$0xff] %v234_v9 }

// kernel: basic_block_forward.7
= control target key start
LH: loop header
LB: loop body
LE: loop exit
PB: predicated region body
PF: predicated region fallthrough
CT: control target
= control target key end

     0   :  { %s392_s0 = inlined_call_operand.vmem [shape: f32[128,128], index: 0, kind: input, shape index: {}]   ;;  %s393_s1 = inlined_call_operand.vmem [shape: f32[1,128], index: 1, kind: input, shape index: {}]   ;;  %s394_s2 = inlined_call_operand.vmem [shape: f32[1,128], index: 2, kind: input, shape index: {}]   ;;  %s395_s3 = inlined_call_operand.vmem [shape: f32[128,128], index: 3, kind: input, shape index: {}]   ;;  %s396_s4 = inlined_call_operand.vmem [shape: f32[128,128], index: 4, kind: output, shape index: {}]  }
   0x1   :  { %v17_v0 = vld [vmem:[%s392_s0] sm:$0xff]  ;;  %v18_v4 = vld [vmem:[%s392_s0 + $0x8] sm:$0xff]  ;;  %v19_v7 = vld [vmem:[%s392_s0 + $0x10] sm:$0xff] }
   0x2   :  { %v212_v1 = vld [vmem:[%s393_s1] ss:$0 sm:$0xff]  ;;  %v20_v8 = vld [vmem:[%s392_s0 + $0x18] sm:$0xff]  ;;  %v80_v10 = vld [vmem:[%s395_s3 + $0x8] sm:$0xff] }
   0x3   :  { %v217_v2 = vld [vmem:[%s394_s2] ss:$0 sm:$0xff]  ;;  %v40_v3 = vmul.f32 %v212_v1, %v17_v0  ;;  %v41_v6 = vmul.f32 %v212_v1, %v18_v4  ;;  %v42_v11 = vmul.f32 %v212_v1, %v19_v7  ;;  %v81_v12 = vld [vmem:[%s395_s3 + $0x10] sm:$0xff]  ;;  %v43_v13 = vmul.f32 %v212_v1, %v20_v8  ;;  %v82_v16 = vld [vmem:[%s395_s3 + $0x18] sm:$0xff] }
   0x4   :  { %v79_v5 = vld [vmem:[%s395_s3] sm:$0xff]  ;;  %v22_v18 = vld [vmem:[%s392_s0 + $0x28] sm:$0xff]  ;;  %v23_v19 = vld [vmem:[%s392_s0 + $0x30] sm:$0xff] }
   0x5   :  { %v63_v9 = vadd.f32 %v217_v2, %v40_v3  ;;  %v21_v14 = vld [vmem:[%s392_s0 + $0x20] sm:$0xff]  ;;  %v64_v15 = vadd.f32 %v217_v2, %v41_v6  ;;  %v65_v21 = vadd.f32 %v217_v2, %v42_v11  ;;  %v66_v22 = vadd.f32 %v217_v2, %v43_v13  ;;  %v24_v25 = vld [vmem:[%s392_s0 + $0x38] sm:$0xff]  ;;  %v84_v28 = vld [vmem:[%s395_s3 + $0x28] sm:$0xff] }
   0x6   :  { %v44_v17 = vmul.f32 %v212_v1, %v21_v14  ;;  %v83_v23 = vld [vmem:[%s395_s3 + $0x20] sm:$0xff]  ;;  %v45_v24 = vmul.f32 %v212_v1, %v22_v18  ;;  %v46_v29 = vmul.f32 %v212_v1, %v23_v19  ;;  %v47_v30 = vmul.f32 %v212_v1, %v24_v25  ;;  %v85_v36 = vld [vmem:[%s395_s3 + $0x30] sm:$0xff]  ;;  %v86_v37 = vld [vmem:[%s395_s3 + $0x38] sm:$0xff] }
   0x7   :  { %v95_v20 = vadd.f32 %v79_v5, %v63_v9  ;;  %v96_v26 = vadd.f32 %v80_v10, %v64_v15  ;;  %v25_v31 = vld [vmem:[%s392_s0 + $0x40] sm:$0xff]  ;;  %v97_v33 = vadd.f32 %v81_v12, %v65_v21  ;;  %v98_v34 = vadd.f32 %v82_v16, %v66_v22  ;;  %v26_v38 = vld [vmem:[%s392_s0 + $0x48] sm:$0xff]  ;;  %v27_v43 = vld [vmem:[%s392_s0 + $0x50] sm:$0xff] }
   0x8   :  { %v67_v27 = vadd.f32 %v217_v2, %v44_v17  ;;  %v68_v35 = vadd.f32 %v217_v2, %v45_v24  ;;  %v69_v41 = vadd.f32 %v217_v2, %v46_v29  ;;  %v70_v42 = vadd.f32 %v217_v2, %v47_v30  ;;  %v28_v44 = vld [vmem:[%s392_s0 + $0x58] sm:$0xff]  ;;  %v29_v49 = vld [vmem:[%s392_s0 + $0x60] sm:$0xff]  ;;  %v30_v55 = vld [vmem:[%s392_s0 + $0x68] sm:$0xff] }
   0x9   :  { %v165_v32 = vclamps-f32 %v95_v20, 1.0  ;;  %v166_v39 = vclamps-f32 %v96_v26, 1.0  ;;  %v167_v45 = vclamps-f32 %v97_v33, 1.0  ;;  %v168_v46 = vclamps-f32 %v98_v34, 1.0  ;;  %v87_v53 = vld [vmem:[%s395_s3 + $0x40] sm:$0xff]  ;;  %v88_v58 = vld [vmem:[%s395_s3 + $0x48] sm:$0xff] }
   0xa   :  { %v99_v40 = vadd.f32 %v83_v23, %v67_v27  ;;  %v100_v47 = vadd.f32 %v84_v28, %v68_v35  ;;  %v48_v48 = vmul.f32 %v212_v1, %v25_v31  ;;  %v101_v51 = vadd.f32 %v85_v36, %v69_v41  ;;  %v31_v61 = vld [vmem:[%s392_s0 + $0x70] sm:$0xff]  ;;  %v32_v62 = vld [vmem:[%s392_s0 + $0x78] sm:$0xff]  ;;  %v91_v10 = vld [vmem:[%s395_s3 + $0x60] sm:$0xff] }
   0xb   :  { %143 = vst [vmem:[%s396_s4] sm:$0xff] %v165_v32  ;;  %144 = vst [vmem:[%s396_s4 + $0x8] sm:$0xff] %v166_v39  ;;  %v102_v52 = vadd.f32 %v86_v37, %v70_v42  ;;  %v49_v54 = vmul.f32 %v212_v1, %v26_v38  ;;  %v50_v59 = vmul.f32 %v212_v1, %v27_v43  ;;  %v89_v4 = vld [vmem:[%s395_s3 + $0x50] sm:$0xff]  ;;  %v90_v5 = vld [vmem:[%s395_s3 + $0x58] sm:$0xff] }
   0xc   :  { %v169_v50 = vclamps-f32 %v99_v40, 1.0  ;;  %145 = vst [vmem:[%s396_s4 + $0x10] sm:$0xff] %v167_v45  ;;  %146 = vst [vmem:[%s396_s4 + $0x18] sm:$0xff] %v168_v46  ;;  %v170_v56 = vclamps-f32 %v100_v47, 1.0  ;;  %v71_v57 = vadd.f32 %v217_v2, %v48_v48  ;;  %v51_v60 = vmul.f32 %v212_v1, %v28_v44  ;;  %v92_v14 = vld [vmem:[%s395_s3 + $0x68] sm:$0xff]  ;;  %v93_v21 = vld [vmem:[%s395_s3 + $0x70] sm:$0xff] }
   0xd   :  { %v171_v63 = vclamps-f32 %v101_v51, 1.0  ;;  %v172_v0 = vclamps-f32 %v102_v52, 1.0  ;;  %v72_v3 = vadd.f32 %v217_v2, %v49_v54  ;;  %v52_v6 = vmul.f32 %v212_v1, %v29_v49  ;;  %v94_v22 = vld [vmem:[%s395_s3 + $0x78] sm:$0xff] }
   0xe   :  { %147 = vst [vmem:[%s396_s4 + $0x20] sm:$0xff] %v169_v50  ;;  %148 = vst [vmem:[%s396_s4 + $0x28] sm:$0xff] %v170_v56  ;;  %v103_v7 = vadd.f32 %v87_v53, %v71_v57  ;;  %v73_v8 = vadd.f32 %v217_v2, %v50_v59  ;;  %v74_v9 = vadd.f32 %v217_v2, %v51_v60 }
   0xf   :  { %v53_v11 = vmul.f32 %v212_v1, %v30_v55  ;;  %149 = vst [vmem:[%s396_s4 + $0x30] sm:$0xff] %v171_v63  ;;  %150 = vst [vmem:[%s396_s4 + $0x38] sm:$0xff] %v172_v0  ;;  %v104_v12 = vadd.f32 %v88_v58, %v72_v3  ;;  %v75_v13 = vadd.f32 %v217_v2, %v52_v6 }
  0x10   :  { %v54_v15 = vmul.f32 %v212_v1, %v31_v61  ;;  %v55_v16 = vmul.f32 %v212_v1, %v32_v62  ;;  %v173_v17 = vclamps-f32 %v103_v7, 1.0  ;;  %v105_v18 = vadd.f32 %v89_v4, %v73_v8 }
  0x11   :  { %v106_v19 = vadd.f32 %v90_v5, %v74_v9  ;;  %v76_v20 = vadd.f32 %v217_v2, %v53_v11  ;;  %v174_v23 = vclamps-f32 %v104_v12, 1.0  ;;  %v107_v24 = vadd.f32 %v91_v10, %v75_v13 }
  0x12   :  { %v77_v25 = vadd.f32 %v217_v2, %v54_v15  ;;  %v78_v26 = vadd.f32 %v217_v2, %v55_v16  ;;  %151 = vst [vmem:[%s396_s4 + $0x40] sm:$0xff] %v173_v17  ;;  %v175_v1 = vclamps-f32 %v105_v18, 1.0 }
  0x13   :  { %v176_v27 = vclamps-f32 %v106_v19, 1.0  ;;  %v108_v28 = vadd.f32 %v92_v14, %v76_v20  ;;  %152 = vst [vmem:[%s396_s4 + $0x48] sm:$0xff] %v174_v23  ;;  %v177_v29 = vclamps-f32 %v107_v24, 1.0 }
  0x14   :  { %v109_v30 = vadd.f32 %v93_v21, %v77_v25  ;;  %v110_v31 = vadd.f32 %v94_v22, %v78_v26  ;;  %153 = vst [vmem:[%s396_s4 + $0x50] sm:$0xff] %v175_v1 }
  0x15   :  { %154 = vst [vmem:[%s396_s4 + $0x58] sm:$0xff] %v176_v27  ;;  %v178_v2 = vclamps-f32 %v108_v28, 1.0  ;;  %155 = vst [vmem:[%s396_s4 + $0x60] sm:$0xff] %v177_v29 }
  0x16   :  { %v179_v32 = vclamps-f32 %v109_v30, 1.0  ;;  %v180_v33 = vclamps-f32 %v110_v31, 1.0 }
  0x17   :  { %156 = vst [vmem:[%s396_s4 + $0x68] sm:$0xff] %v178_v2 }
  0x18   :  { %157 = vst [vmem:[%s396_s4 + $0x70] sm:$0xff] %v179_v32  ;;  %158 = vst [vmem:[%s396_s4 + $0x78] sm:$0xff] %v180_v33 }

// kernel: basic_block_forward.4
= control target key start
LH: loop header
LB: loop body
LE: loop exit
PB: predicated region body
PF: predicated region fallthrough
CT: control target
= control target key end

     0   :  { %s3007_s21 = smov 0   ;;  %s3009_s22 = smov 0   ;;  %s3347_s0 = inlined_call_operand.vmem [shape: bf16[2,9,9,4], index: 0, kind: input, shape index: {}]   ;;  %s3348_s1 = inlined_call_operand.vmem [shape: bf16[2,9,9,4], index: 1, kind: input, shape index: {}]   ;;  %s3349_s2 = inlined_call_operand.vmem [shape: bf16[2,9,9,4], index: 2, kind: input, shape index: {}]   ;;  %s3350_s3 = inlined_call_operand.vmem [shape: bf16[2,9,9,4], index: 3, kind: input, shape index: {}]   ;;  %s3351_s4 = inlined_call_operand.vmem [shape: bf16[9,4,128], index: 4, kind: input, shape index: {}]   ;;  %s3352_s5 = inlined_call_operand.vmem [shape: f32[2,8,8,4], index: 5, kind: input, shape index: {}]   ;;  %s3353_s6 = inlined_call_operand.vmem [shape: f32[4,128], index: 6, kind: input, shape index: {}]   ;;  %s3354_s7 = inlined_call_operand.vmem [shape: f32[128,128], index: 7, kind: output, shape index: {0}]   ;;  %s3355_s8 = inlined_call_operand.vmem [shape: f32[128,128], index: 8, kind: output, shape index: {1}]   ;;  %s3356_s9 = inlined_call_operand.vmem [shape: f32[16,128], index: 9, kind: output, shape index: {2}]   ;;  %s3357_s10 = inlined_call_operand.vmem [shape: f32[16,128], index: 10, kind: output, shape index: {3}]   ;;  %s3358_s11 = inlined_call_operand.vmem [shape: f32[16,128], index: 11, kind: output, shape index: {4}]   ;;  %s3359_s12 = inlined_call_operand.vmem [shape: f32[16,128], index: 12, kind: output, shape index: {5}]  }
   0x1   :  { %s3011_s23 = smov 0  }
   0x2 LB: > { %s35_s24 = sadd.s32 1, %s2936_s22  ;;  %p2498_p0 = scmp.ge.s32.totalorder %s2940_s23, 1  ;;  %s2940_s23 = sphi %s3011_s23, %s23_s23   ;;  %s2936_s22 = sphi %s3009_s22, %s3363_s22   ;;  %s2932_s21 = sphi %s3007_s21, %s3362_s21  }
   0x3   : > { %p37_p1 = scmp.ge.s32.totalorder %s35_s24, 2  ;;  %p449_p2 = scmp.lt.s32.totalorder %s2940_s23, 3 }
   0x5   : > { %s3365_s24 = smov (%p37_p1, %s35_s24), 0  ;;  %p450_p3 = pnand %p2498_p0, %p449_p2 }
   0x6   : > { %vm667_vm0 = vcmask (!%p450_p3), 1041408   ;;  %v2548_v0 = vld [vmem:[%s3351_s4 + $0x8] sm:$0x3] (!%p450_p3)  ;;  %v2513_v1 = vld [vmem:[%s3351_s4 + $0x2] sm:$0x3] (!%p450_p3)  ;;  %p540_p4 = scmp.lt.s32.totalorder (!%p450_p3), %s2932_s21, 1 }
   0x7   : > { %453 = sbr.rel (%p450_p3) target bundleno = 326 (0x146), region = 48  ;;  %2863 = vmatprep.subr.msk.bf16.mxu0 (!%p450_p3), %vm667_vm0, %v2548_v0  ;;  %2859 = vmatprep.subr.msk.bf16.mxu1 (!%p450_p3), %vm667_vm0, %v2513_v1  ;;  %v1230_v2 = vsel (!%p450_p3), %vm667_vm0, %v2548_v0, 0  ;;  %v669_v3 = vsel (!%p450_p3), %vm667_vm0, %v2513_v1, 0  ;;  %v2557_v4 = vld [vmem:[%s3351_s4 + $0xa] sm:$0x3] (!%p450_p3)  ;;  %vm654_vm1 = vcmask (!%p450_p3), 31744  }
   0x8   : > { %2732 = vmatpush3.bf16.msra.mxu0 (!%p450_p3), %v1230_v2  ;;  %2692 = vmatpush3.bf16.msra.mxu1 (!%p450_p3), %v669_v3  ;;  %v623_v5 = vld [vmem:[%s3351_s4] sm:$0x3] (!%p450_p3)  ;;  %v2574_v6 = vld [vmem:[%s3351_s4 + $0xc] sm:$0x3] (!%p450_p3)  ;;  %v1460_v7 = vsel (!%p450_p3), %vm667_vm0, %v2557_v4, 0  ;;  %vm2072_vm5 = vcmask (!%p450_p3), 1043456  }
   0x9   : > { %2864 = vmatprep.subr.msk.bf16.mxu0 (!%p450_p3), %vm667_vm0, %v2557_v4  ;;  %2860 = vmatprep.subr.msk.bf16.mxu1 (!%p450_p3), %vm667_vm0, %v623_v5  ;;  %v769_v8 = vsel (!%p450_p3), %vm667_vm0, %v623_v5, 0  ;;  %v3061_v9 = vsel (!%p450_p3), %vm667_vm0, %v2574_v6, 0  ;;  %v2530_v14 = vld [vmem:[%s3351_s4 + $0x4] sm:$0x3] (!%p450_p3)  ;;  %vm852_vm2 = vsmask.f32 (!%p450_p3), 3328 }
   0xa   : > { %vm853_vm3 = vsmask.f32 (!%p450_p3), 7440  ;;  %v994_v56 = vsel (!%p450_p3), %vm667_vm0, %v2530_v14, 0  ;;  %v3115_v58 = vld [vmem:[%s3351_s4 + $0xe] sm:$0x3] (!%p450_p3) }
   0xb   : > { %vm3106_vm4 = vmor (!%p450_p3), %vm852_vm2, %vm853_vm3  ;;  %v3120_v59 = vld [vmem:[%s3351_s4 + $0x6] sm:$0x3] (!%p450_p3) }
   0xe   : > { %s3042_s13 = scalar_select %p540_p4, %s2932_s21, 1 }
  0x10   : > { %s2868_s18 = smul.u32 72, %s3042_s13  ;;  %s2636_s17 = sshll.u32 %s3042_s13, 6 }
  0x11   : > { %s2509_s14 = sshll.u32 %s3042_s13, 3 }
  0x12   : > { %s3056_s25 = scalar_lea.vmem %s3348_s1, %s2868_s18  ;;  %s565_s28 = scalar_lea.vmem %s3350_s3, %s2868_s18 }
  0x13   : > { %v2894_v10 = vld [vmem:[%s3056_s25] ss:$8 sps:$4 sm:$0xff]   ;;  %v2896_v12 = vld [vmem:[%s3056_s25 + $0x10] ss:$8 sps:$4 sm:$0xff]   ;;  %s3078_s16 = scalar_lea.vmem %s3347_s0, %s2868_s18  ;;  %s3084_s20 = scalar_lea.vmem %s3349_s2, %s2868_s18 }
  0x14   : > { %v2895_v11 = vld [vmem:[%s565_s28] ss:$8 sps:$4 sm:$0xff]   ;;  %2693 = vmatprep.mubr.msk.bf16.mxu1 %vm654_vm1, %v2894_v10  ;;  %v2897_v13 = vld [vmem:[%s565_s28 + $0x10] ss:$8 sps:$4 sm:$0xff]   ;;  %v1306_v21 = vld [vmem:[%s3084_s20 + $0x4] sm:$0x1]  ;;  %s3260_s18 = scalar_lea.vmem %s3352_s5, %s2636_s17  ;;  %s597_s26 = scalar_lea.vmem %s3357_s10, %s2509_s14 }
  0x15   : > { %2733 = vmatprep.mubr.msk.bf16.mxu0 %vm654_vm1, %v2895_v11  ;;  %2694 = vmatmul.mubr.msk.bf16.vlgmr.msra.gmra.mrb[0].mxu1 %vm654_vm1, %v2896_v12  ;;  %v2898_v15 = vld [vmem:[%s3056_s25 + $0x20] ss:$8 sps:$4 sm:$0xff]   ;;  %v2900_v17 = vld [vmem:[%s3056_s25 + $0x30] ss:$8 sps:$4 sm:$0xff]   ;;  %v1308_v23 = vld [vmem:[%s3084_s20 + $0xc] sm:$0x1] }
  0x16   : > { %2734 = vmatmul.mubr.msk.bf16.vlgmr.msra.gmra.mrb[0].mxu0 %vm654_vm1, %v2897_v13  ;;  %2702 = vmatpush3.bf16.msra.mxu1 %v769_v8  ;;  %v2899_v16 = vld [vmem:[%s565_s28 + $0x20] ss:$8 sps:$4 sm:$0xff]   ;;  %v2901_v18 = vld [vmem:[%s565_s28 + $0x30] ss:$8 sps:$4 sm:$0xff]   ;;  %v1331_v26 = vshll.u32 %v1306_v21, 16  ;;  %v1345_v29 = vshll.u32 %v1308_v23, 16 }
  0x17   : > { %2742 = vmatpush3.bf16.msra.mxu0 %v1460_v7  ;;  %2697 = vmatprep.mubr.msk.bf16.mxu1 %vm654_vm1, %v2898_v15  ;;  %v2902_v19 = vld [vmem:[%s3078_s16] ss:$8 sps:$4 sm:$0xff]   ;;  %v1309_v36 = vld [vmem:[%s3084_s20 + $0x10] sm:$0xf]  ;;  %v1310_v37 = vld [vmem:[%s3084_s20 + $0x14] sm:$0x1] }
  0x18   : > { %2737 = vmatprep.mubr.msk.bf16.mxu0 %vm654_vm1, %v2899_v16  ;;  %2865 = vmatprep.subr.msk.bf16.mxu0 %vm667_vm0, %v2574_v6  ;;  %v1305_v20 = vld [vmem:[%s3084_s20] sm:$0xf]  ;;  %v1307_v22 = vld [vmem:[%s3084_s20 + $0x8] sm:$0xf]  ;;  %v1333_v32 = vrot.slane %v1331_v26, 5  ;;  %v1347_v35 = vrot.slane %v1345_v29, 5 }
  0x19   : > { %2861 = vmatprep.subr.msk.bf16.mxu1 %vm667_vm0, %v2530_v14  ;;  %v1322_v24 = vshrl.u32 %v1305_v20, 16  ;;  %v1325_v25 = vshll.u32 %v1305_v20, 16  ;;  %v1336_v27 = vshrl.u32 %v1307_v22, 16  ;;  %v1339_v28 = vshll.u32 %v1307_v22, 16  ;;  %v2903_v39 = vld [vmem:[%s3078_s16 + $0x10] ss:$8 sps:$4 sm:$0xff]  }
  0x1a   : > { %v1311_v40 = vld [vmem:[%s3084_s20 + $0x18] sm:$0xf]  ;;  %v1312_v41 = vld [vmem:[%s3084_s20 + $0x1c] sm:$0x1]  ;;  %v1350_v42 = vshrl.u32 %v1309_v36, 16  ;;  %v1353_v43 = vshll.u32 %v1309_v36, 16 }
  0x1b   : > { %v1324_v30 = vrot.slane %v1322_v24, 4  ;;  %v1327_v31 = vrot.slane %v1325_v25, 5  ;;  %v1338_v33 = vrot.slane %v1336_v27, 4  ;;  %v1341_v34 = vrot.slane %v1339_v28, 5  ;;  %v2904_v57 = vld [vmem:[%s3078_s16 + $0x20] ss:$8 sps:$4 sm:$0xff]  }
  0x1c   : > { %v1359_v46 = vshll.u32 %v1310_v37, 16  ;;  %v1364_v47 = vshrl.u32 %v1311_v40, 16  ;;  %v1367_v48 = vshll.u32 %v1311_v40, 16  ;;  %v1352_v50 = vrot.slane %v1350_v42, 4  ;;  %v1313_v0 = vld [vmem:[%s3084_s20 + $0x20] sm:$0xf] }
  0x1d   : > { %2698 = vmatmul.mubr.msk.bf16.gmra.mrb[4].mxu1 %vm654_vm1, %v2900_v17  ;;  %v1328_v38 = vor.u32 %v1327_v31, %v1324_v30  ;;  %v1342_v45 = vor.u32 %v1341_v34, %v1338_v33  ;;  %v1355_v51 = vrot.slane %v1353_v43, 5  ;;  %v1373_v52 = vshll.u32 %v1312_v41, 16  ;;  %v1314_v1 = vld [vmem:[%s3084_s20 + $0x24] sm:$0x1]  ;;  %v1315_v4 = vld [vmem:[%s3084_s20 + $0x28] sm:$0xf] }
  0x1e   : > { %2738 = vmatmul.mubr.msk.bf16.gmra.mrb[4].mxu0 %vm654_vm1, %v2901_v18  ;;  %2703 = vmatprep.mubr.msk.bf16.mxu1 %vm654_vm1, %v2902_v19  ;;  %v1366_v54 = vrot.slane %v1364_v47, 4  ;;  %v1369_v55 = vrot.slane %v1367_v48, 5  ;;  %v1361_v62 = vrot.slane %v1359_v46, 5  ;;  %v1316_v5 = vld [vmem:[%s3084_s20 + $0x2c] sm:$0x1]  ;;  %v1378_v6 = vshrl.u32 %v1313_v0, 16 }
  0x1f   : > { %v1329_v49 = vrot.slane %v1328_v38, 4  ;;  %v1343_v53 = vrot.slane %v1342_v45, 4  ;;  %v1356_v61 = vor.u32 %v1355_v51, %v1352_v50  ;;  %v1375_v63 = vrot.slane %v1373_v52, 5  ;;  %v2905_v20 = vld [vmem:[%s3078_s16 + $0x30] ss:$8 sps:$4 sm:$0xff]  }
  0x20   : > { %v1370_v3 = vor.u32 %v1369_v55, %v1366_v54  ;;  %v1381_v7 = vshll.u32 %v1313_v0, 16  ;;  %v1387_v11 = vshll.u32 %v1314_v1, 16  ;;  %v1392_v12 = vshrl.u32 %v1315_v4, 16  ;;  %v1317_v26 = vld [vmem:[%s3084_s20 + $0x30] sm:$0xf]  ;;  %v2046_v44 = vld [vmem:[%s3260_s18 + $0x38] sm:$0xff] }
  0x21   : > { %v1334_v60 = vsel %vm3106_vm4, %v1329_v49, %v1333_v32  ;;  %v1348_v2 = vsel %vm3106_vm4, %v1343_v53, %v1347_v35  ;;  %v1357_v10 = vrot.slane %v1356_v61, 4  ;;  %v1380_v14 = vrot.slane %v1378_v6, 4  ;;  %v1318_v27 = vld [vmem:[%s3084_s20 + $0x34] sm:$0x1]  ;;  %v1319_v30 = vld [vmem:[%s3084_s20 + $0x38] sm:$0xf] }
  0x22   : > { %v2558_v8 = vcombine.low %v1334_v60, %v1348_v2  ;;  %v1371_v13 = vrot.slane %v1370_v3, 4  ;;  %v1383_v15 = vrot.slane %v1381_v7, 5  ;;  %v1395_v16 = vshll.u32 %v1315_v4, 16  ;;  %v1320_v31 = vld [vmem:[%s3084_s20 + $0x3c] sm:$0x1] }
  0x23   : > { %v1362_v17 = vsel %vm3106_vm4, %v1357_v10, %v1361_v62  ;;  %v1394_v18 = vrot.slane %v1392_v12, 4  ;;  %v1401_v19 = vshll.u32 %v1316_v5, 16  ;;  %v3138_v21 = vsel %vm667_vm0, %v3115_v58, 0  ;;  %v836_v37 = vld [vmem:[%s3078_s16] sm:$0xf] }
  0x24   : > { %2743 = vmatprep.mubr.msk.bf16.mxu0 %vm654_vm1, %v2558_v8  ;;  %v1376_v22 = vsel %vm3106_vm4, %v1371_v13, %v1375_v63  ;;  %v1384_v23 = vor.u32 %v1383_v15, %v1380_v14  ;;  %v1389_v24 = vrot.slane %v1387_v11, 5  ;;  %v1397_v25 = vrot.slane %v1395_v16, 5  ;;  %v837_v42 = vld [vmem:[%s3078_s16 + $0x4] sm:$0x1]  ;;  %v838_v48 = vld [vmem:[%s3078_s16 + $0x8] sm:$0xf] }
  0x25   : > { %2704 = vmatmul.mubr.msk.bf16.vlgmr.msra.gmra.mrb[0].mxu1 %vm654_vm1, %v2903_v39  ;;  %v2559_v28 = vcombine.low %v1362_v17, %v1376_v22  ;;  %v1403_v29 = vrot.slane %v1401_v19, 5  ;;  %v1406_v32 = vshrl.u32 %v1317_v26, 16  ;;  %v1409_v35 = vshll.u32 %v1317_v26, 16  ;;  %v839_v52 = vld [vmem:[%s3078_s16 + $0xc] sm:$0x1] }
  0x26   : > { %2712 = vmatpush3.bf16.msra.mxu1 %v994_v56  ;;  %2707 = vmatprep.mubr.msk.bf16.mxu1 %vm654_vm1, %v2904_v57  ;;  %v1385_v33 = vrot.slane %v1384_v23, 4  ;;  %v1398_v34 = vor.u32 %v1397_v25, %v1394_v18  ;;  %v1415_v36 = vshll.u32 %v1318_v27, 16  ;;  %v1420_v39 = vshrl.u32 %v1319_v30, 16  ;;  %v840_v63 = vld [vmem:[%s3078_s16 + $0x10] sm:$0xf] }
  0x27   : > { %2862 = vmatprep.subr.msk.bf16.mxu1 %vm667_vm0, %v3120_v59  ;;  %2744 = vmatmul.mubr.msk.bf16.vlgmr.msra.gmra.mrb[0].mxu0 %vm654_vm1, %v2559_v28  ;;  %v1408_v38 = vrot.slane %v1406_v32, 4  ;;  %v1423_v40 = vshll.u32 %v1319_v30, 16  ;;  %v1429_v41 = vshll.u32 %v1320_v31, 16  ;;  %v1411_v46 = vrot.slane %v1409_v35, 5  ;;  %v841_v4 = vld [vmem:[%s3078_s16 + $0x14] sm:$0x1] }
  0x28   : > { %2752 = vmatpush3.bf16.msra.mxu0 %v3061_v9  ;;  %v1390_v43 = vsel %vm3106_vm4, %v1385_v33, %v1389_v24  ;;  %v1399_v45 = vrot.slane %v1398_v34, 4  ;;  %v1417_v47 = vrot.slane %v1415_v36, 5  ;;  %v1422_v49 = vrot.slane %v1420_v39, 4  ;;  %v2906_v7 = vld [vmem:[%s3078_s16 + $0x8] ss:$8 sps:$4 sm:$0xff]  }
  0x29   : > { %v1425_v50 = vrot.slane %v1423_v40, 5  ;;  %v1431_v51 = vrot.slane %v1429_v41, 5  ;;  %v856_v53 = vshrl.u32 %v836_v37, 16  ;;  %2866 = vmatprep.subr.msk.bf16.mxu0 %vm667_vm0, %v3115_v58  ;;  %v1412_v54 = vor.u32 %v1411_v46, %v1408_v38  ;;  %v842_v8 = vld [vmem:[%s3078_s16 + $0x18] sm:$0xf] }
  0x2a   : > { %v1404_v9 = vsel %vm3106_vm4, %v1399_v45, %v1403_v29  ;;  %v859_v55 = vshll.u32 %v836_v37, 16  ;;  %v865_v56 = vshll.u32 %v837_v42, 16  ;;  %v870_v62 = vshrl.u32 %v838_v48, 16  ;;  %v843_v14 = vld [vmem:[%s3078_s16 + $0x1c] sm:$0x1] }
  0x2b   : > { %v2560_v57 = vcombine.low %v1390_v43, %v1404_v9  ;;  %v1426_v60 = vor.u32 %v1425_v50, %v1422_v49  ;;  %v858_v61 = vrot.slane %v856_v53, 4  ;;  %v1413_v0 = vrot.slane %v1412_v54, 4  ;;  %v844_v25 = vld [vmem:[%s3078_s16 + $0x20] sm:$0xf]  ;;  %v845_v30 = vld [vmem:[%s3078_s16 + $0x24] sm:$0x1] }
  0x2c   : > { %v861_v1 = vrot.slane %v859_v55, 5  ;;  %v867_v2 = vrot.slane %v865_v56, 5  ;;  %v873_v3 = vshll.u32 %v838_v48, 16  ;;  %v872_v5 = vrot.slane %v870_v62, 4  ;;  %v846_v34 = vld [vmem:[%s3078_s16 + $0x28] sm:$0xf] }
  0x2d   : > { %2708 = vmatmul.mubr.msk.bf16.gmra.mrb[4].mxu1 %vm654_vm1, %v2905_v20  ;;  %2747 = vmatprep.mubr.msk.bf16.mxu0 %vm654_vm1, %v2560_v57  ;;  %v1427_v58 = vrot.slane %v1426_v60, 4  ;;  %v879_v6 = vshll.u32 %v839_v52, 16  ;;  %v884_v10 = vshrl.u32 %v840_v63, 16  ;;  %v1418_v11 = vsel %vm3106_vm4, %v1413_v0, %v1417_v47  ;;  %v847_v35 = vld [vmem:[%s3078_s16 + $0x2c] sm:$0x1] }
  0x2e   : > { %v862_v12 = vor.u32 %v861_v1, %v858_v61  ;;  %v875_v13 = vrot.slane %v873_v3, 5  ;;  %v887_v15 = vshll.u32 %v840_v63, 16  ;;  %v893_v19 = vshll.u32 %v841_v4, 16  ;;  %v2907_v43 = vld [vmem:[%s3078_s16 + $0x18] ss:$8 sps:$4 sm:$0xff]  }
  0x2f   : > { %v1432_v16 = vsel %vm3106_vm4, %v1427_v58, %v1431_v51  ;;  %v881_v17 = vrot.slane %v879_v6, 5  ;;  %v886_v18 = vrot.slane %v884_v10, 4  ;;  %v898_v27 = vshrl.u32 %v842_v8, 16  ;;  %v2908_v51 = vld [vmem:[%s3078_s16 + $0x28] ss:$8 sps:$4 sm:$0xff]  }
  0x30   : > { %v2561_v20 = vcombine.low %v1418_v11, %v1432_v16  ;;  %v863_v22 = vrot.slane %v862_v12, 4  ;;  %v876_v23 = vor.u32 %v875_v13, %v872_v5  ;;  %v889_v24 = vrot.slane %v887_v15, 5  ;;  %v848_v52 = vld [vmem:[%s3078_s16 + $0x30] sm:$0xf]  ;;  %v849_v56 = vld [vmem:[%s3078_s16 + $0x34] sm:$0x1] }
  0x31   : > { %v895_v26 = vrot.slane %v893_v19, 5  ;;  %v901_v28 = vshll.u32 %v842_v8, 16  ;;  %v907_v29 = vshll.u32 %v843_v14, 16  ;;  %v912_v36 = vshrl.u32 %v844_v25, 16  ;;  %v850_v63 = vld [vmem:[%s3078_s16 + $0x38] sm:$0xf] }
  0x32   : > { %2748 = vmatmul.mubr.msk.bf16.gmra.mrb[4].mxu0 %vm654_vm1, %v2561_v20  ;;  %v868_v31 = vsel %vm3106_vm4, %v863_v22, %v867_v2  ;;  %v877_v32 = vrot.slane %v876_v23, 4  ;;  %v890_v33 = vor.u32 %v889_v24, %v886_v18  ;;  %v900_v37 = vrot.slane %v898_v27, 4  ;;  %v851_v0 = vld [vmem:[%s3078_s16 + $0x3c] sm:$0x1]  ;;  %v2616_v1 = vld [vmem:[%s3351_s4 + $0x10] sm:$0x3] }
  0x33   : > { %2753 = vmatprep.mubr.msk.bf16.mxu0 %vm654_vm1, %v2906_v7  ;;  %v903_v38 = vrot.slane %v901_v28, 5  ;;  %v909_v39 = vrot.slane %v907_v29, 5  ;;  %v915_v40 = vshll.u32 %v844_v25, 16  ;;  %v914_v45 = vrot.slane %v912_v36, 4  ;;  %v3203_v15 = vld [vmem:[%s3353_s6] sm:$0xf] }
  0x34   : > { %v882_v41 = vsel %vm3106_vm4, %v877_v32, %v881_v17  ;;  %v891_v42 = vrot.slane %v890_v33, 4  ;;  %v921_v46 = vshll.u32 %v845_v30, 16  ;;  %v926_v50 = vshrl.u32 %v846_v34, 16  ;;  %v2909_v20 = vld [vmem:[%s3078_s16 + $0x38] ss:$8 sps:$4 sm:$0xff]  }
  0x35   : > { %v2531_v47 = vcombine.low %v868_v31, %v882_v41  ;;  %v904_v48 = vor.u32 %v903_v38, %v900_v37  ;;  %v917_v49 = vrot.slane %v915_v40, 5  ;;  %v1112_v53 = vsel %vm667_vm0, %v3120_v59, 0  ;;  %v2911_v23 = vld [vmem:[%s3056_s25 + $0x8] ss:$8 sps:$4 sm:$0xff]   ;;  %v2601_v38 = vld [vmem:[%s3078_s16 + $0xc] sm:$0x1] }
  0x36   : > { %v923_v9 = vrot.slane %v921_v46, 5  ;;  %v929_v54 = vshll.u32 %v846_v34, 16  ;;  %v935_v55 = vshll.u32 %v847_v35, 16  ;;  %v896_v57 = vsel %vm3106_vm4, %v891_v42, %v895_v26  ;;  %v2910_v33 = vld [vmem:[%s3084_s20] ss:$8 sps:$4 sm:$0xff]  }
  0x37   : > { %2713 = vmatprep.mubr.msk.bf16.mxu1 %vm654_vm1, %v2531_v47  ;;  %v905_v60 = vrot.slane %v904_v48, 4  ;;  %v918_v61 = vor.u32 %v917_v49, %v914_v45  ;;  %v928_v62 = vrot.slane %v926_v50, 4  ;;  %v940_v3 = vshrl.u32 %v848_v52, 16  ;;  %v2913_v35 = vld [vmem:[%s3056_s25 + $0x18] ss:$8 sps:$4 sm:$0xff]  }
  0x38   : > { %v931_v2 = vrot.slane %v929_v54, 5  ;;  %v937_v59 = vrot.slane %v935_v55, 5  ;;  %v943_v4 = vshll.u32 %v848_v52, 16  ;;  %v949_v6 = vshll.u32 %v849_v56, 16  ;;  %v2600_v36 = vld [vmem:[%s3078_s16 + $0x8] sm:$0xf] }
  0x39   : > { %v910_v58 = vsel %vm3106_vm4, %v905_v60, %v909_v39  ;;  %v919_v5 = vrot.slane %v918_v61, 4  ;;  %v954_v7 = vshrl.u32 %v850_v63, 16  ;;  %v942_v11 = vrot.slane %v940_v3, 4  ;;  %v2915_v37 = vld [vmem:[%s3056_s25 + $0x28] ss:$8 sps:$4 sm:$0xff]  }
  0x3a   : > { %v2532_v8 = vcombine.low %v896_v57, %v910_v58  ;;  %2754 = vmatmul.mubr.msk.bf16.vlgmr.msra.gmra.mrb[0].mxu0 %vm654_vm1, %v2907_v43  ;;  %v932_v10 = vor.u32 %v931_v2, %v928_v62  ;;  %v945_v12 = vrot.slane %v943_v4, 5  ;;  %v957_v14 = vshll.u32 %v850_v63, 16  ;;  %v2602_v39 = vld [vmem:[%s3078_s16 + $0x10] sm:$0xf]  ;;  %v2603_v40 = vld [vmem:[%s3078_s16 + $0x14] sm:$0x1] }
  0x3b   : > { %2762 = vmatpush3.bf16.msra.mxu0 %v3138_v21  ;;  %2757 = vmatprep.mubr.msk.bf16.mxu0 %vm654_vm1, %v2908_v51  ;;  %v956_v13 = vrot.slane %v954_v7, 4  ;;  %v924_v16 = vsel %vm3106_vm4, %v919_v5, %v923_v9  ;;  %v963_v19 = vshll.u32 %v851_v0, 16  ;;  %v951_v21 = vrot.slane %v949_v6, 5  ;;  %v2604_v46 = vld [vmem:[%s3078_s16 + $0x18] sm:$0xf] }
  0x3c   : > { %2714 = vmatmul.mubr.msk.bf16.vlgmr.msra.gmra.mrb[0].mxu1 %vm654_vm1, %v2532_v8  ;;  %v933_v17 = vrot.slane %v932_v10, 4  ;;  %v946_v18 = vor.u32 %v945_v12, %v942_v11  ;;  %2867 = vmatprep.subr.msk.bf16.mxu0 %vm667_vm0, %v2616_v1  ;;  %v959_v22 = vrot.slane %v957_v14, 5  ;;  %v1928_v31 = vsel %vm667_vm0, %v2616_v1, 0  ;;  %v2605_v49 = vld [vmem:[%s3078_s16 + $0x1c] sm:$0x1] }
  0x3d   : > { %2722 = vmatpush3.bf16.msra.mxu1 %v1112_v53  ;;  %v965_v28 = vrot.slane %v963_v19, 5  ;;  %v1790_v41 = vshrl.u32 %v2600_v36, 16  ;;  %v1793_v42 = vshll.u32 %v2600_v36, 16  ;;  %v1799_v43 = vshll.u32 %v2601_v38, 16  ;;  %v2606_v50 = vld [vmem:[%s3078_s16 + $0x20] sm:$0xf] }
  0x3e   : > { %v938_v24 = vsel %vm3106_vm4, %v933_v17, %v937_v59  ;;  %v947_v25 = vrot.slane %v946_v18, 4  ;;  %2781 = vmatprep.subr.msk.mxu1 %vm2072_vm5, %v3203_v15  ;;  %v960_v27 = vor.u32 %v959_v22, %v956_v13  ;;  %v1804_v45 = vshrl.u32 %v2602_v39, 16  ;;  %v2912_v51 = vld [vmem:[%s3084_s20 + $0x10] ss:$8 sps:$4 sm:$0xff]   ;;  %v2607_v55 = vld [vmem:[%s3078_s16 + $0x24] sm:$0x1] }
  0x3f   : > { %v2533_v26 = vcombine.low %v924_v16, %v938_v24  ;;  %v1807_v47 = vshll.u32 %v2602_v39, 16  ;;  %v1813_v48 = vshll.u32 %v2603_v40, 16  ;;  %v1792_v52 = vrot.slane %v1790_v41, 4  ;;  %v2914_v56 = vld [vmem:[%s3084_s20 + $0x20] ss:$8 sps:$4 sm:$0xff]  }
  0x40   : > { %v952_v29 = vsel %vm3106_vm4, %v947_v25, %v951_v21  ;;  %v961_v30 = vrot.slane %v960_v27, 4  ;;  %v1795_v53 = vrot.slane %v1793_v42, 5  ;;  %v1801_v9 = vrot.slane %v1799_v43, 5  ;;  %v2608_v59 = vld [vmem:[%s3078_s16 + $0x28] sm:$0xf] }
  0x41   : > { %2717 = vmatprep.mubr.msk.bf16.mxu1 %vm654_vm1, %v2533_v26  ;;  %v1806_v54 = vrot.slane %v1804_v45, 4  ;;  %v1809_v57 = vrot.slane %v1807_v47, 5  ;;  %v1815_v60 = vrot.slane %v1813_v48, 5  ;;  %v1818_v61 = vshrl.u32 %v2604_v46, 16  ;;  %v2609_v6 = vld [vmem:[%s3078_s16 + $0x2c] sm:$0x1] }
  0x42   : > { %2758 = vmatmul.mubr.msk.bf16.gmra.mrb[4].mxu0 %vm654_vm1, %v2909_v20  ;;  %v966_v32 = vsel %vm3106_vm4, %v961_v30, %v965_v28  ;;  %v1821_v62 = vshll.u32 %v2604_v46, 16  ;;  %v1796_v63 = vor.u32 %v1795_v53, %v1792_v52  ;;  %v1827_v0 = vshll.u32 %v2605_v49, 16  ;;  %v2610_v12 = vld [vmem:[%s3078_s16 + $0x30] sm:$0xf]  ;;  %v2917_v18 = vld [vmem:[%s3056_s25 + $0x38] ss:$8 sps:$4 sm:$0xff]   ;;  %s593_s25 = scalar_lea.vmem %s3356_s9, %s2509_s14 }
  0x43   : > { %2763 = vmatprep.mubr.msk.bf16.mxu0 %vm654_vm1, %v2911_v23  ;;  %v2534_v34 = vcombine.low %v952_v29, %v966_v32  ;;  %v1832_v1 = vshrl.u32 %v2606_v50, 16  ;;  %v1835_v2 = vshll.u32 %v2606_v50, 16  ;;  %v1810_v3 = vor.u32 %v1809_v57, %v1806_v54  ;;  %v2611_v21 = vld [vmem:[%s3078_s16 + $0x34] sm:$0x1]  ;;  %v2612_v28 = vld [vmem:[%s3078_s16 + $0x38] sm:$0xf] }
  0x44   : > { %v1820_v4 = vrot.slane %v1818_v61, 4  ;;  %v1823_v58 = vrot.slane %v1821_v62, 5  ;;  %v1841_v5 = vshll.u32 %v2607_v55, 16  ;;  %v1797_v7 = vrot.slane %v1796_v63, 4  ;;  %v2916_v29 = vld [vmem:[%s3084_s20 + $0x30] ss:$8 sps:$4 sm:$0xff]  }
  0x45   : > { %2718 = vmatmul.mubr.msk.bf16.gmra.mrb[4].mxu1 %vm654_vm1, %v2534_v34  ;;  %v1829_v8 = vrot.slane %v1827_v0, 5  ;;  %v1834_v10 = vrot.slane %v1832_v1, 4  ;;  %v1837_v11 = vrot.slane %v1835_v2, 5  ;;  %v1811_v13 = vrot.slane %v1810_v3, 4  ;;  %v2614_v36 = vld [vmem:[%s3078_s16 + $0x40] sm:$0xf] }
  0x46   : > { %2723 = vmatprep.mubr.msk.bf16.mxu1 %vm654_vm1, %v2910_v33  ;;  %v1824_v14 = vor.u32 %v1823_v58, %v1820_v4  ;;  %v1843_v16 = vrot.slane %v1841_v5, 5  ;;  %v1846_v17 = vshrl.u32 %v2608_v59, 16  ;;  %v1802_v19 = vsel %vm3106_vm4, %v1797_v7, %v1801_v9  ;;  %v2613_v33 = vld [vmem:[%s3078_s16 + $0x3c] sm:$0x1]  ;;  %v2615_v39 = vld [vmem:[%s3078_s16 + $0x44] sm:$0x1] }
  0x47   : > { %v1838_v20 = vor.u32 %v1837_v11, %v1834_v10  ;;  %v1849_v22 = vshll.u32 %v2608_v59, 16  ;;  %v1855_v23 = vshll.u32 %v2609_v6, 16  ;;  %v1816_v24 = vsel %vm3106_vm4, %v1811_v13, %v1815_v60  ;;  %v2039_v47 = vld [vmem:[%s3260_s18] sm:$0xff]  ;;  %v2040_v4 = vld [vmem:[%s3260_s18 + $0x8] sm:$0xff]  ;;  %v2041_v6 = vld [vmem:[%s3260_s18 + $0x10] sm:$0xff]  ;;  %s2505_s16 = sshll.u32 %s2932_s21, 3  ;;  %s605_s21 = scalar_lea.vmem %s3359_s12, %s2509_s14 }
  0x48   : > { %v1825_v25 = vrot.slane %v1824_v14, 4  ;;  %v1848_v26 = vrot.slane %v1846_v17, 4  ;;  %v1860_v27 = vshrl.u32 %v2610_v12, 16  ;;  %v2617_v30 = vcombine.low %v1802_v19, %v1816_v24  ;;  %v2042_v10 = vld [vmem:[%s3260_s18 + $0x18] sm:$0xff]  ;;  %v2043_v11 = vld [vmem:[%s3260_s18 + $0x20] sm:$0xff]  ;;  %v2045_v13 = vld [vmem:[%s3260_s18 + $0x30] sm:$0xff] }
  0x49   : > { %v1851_v32 = vrot.slane %v1849_v22, 5  ;;  %v1863_v34 = vshll.u32 %v2610_v12, 16  ;;  %v1857_v38 = vrot.slane %v1855_v23, 5  ;;  %v1874_v40 = vshrl.u32 %v2612_v28, 16  ;;  %v2044_v12 = vld [vmem:[%s3260_s18 + $0x28] sm:$0xff]  ;;  %p576_p5 = scmp.lt.s32.totalorder %s2505_s16, 15 }
  0x4a   : > { %2764 = vmatmul.mubr.msk.bf16.vlgmr.msra.gmra.mrb[0].mxu0 %vm654_vm1, %v2913_v35  ;;  %v1869_v35 = vshll.u32 %v2611_v21, 16  ;;  %v1877_v41 = vshll.u32 %v2612_v28, 16  ;;  %v1830_v42 = vsel %vm3106_vm4, %v1825_v25, %v1829_v8  ;;  %v1883_v46 = vshll.u32 %v2613_v33, 16 }
  0x4b   : > { %2772 = vmatpush3.bf16.msra.mxu0 %v1928_v31  ;;  %2767 = vmatprep.mubr.msk.bf16.mxu0 %vm654_vm1, %v2915_v37  ;;  %v1839_v31 = vrot.slane %v1838_v20, 4  ;;  %v1852_v37 = vor.u32 %v1851_v32, %v1848_v26  ;;  %v1865_v45 = vrot.slane %v1863_v34, 5  ;;  %v1876_v49 = vrot.slane %v1874_v40, 4  ;;  %s3367_s16 = smov (!%p576_p5, %s2505_s16), 15 }
  0x4c   : > { %v1879_v50 = vrot.slane %v1877_v41, 5  ;;  %v1871_v53 = vrot.slane %v1869_v35, 5  ;;  %v1891_v9 = vshll.u32 %v2614_v36, 16  ;;  %v1897_v54 = vshll.u32 %v2615_v39, 16  ;;  %s2506_s20 = sshll.u32 %s3367_s16, 3  ;;  %s601_s16 = scalar_lea.vmem %s3358_s11, %s2509_s14 }
  0x4d   : > { %2724 = vmatmul.mubr.msk.bf16.vlgmr.msra.gmra.mrb[0].mxu1 %vm654_vm1, %v2912_v51  ;;  %v1844_v43 = vsel %vm3106_vm4, %v1839_v31, %v1843_v16  ;;  %v1853_v48 = vrot.slane %v1852_v37, 4  ;;  %v1888_v51 = vshrl.u32 %v2614_v36, 16  ;;  %v1885_v62 = vrot.slane %v1883_v46, 5  ;;  %s3302_s28 = scalar_lea.vmem %s3354_s7, %s2506_s20  ;;  %s3307_s30 = scalar_lea.vmem %s3355_s8, %s2506_s20 }
  0x4e   : > { %2782 = vmatpush3.msk.msra.mxu1 %vm2072_vm5, %v3203_v15  ;;  %2727 = vmatprep.mubr.msk.bf16.mxu1 %vm654_vm1, %v2914_v56  ;;  %v1862_v15 = vrot.slane %v1860_v27, 4  ;;  %v2618_v55 = vcombine.low %v1830_v42, %v1844_v43  ;;  %v1880_v56 = vor.u32 %v1879_v50, %v1876_v49  ;;  %v1893_v63 = vrot.slane %v1891_v9, 5 }
  0x4f   : > { %v1890_v57 = vrot.slane %v1888_v51, 4  ;;  %v1858_v60 = vsel %vm3106_vm4, %v1853_v48, %v1857_v38  ;;  %v1899_v59 = vrot.slane %v1897_v54, 5 }
  0x50   : > { %v1866_v52 = vor.u32 %v1865_v45, %v1862_v15  ;;  %v1881_v0 = vrot.slane %v1880_v56, 4 }
  0x51   : > { %v1894_v2 = vor.u32 %v1893_v63, %v1890_v57 }
  0x52   : > { %2768 = vmatmul.mubr.msk.bf16.gmra.mrb[4].mxu0 %vm654_vm1, %v2917_v18  ;;  %v1867_v61 = vrot.slane %v1866_v52, 4  ;;  %v1886_v58 = vsel %vm3106_vm4, %v1881_v0, %v1885_v62 }
  0x53   : > { %2773 = vmatprep.mubr.msk.bf16.mxu0 %vm654_vm1, %v2617_v30  ;;  %v1895_v5 = vrot.slane %v1894_v2, 4 }
  0x54   : > { %v1872_v1 = vsel %vm3106_vm4, %v1867_v61, %v1871_v53 }
  0x55   : > { %2728 = vmatmul.mubr.msk.bf16.gmra.mrb[4].mxu1 %vm654_vm1, %v2916_v29  ;;  %v2619_v3 = vcombine.low %v1858_v60, %v1872_v1  ;;  %v1900_v7 = vsel %vm3106_vm4, %v1895_v5, %v1899_v59 }
  0x56   : > { %2783 = vmatprep.mubr.msk.f32.mxu1 %vm654_vm1, %v2039_v47  ;;  %v2620_v8 = vcombine.low %v1886_v58, %v1900_v7 }
  0x5a   : > { %2774 = vmatmul.mubr.msk.bf16.vlgmr.msra.gmra.mrb[0].mxu0 %vm654_vm1, %v2618_v55 }
  0x5b   : > { %2777 = vmatprep.mubr.msk.bf16.mxu0 %vm654_vm1, %v2619_v3 }
  0x5d   : > { %2784 = vmatmul.mubr.msk.f32.vlgmr.msra.gmra.mrb[8].mxu1 %vm654_vm1, %v2040_v4 }
  0x5e   : > { %2786 = vmatprep.mubr.msk.f32.mxu1 %vm654_vm1, %v2041_v6 }
  0x61   : > { %2787 = vmatmul.mubr.msk.f32.gmra.mrb[10].mxu1 %vm654_vm1, %v2042_v10 }
  0x62   : > { %2778 = vmatmul.mubr.msk.bf16.gmra.mrb[4].mxu0 %vm654_vm1, %v2620_v8  ;;  %2789 = vmatprep.mubr.msk.f32.mxu1 %vm654_vm1, %v2043_v11 }
  0x65   : > { %2790 = vmatmul.mubr.msk.f32.gmra.mrb[12].mxu1 %vm654_vm1, %v2044_v12 }
  0x66   : > { %2792 = vmatprep.mubr.msk.f32.mxu1 %vm654_vm1, %v2045_v13 }
  0x69   : > { %2793 = vmatmul.mubr.msk.f32.gmra.mrb[14].mxu1 %vm654_vm1, %v2046_v44 }
 0x120   : > { %v2725_v14 = vpop.f32.mrb[0].mxu1 }
 0x121   : > { %v1148_v16 = vpop.f32.mrb[1].mxu1 }
 0x122   : > { %v2726_v17 = vpop.f32.mrb[2].mxu1 }
 0x123   : > { %v1151_v18 = vpop.f32.mrb[3].mxu1 }
 0x128   : > { %v2729_v19 = vpop.f32.mrb[4].mxu1 }
 0x129   : > { %v1164_v20 = vpop.f32.mrb[5].mxu1 }
 0x12a   : > { %v2730_v21 = vpop.f32.mrb[6].mxu1 }
 0x12b   : > { %v1167_v22 = vpop.f32.mrb[7].mxu1 }
 0x12d   : > { %v2775_v23 = vpop.f32.mrb[0].mxu0 }
 0x12e   : > { %v2795_v24 = vadd.f32 %v2775_v23, %v2725_v14  ;;  %v1964_v25 = vpop.f32.mrb[1].mxu0 }
 0x12f   : > { %v2796_v26 = vadd.f32 %v1964_v25, %v1148_v16  ;;  %v2776_v27 = vpop.f32.mrb[2].mxu0 }
 0x130   : > { %2005 = vst [vmem:[%s3302_s28 + $0x10] sm:$0xff] %v2795_v24  ;;  %v2797_v28 = vadd.f32 %v2776_v27, %v2726_v17  ;;  %v1967_v29 = vpop.f32.mrb[3].mxu0  ;;  %v2785_v30 = vpop.f32.mrb[8].mxu1  ;;  %v2024_v38 = vmul.f32 %v2795_v24, %v2795_v24 }
 0x131   : > { %2003 = vst [vmem:[%s3302_s28] sm:$0xff] %v2796_v26  ;;  %v2798_v31 = vadd.f32 %v1967_v29, %v1151_v18  ;;  %v2022_v32 = vmul.f32 %v2796_v26, %v2796_v26  ;;  %2182 = vst [vmem:[%s3307_s30 + $0x8] sm:$0xff] %v2785_v30  ;;  %v2201_v33 = vmul.f32 %v2785_v30, %v2785_v30  ;;  %v2142_v15 = vpop.f32.mrb[9].mxu1 }
 0x132   : > { %2006 = vst [vmem:[%s3302_s28 + $0x18] sm:$0xff] %v2797_v28  ;;  %2181 = vst [vmem:[%s3307_s30] sm:$0xff] %v2142_v15  ;;  %v2190_v34 = vadd.f32 %v2785_v30, %v2142_v15  ;;  %v2200_v35 = vmul.f32 %v2142_v15, %v2142_v15  ;;  %v2025_v45 = vmul.f32 %v2797_v28, %v2797_v28 }
 0x133   : > { %2004 = vst [vmem:[%s3302_s28 + $0x8] sm:$0xff] %v2798_v31  ;;  %v2012_v36 = vadd.f32 %v2798_v31, %v2796_v26  ;;  %v2023_v37 = vmul.f32 %v2798_v31, %v2798_v31 }
 0x134   : > { %v2208_v39 = vadd.f32 %v2201_v33, %v2200_v35  ;;  %v2788_v42 = vpop.f32.mrb[10].mxu1 }
 0x135   : > { %v2013_v40 = vadd.f32 %v2795_v24, %v2012_v36  ;;  %v2030_v41 = vadd.f32 %v2023_v37, %v2022_v32  ;;  %v2779_v43 = vpop.f32.mrb[4].mxu0  ;;  %2184 = vst [vmem:[%s3307_s30 + $0x18] sm:$0xff] %v2788_v42  ;;  %v2203_v46 = vmul.f32 %v2788_v42, %v2788_v42  ;;  %v2152_v47 = vpop.f32.mrb[11].mxu1 }
 0x136   : > { %v2799_v48 = vadd.f32 %v2779_v43, %v2729_v19  ;;  %v1980_v49 = vpop.f32.mrb[5].mxu0  ;;  %2183 = vst [vmem:[%s3307_s30 + $0x10] sm:$0xff] %v2152_v47  ;;  %v2191_v51 = vadd.f32 %v2190_v34, %v2152_v47  ;;  %v2202_v52 = vmul.f32 %v2152_v47, %v2152_v47 }
 0x137   : > { %v2031_v50 = vadd.f32 %v2030_v41, %v2024_v38  ;;  %v2800_v53 = vadd.f32 %v1980_v49, %v1164_v20  ;;  %v2780_v9 = vpop.f32.mrb[6].mxu0  ;;  %v2014_v54 = vadd.f32 %v2797_v28, %v2013_v40 }
 0x138   : > { %2009 = vst [vmem:[%s3302_s28 + $0x30] sm:$0xff] %v2799_v48  ;;  %v2801_v55 = vadd.f32 %v2780_v9, %v2730_v21  ;;  %v1983_v56 = vpop.f32.mrb[7].mxu0  ;;  %v2209_v57 = vadd.f32 %v2208_v39, %v2202_v52  ;;  %v2791_v60 = vpop.f32.mrb[12].mxu1  ;;  %v2192_v63 = vadd.f32 %v2788_v42, %v2191_v51  ;;  %v2028_v12 = vmul.f32 %v2799_v48, %v2799_v48 }
 0x139   : > { %2007 = vst [vmem:[%s3302_s28 + $0x20] sm:$0xff] %v2800_v53  ;;  %v2026_v61 = vmul.f32 %v2800_v53, %v2800_v53  ;;  %v2032_v62 = vadd.f32 %v2031_v50, %v2025_v45  ;;  %2186 = vst [vmem:[%s3307_s30 + $0x28] sm:$0xff] %v2791_v60  ;;  %v2205_v0 = vmul.f32 %v2791_v60, %v2791_v60  ;;  %v2162_v2 = vpop.f32.mrb[13].mxu1 }
 0x13a   : > { %v2015_v1 = vadd.f32 %v2800_v53, %v2014_v54  ;;  %2010 = vst [vmem:[%s3302_s28 + $0x38] sm:$0xff] %v2801_v55  ;;  %v2802_v59 = vadd.f32 %v1983_v56, %v1167_v22  ;;  %2185 = vst [vmem:[%s3307_s30 + $0x20] sm:$0xff] %v2162_v2  ;;  %v2193_v4 = vadd.f32 %v2192_v63, %v2162_v2 }
 0x13b   : > { %v2033_v3 = vadd.f32 %v2032_v62, %v2026_v61  ;;  %v2204_v58 = vmul.f32 %v2162_v2, %v2162_v2  ;;  %v2210_v5 = vadd.f32 %v2209_v57, %v2203_v46  ;;  %v2029_v20 = vmul.f32 %v2801_v55, %v2801_v55 }
 0x13c   : > { %2008 = vst [vmem:[%s3302_s28 + $0x28] sm:$0xff] %v2802_v59  ;;  %v2016_v6 = vadd.f32 %v2802_v59, %v2015_v1  ;;  %v2027_v7 = vmul.f32 %v2802_v59, %v2802_v59  ;;  %v2794_v10 = vpop.f32.mrb[14].mxu1  ;;  %v2194_v11 = vadd.f32 %v2791_v60, %v2193_v4 }
 0x13d   : > { %v2211_v8 = vadd.f32 %v2210_v5, %v2204_v58  ;;  %2188 = vst [vmem:[%s3307_s30 + $0x38] sm:$0xff] %v2794_v10  ;;  %v2172_v14 = vpop.f32.mrb[15].mxu1  ;;  %v2207_v16 = vmul.f32 %v2794_v10, %v2794_v10 }
 0x13e   : > { %v2017_v13 = vadd.f32 %v2799_v48, %v2016_v6  ;;  %v2034_v44 = vadd.f32 %v2033_v3, %v2027_v7  ;;  %2187 = vst [vmem:[%s3307_s30 + $0x30] sm:$0xff] %v2172_v14  ;;  %v2195_v17 = vadd.f32 %v2194_v11, %v2172_v14  ;;  %v2206_v18 = vmul.f32 %v2172_v14, %v2172_v14 }
 0x13f   : > { %v2212_v19 = vadd.f32 %v2211_v8, %v2205_v0 }
 0x140   : > { %v2018_v21 = vadd.f32 %v2801_v55, %v2017_v13  ;;  %v2035_v22 = vadd.f32 %v2034_v44, %v2028_v12  ;;  %v2196_v23 = vadd.f32 %v2794_v10, %v2195_v17 }
 0x141   : > { %v2213_v24 = vadd.f32 %v2212_v19, %v2206_v18 }
 0x142   : > { %v2036_v25 = vadd.f32 %v2035_v22, %v2029_v20  ;;  %2020 = vst [vmem:[%s593_s25] sm:$0xff] %v2018_v21  ;;  %2198 = vst [vmem:[%s601_s16] sm:$0xff] %v2196_v23 }
 0x143   : > { %v2214_v26 = vadd.f32 %v2213_v24, %v2207_v16 }
 0x144   : > { %2038 = vst [vmem:[%s597_s26] sm:$0xff] %v2036_v25 }
 0x145   : > { %2216 = vst [vmem:[%s605_s21] sm:$0xff] %v2214_v26 }
 0x146 PF: > { %s23_s23 = sadd.s32 1, %s2940_s23   ;;  %s3362_s21 = smov %s2936_s22 }
 0x147   : > { %p20_p6 = scmp.ge.s32.totalorder %s23_s23, 4   ;;  %s3363_s22 = smov %s3365_s24 }
 0x149   :  { %22 = sbr.rel (!%p20_p6) target bundleno = 2 (0x2), region = 164 }

// kernel: basic_block_forward.6
= control target key start
LH: loop header
LB: loop body
LE: loop exit
PB: predicated region body
PF: predicated region fallthrough
CT: control target
= control target key end

     0   :  { %s2398_s15 = smov 0   ;;  %s2400_s16 = smov 0   ;;  %s2945_s0 = inlined_call_operand.vmem [shape: bf16[2,10,10,8], index: 0, kind: input, shape index: {}]   ;;  %s2946_s1 = inlined_call_operand.vmem [shape: bf16[9,8,128], index: 1, kind: input, shape index: {}]   ;;  %s2947_s2 = inlined_call_operand.vmem [shape: f32[128,128], index: 2, kind: output, shape index: {0}]   ;;  %s2948_s3 = inlined_call_operand.vmem [shape: f32[16,128], index: 3, kind: output, shape index: {1}]   ;;  %s2949_s4 = inlined_call_operand.vmem [shape: f32[16,128], index: 4, kind: output, shape index: {2}]  }
   0x1   :  { %s2402_s17 = smov 0  }
   0x2 LB: > { %s27_s18 = sadd.s32 1, %s2367_s16  ;;  %p1924_p0 = scmp.ge.s32.totalorder %s2371_s17, 1  ;;  %s2371_s17 = sphi %s2402_s17, %s15_s17   ;;  %s2367_s16 = sphi %s2400_s16, %s2955_s16   ;;  %s2363_s15 = sphi %s2398_s15, %s2954_s15  }
   0x3   : > { %p29_p1 = scmp.ge.s32.totalorder %s27_s18, 2  ;;  %p185_p2 = scmp.lt.s32.totalorder %s2371_s17, 3 }
   0x5   : > { %s2957_s18 = smov (%p29_p1, %s27_s18), 0  ;;  %p186_p3 = pnand %p1924_p0, %p185_p2 }
   0x6   : > { %v1930_v0 = vld [vmem:[%s2946_s1 + $0x4] sm:$0xf] (!%p186_p3)  ;;  %vm410_vm0 = vcmask (!%p186_p3), 1043456   ;;  %v2424_v1 = vld [vmem:[%s2946_s1 + $0x10] sm:$0xf] (!%p186_p3)  ;;  %p222_p4 = scmp.lt.s32.totalorder (!%p186_p3), %s2363_s15, 1 }
   0x7   : > { %189 = sbr.rel (%p186_p3) target bundleno = 342 (0x156), region = 28  ;;  %2301 = vmatprep.subr.msk.bf16.mxu1 (!%p186_p3), %vm410_vm0, %v1930_v0  ;;  %2305 = vmatprep.subr.msk.bf16.mxu0 (!%p186_p3), %vm410_vm0, %v2424_v1  ;;  %v412_v2 = vsel (!%p186_p3), %vm410_vm0, %v1930_v0, 0  ;;  %v2433_v3 = vsel (!%p186_p3), %vm410_vm0, %v2424_v1, 0  ;;  %v259_v4 = vld [vmem:[%s2946_s1] sm:$0xf] (!%p186_p3)  ;;  %vm397_vm3 = vcmask (!%p186_p3), 64512  }
   0x8   : > { %2146 = vmatpush3.bf16.msra.mxu1 (!%p186_p3), %v412_v2  ;;  %2186 = vmatpush3.bf16.msra.mxu0 (!%p186_p3), %v2433_v3  ;;  %v2022_v5 = vld [vmem:[%s2946_s1 + $0x14] sm:$0xf] (!%p186_p3)  ;;  %vm268_vm1 = vsmask.f32 (!%p186_p3), 3328  ;;  %vm269_vm2 = vsmask.f32 (!%p186_p3), 7440 }
   0x9   : > { %2302 = vmatprep.subr.msk.bf16.mxu1 (!%p186_p3), %vm410_vm0, %v259_v4  ;;  %2307 = vmatprep.subr.msk.bf16.mxu0 (!%p186_p3), %vm410_vm0, %v2022_v5  ;;  %v2473_v17 = vsel (!%p186_p3), %vm410_vm0, %v259_v4, 0  ;;  %v2486_v31 = vld [vmem:[%s2946_s1 + $0x18] sm:$0xf] (!%p186_p3)  ;;  %vm2490_vm4 = vmor (!%p186_p3), %vm268_vm1, %vm269_vm2  ;;  %v2502_v42 = vsel (!%p186_p3), %vm410_vm0, %v2022_v5, 0  ;;  %vm603_vm5 = vcmask (!%p186_p3), 1042432   ;;  %vm604_vm6 = vcmask (!%p186_p3), 1046532  }
   0xa   : > { %v2509_v47 = vsel (!%p186_p3), %vm410_vm0, %v2486_v31, 0  ;;  %vm2601_vm7 = vmor (!%p186_p3), %vm603_vm5, %vm604_vm6  ;;  %s1926_s20 = sshll.u32 (!%p186_p3), %s2363_s15, 3 }
   0xb   : > { %p230_p5 = scmp.lt.s32.totalorder (!%p186_p3), %s1926_s20, 15 }
   0xe   : > { %s2437_s23 = scalar_select %p222_p4, %s2363_s15, 1 }
   0xf   : > { %s2959_s20 = smov (!%p230_p5, %s1926_s20), 15 }
  0x10   : > { %s2311_s28 = smul.u32 80, %s2437_s23  ;;  %s1927_s21 = sshll.u32 %s2959_s20, 3 }
  0x11   : > { %s2919_s25 = scalar_lea.vmem %s2947_s2, %s1927_s21  ;;  %s1928_s15 = sshll.u32 %s2437_s23, 3 }
  0x12   : > { %s2451_s5 = scalar_lea.vmem %s2945_s0, %s2311_s28  ;;  %s239_s28 = scalar_lea.vmem %s2948_s3, %s1928_s15 }
  0x13   : > { %v2454_v6 = vld [vmem:[%s2451_s5] sm:$0xf]  ;;  %v2457_v7 = vld [vmem:[%s2451_s5 + $0x8] sm:$0xf]  ;;  %v2460_v8 = vld [vmem:[%s2451_s5 + $0x4] sm:$0x1] }
  0x14   : > { %v2463_v9 = vld [vmem:[%s2451_s5 + $0xc] sm:$0x1]  ;;  %v272_v10 = vshrl.u32 %v2454_v6, 16  ;;  %v275_v11 = vshll.u32 %v2454_v6, 16  ;;  %v281_v12 = vshll.u32 %v2460_v8, 16  ;;  %v286_v13 = vshrl.u32 %v2457_v7, 16 }
  0x15   : > { %v289_v14 = vshll.u32 %v2457_v7, 16  ;;  %v295_v15 = vshll.u32 %v2463_v9, 16  ;;  %v1981_v16 = vld [vmem:[%s2451_s5 + $0x8] sm:$0xf]  ;;  %v2476_v22 = vld [vmem:[%s2451_s5 + $0xc] sm:$0x1] }
  0x16   : > { %v274_v18 = vrot.slane %v272_v10, 4  ;;  %v277_v19 = vrot.slane %v275_v11, 5  ;;  %v283_v20 = vrot.slane %v281_v12, 5  ;;  %v288_v21 = vrot.slane %v286_v13, 4  ;;  %v1983_v25 = vld [vmem:[%s2451_s5 + $0x10] sm:$0xf] }
  0x17   : > { %v291_v23 = vrot.slane %v289_v14, 5  ;;  %v297_v24 = vrot.slane %v295_v15, 5  ;;  %v2480_v26 = vld [vmem:[%s2451_s5 + $0x14] sm:$0x1]  ;;  %v876_v28 = vshrl.u32 %v1981_v16, 16  ;;  %v879_v29 = vshll.u32 %v1981_v16, 16 }
  0x18   : > { %v278_v27 = vor.u32 %v277_v19, %v274_v18  ;;  %v885_v30 = vshll.u32 %v2476_v22, 16  ;;  %v890_v34 = vshrl.u32 %v1983_v25, 16  ;;  %v893_v35 = vshll.u32 %v1983_v25, 16  ;;  %v2496_v37 = vld [vmem:[%s2451_s5 + $0x10] sm:$0xf] }
  0x19   : > { %v292_v33 = vor.u32 %v291_v23, %v288_v21  ;;  %v899_v36 = vshll.u32 %v2480_v26, 16  ;;  %v878_v39 = vrot.slane %v876_v28, 4  ;;  %v881_v40 = vrot.slane %v879_v29, 5  ;;  %v2499_v41 = vld [vmem:[%s2451_s5 + $0x18] sm:$0xf] }
  0x1a   : > { %v279_v38 = vrot.slane %v278_v27, 4  ;;  %v892_v44 = vrot.slane %v890_v34, 4  ;;  %v895_v45 = vrot.slane %v893_v35, 5  ;;  %v2505_v46 = vld [vmem:[%s2451_s5 + $0x14] sm:$0x1]  ;;  %v887_v50 = vrot.slane %v885_v30, 5 }
  0x1b   : > { %v293_v43 = vrot.slane %v292_v33, 4  ;;  %v882_v49 = vor.u32 %v881_v40, %v878_v39  ;;  %v901_v51 = vrot.slane %v899_v36, 5  ;;  %v2516_v54 = vld [vmem:[%s2451_s5 + $0x1c] sm:$0x1]  ;;  %v300_v55 = vshrl.u32 %v2496_v37, 16 }
  0x1c   : > { %v284_v48 = vsel %vm2490_vm4, %v279_v38, %v283_v20  ;;  %v896_v53 = vor.u32 %v895_v45, %v892_v44  ;;  %v303_v56 = vshll.u32 %v2496_v37, 16  ;;  %v309_v59 = vshll.u32 %v2505_v46, 16  ;;  %v1985_v2 = vld [vmem:[%s2451_s5 + $0x18] sm:$0xf]  ;;  %v2530_v12 = vld [vmem:[%s2451_s5 + $0x1c] sm:$0x1] }
  0x1d   : > { %v298_v52 = vsel %vm2490_vm4, %v293_v43, %v297_v24  ;;  %v883_v58 = vrot.slane %v882_v49, 4  ;;  %v314_v60 = vshrl.u32 %v2499_v41, 16  ;;  %v302_v62 = vrot.slane %v300_v55, 4  ;;  %v1987_v18 = vld [vmem:[%s2451_s5 + $0x20] sm:$0xf] }
  0x1e   : > { %v1931_v57 = vcombine.low %v284_v48, %v298_v52  ;;  %v897_v61 = vrot.slane %v896_v53, 4  ;;  %v305_v63 = vrot.slane %v303_v56, 5  ;;  %v317_v0 = vshll.u32 %v2499_v41, 16  ;;  %v2536_v19 = vld [vmem:[%s2451_s5 + $0x24] sm:$0x1] }
  0x1f   : > { %v888_v4 = vsel %vm2490_vm4, %v883_v58, %v887_v50  ;;  %v1115_v5 = vrot.slane %v2476_v22, 5  ;;  %v316_v10 = vrot.slane %v314_v60, 4  ;;  %v323_v11 = vshll.u32 %v2516_v54, 16  ;;  %v2543_v36 = vld [vmem:[%s2451_s5 + $0x20] sm:$0xf] }
  0x20   : > { %2147 = vmatprep.mubr.msk.bf16.mxu1 %vm397_vm3, %v1931_v57  ;;  %v902_v13 = vsel %vm2490_vm4, %v897_v61, %v901_v51  ;;  %v306_v14 = vor.u32 %v305_v63, %v302_v62  ;;  %v311_v15 = vrot.slane %v309_v59, 5  ;;  %v319_v16 = vrot.slane %v317_v0, 5  ;;  %v2548_v44 = vld [vmem:[%s2451_s5 + $0x24] sm:$0x1]  ;;  %v2552_v51 = vld [vmem:[%s2451_s5 + $0x28] sm:$0xf] }
  0x21   : > { %v1998_v20 = vcombine.low %v888_v4, %v902_v13  ;;  %v1119_v21 = vrot.slane %v2480_v26, 5  ;;  %v325_v23 = vrot.slane %v323_v11, 5  ;;  %v904_v24 = vshrl.u32 %v1985_v2, 16  ;;  %v2558_v56 = vld [vmem:[%s2451_s5 + $0x2c] sm:$0x1] }
  0x22   : > { %v307_v25 = vrot.slane %v306_v14, 4  ;;  %v320_v27 = vor.u32 %v319_v16, %v316_v10  ;;  %v907_v28 = vshll.u32 %v1985_v2, 16  ;;  %v913_v29 = vshll.u32 %v2530_v12, 16  ;;  %v2564_v62 = vld [vmem:[%s2451_s5 + $0x30] sm:$0xf] }
  0x23   : > { %2187 = vmatprep.mubr.msk.bf16.mxu0 %vm397_vm3, %v1998_v20  ;;  %v906_v30 = vrot.slane %v904_v24, 4  ;;  %v918_v33 = vshrl.u32 %v1987_v18, 16  ;;  %v921_v34 = vshll.u32 %v1987_v18, 16  ;;  %v927_v35 = vshll.u32 %v2536_v19, 16  ;;  %v2569_v63 = vld [vmem:[%s2946_s1 + $0x8] sm:$0xf] }
  0x24   : > { %v312_v38 = vsel %vm2490_vm4, %v307_v25, %v311_v15  ;;  %v321_v39 = vrot.slane %v320_v27, 4  ;;  %v909_v40 = vrot.slane %v907_v28, 5  ;;  %v915_v43 = vrot.slane %v913_v29, 5  ;;  %v2574_v11 = vld [vmem:[%s2451_s5 + $0x38] sm:$0xf] }
  0x25   : > { %v920_v45 = vrot.slane %v918_v33, 4  ;;  %v923_v48 = vrot.slane %v921_v34, 5  ;;  %v929_v49 = vrot.slane %v927_v35, 5  ;;  %v1123_v50 = vrot.slane %v2530_v12, 5  ;;  %v2579_v18 = vld [vmem:[%s2451_s5 + $0x34] sm:$0x1] }
  0x26   : > { %v326_v52 = vsel %vm2490_vm4, %v321_v39, %v325_v23  ;;  %v910_v53 = vor.u32 %v909_v40, %v906_v30  ;;  %v1127_v55 = vrot.slane %v2536_v19, 5  ;;  %v328_v57 = vshrl.u32 %v2543_v36, 16  ;;  %v2585_v25 = vld [vmem:[%s2451_s5 + $0x3c] sm:$0x1]  ;;  %v2006_v34 = vld [vmem:[%s2451_s5 + $0x8] sm:$0xe] }
  0x27   : > { %v1932_v58 = vcombine.low %v312_v38, %v326_v52  ;;  %v924_v59 = vor.u32 %v923_v48, %v920_v45  ;;  %v331_v60 = vshll.u32 %v2543_v36, 16  ;;  %v337_v61 = vshll.u32 %v2548_v44, 16  ;;  %v2654_v19 = vld [vmem:[%s2451_s5 + $0x44] sm:$0x1] }
  0x28   : > { %v911_v0 = vrot.slane %v910_v53, 4  ;;  %v330_v2 = vrot.slane %v328_v57, 4  ;;  %v342_v4 = vshrl.u32 %v2552_v51, 16  ;;  %v345_v10 = vshll.u32 %v2552_v51, 16  ;;  %v2009_v57 = vld [vmem:[%s2451_s5 + $0x20] sm:$0xe] }
  0x29   : > { %2148 = vmatmul.mubr.msk.bf16.vlgmr.msra.gmra.mrb[0].mxu1 %vm397_vm3, %v1932_v58  ;;  %v925_v13 = vrot.slane %v924_v59, 4  ;;  %v333_v14 = vrot.slane %v331_v60, 5  ;;  %v339_v15 = vrot.slane %v337_v61, 5  ;;  %v351_v16 = vshll.u32 %v2558_v56, 16 }
  0x2a   : > { %2156 = vmatpush3.bf16.msra.mxu1 %v2473_v17  ;;  %v916_v20 = vsel %vm2490_vm4, %v911_v0, %v915_v43  ;;  %v344_v23 = vrot.slane %v342_v4, 4  ;;  %v347_v24 = vrot.slane %v345_v10, 5  ;;  %v356_v27 = vshrl.u32 %v2564_v62, 16  ;;  %v2007_v17 = vld [vmem:[%s2451_s5 + $0x10] sm:$0xe] }
  0x2b   : > { %v930_v28 = vsel %vm2490_vm4, %v925_v13, %v929_v49  ;;  %v334_v29 = vor.u32 %v333_v14, %v330_v2  ;;  %v353_v30 = vrot.slane %v351_v16, 5  ;;  %v359_v33 = vshll.u32 %v2564_v62, 16  ;;  %2303 = vmatprep.subr.msk.bf16.mxu1 %vm410_vm0, %v2569_v63  ;;  %v2008_v43 = vld [vmem:[%s2451_s5 + $0x18] sm:$0xe]  ;;  %v2010_v0 = vld [vmem:[%s2451_s5 + $0x28] sm:$0xe] }
  0x2c   : > { %v1999_v35 = vcombine.low %v916_v20, %v930_v28  ;;  %v348_v38 = vor.u32 %v347_v24, %v344_v23  ;;  %v358_v39 = vrot.slane %v356_v27, 4  ;;  %v365_v40 = vshll.u32 %v2579_v18, 16 }
  0x2d   : > { %v335_v45 = vrot.slane %v334_v29, 4  ;;  %v361_v48 = vrot.slane %v359_v33, 5  ;;  %v370_v49 = vshrl.u32 %v2574_v11, 16  ;;  %v373_v52 = vshll.u32 %v2574_v11, 16  ;;  %v2624_v29 = vld [vmem:[%s2451_s5 + $0x34] sm:$0x1] }
  0x2e   : > { %2188 = vmatmul.mubr.msk.bf16.vlgmr.msra.gmra.mrb[0].mxu0 %vm397_vm3, %v1999_v35  ;;  %v349_v58 = vrot.slane %v348_v38, 4  ;;  %v367_v59 = vrot.slane %v365_v40, 5  ;;  %v379_v60 = vshll.u32 %v2585_v25, 16  ;;  %v2014_v61 = vrot.slane %v2006_v34, 9  ;;  %v2012_v38 = vld [vmem:[%s2451_s5 + $0x38] sm:$0xe] }
  0x2f   : > { %2196 = vmatpush3.bf16.msra.mxu0 %v2502_v42  ;;  %v340_v2 = vsel %vm2490_vm4, %v335_v45, %v339_v15  ;;  %v362_v4 = vor.u32 %v361_v48, %v358_v39  ;;  %v372_v10 = vrot.slane %v370_v49, 4  ;;  %v375_v13 = vrot.slane %v373_v52, 5  ;;  %v2621_v42 = vld [vmem:[%s2451_s5 + $0x2c] sm:$0x1]  ;;  %v2013_v45 = vld [vmem:[%s2451_s5 + $0x40] sm:$0xe] }
  0x30   : > { %v354_v14 = vsel %vm2490_vm4, %v349_v58, %v353_v30  ;;  %v381_v16 = vrot.slane %v379_v60, 5  ;;  %v1116_v20 = vsel %vm2601_vm7, %v2014_v61, %v1115_v5  ;;  %v2015_v23 = vrot.slane %v2007_v17, 9  ;;  %2308 = vmatprep.subr.msk.bf16.mxu0 %vm410_vm0, %v2486_v31  ;;  %v2011_v30 = vld [vmem:[%s2451_s5 + $0x30] sm:$0xe]  ;;  %v2632_v31 = vld [vmem:[%s2451_s5 + $0x3c] sm:$0x1] }
  0x31   : > { %v1933_v15 = vcombine.low %v340_v2, %v354_v14  ;;  %v363_v24 = vrot.slane %v362_v4, 4  ;;  %v376_v27 = vor.u32 %v375_v13, %v372_v10  ;;  %v2016_v28 = vrot.slane %v2008_v43, 9  ;;  %v2663_v48 = vld [vmem:[%s2946_s1 + $0xc] sm:$0xf]  ;;  %v580_v58 = vld [vmem:[%s2451_s5 + $0x8] sm:$0xe] }
  0x32   : > { %v1120_v22 = vsel %vm2601_vm7, %v2015_v23, %v1119_v21  ;;  %v2017_v5 = vrot.slane %v2009_v57, 9  ;;  %v2018_v33 = vrot.slane %v2010_v0, 9  ;;  %v1131_v39 = vrot.slane %v2621_v42, 5  ;;  %v582_v4 = vld [vmem:[%s2451_s5 + $0x18] sm:$0xe] }
  0x33   : > { %2151 = vmatprep.mubr.msk.bf16.mxu1 %vm397_vm3, %v1933_v15  ;;  %v368_v34 = vsel %vm2490_vm4, %v363_v24, %v367_v59  ;;  %v377_v17 = vrot.slane %v376_v27, 4  ;;  %v2023_v35 = vcombine.low %v1116_v20, %v1120_v22  ;;  %v1124_v26 = vsel %vm2601_vm7, %v2016_v28, %v1123_v50  ;;  %v581_v59 = vld [vmem:[%s2451_s5 + $0x10] sm:$0xe]  ;;  %v583_v20 = vld [vmem:[%s2451_s5 + $0x20] sm:$0xe] }
  0x34   : > { %v1128_v21 = vsel %vm2601_vm7, %v2017_v5, %v1127_v55  ;;  %v2019_v40 = vrot.slane %v2011_v30, 9  ;;  %v1135_v43 = vrot.slane %v2624_v29, 5  ;;  %v1939_v50 = vcombine.low %v2454_v6, %v2457_v7  ;;  %v2064_v55 = vld [vmem:[%s2946_s1 + $0x1c] sm:$0xf]  ;;  %v579_v7 = vld [vmem:[%s2451_s5] sm:$0xe] }
  0x35   : > { %v382_v12 = vsel %vm2490_vm4, %v377_v17, %v381_v16  ;;  %2197 = vmatprep.mubr.msk.bf16.mxu0 %vm397_vm3, %v2023_v35  ;;  %v2024_v52 = vcombine.low %v1124_v26, %v1128_v21  ;;  %v1132_v57 = vsel %vm2601_vm7, %v2018_v33, %v1131_v39  ;;  %v608_v60 = vrot.slane %v2460_v8, 5  ;;  %v2048_v5 = vld [vmem:[%s2451_s5 + $0x10] sm:$0xf]  ;;  %v584_v17 = vld [vmem:[%s2451_s5 + $0x28] sm:$0xe] }
  0x36   : > { %v1934_v49 = vcombine.low %v368_v34, %v382_v12  ;;  %v1136_v6 = vsel %vm2601_vm7, %v2019_v40, %v1135_v43  ;;  %v2020_v0 = vrot.slane %v2012_v38, 9  ;;  %v1139_v2 = vrot.slane %v2632_v31, 5  ;;  %v585_v35 = vld [vmem:[%s2451_s5 + $0x30] sm:$0xe]  ;;  %v2050_v26 = vld [vmem:[%s2451_s5 + $0x18] sm:$0xf] }
  0x37   : > { %v2025_v61 = vcombine.low %v1132_v57, %v1136_v6  ;;  %v612_v10 = vrot.slane %v2463_v9, 5  ;;  %v616_v13 = vrot.slane %v2505_v46, 5  ;;  %v2021_v14 = vrot.slane %v2013_v45, 9  ;;  %v2341_v38 = vld [vmem:[%s2451_s5 + $0x10] ss:$8 sps:$4 sm:$0xff]  }
  0x38   : > { %2152 = vmatmul.mubr.msk.bf16.gmra.mrb[4].mxu1 %vm397_vm3, %v1934_v49  ;;  %v1143_v16 = vrot.slane %v2654_v19, 5  ;;  %v620_v23 = vrot.slane %v2516_v54, 5  ;;  %v1947_v8 = vrot.slane %v579_v7, 9  ;;  %v1948_v15 = vrot.slane %v580_v58, 9  ;;  %v2726_v21 = vld [vmem:[%s2451_s5 + $0x38] sm:$0xe] }
  0x39   : > { %2157 = vmatprep.mubr.msk.bf16.mxu1 %vm397_vm3, %v1939_v50  ;;  %v1949_v24 = vrot.slane %v581_v59, 9  ;;  %v665_v9 = vsel %vm410_vm0, %v2569_v63, 0  ;;  %v2686_v46 = vsel %vm410_vm0, %v2064_v55, 0  ;;  %v1950_v27 = vrot.slane %v582_v4, 9  ;;  %v2729_v39 = vld [vmem:[%s2451_s5 + $0x14] sm:$0x1] }
  0x3a   : > { %2198 = vmatmul.mubr.msk.bf16.vlgmr.msra.gmra.mrb[0].mxu0 %vm397_vm3, %v2024_v52  ;;  %v2690_v54 = vsel %vm410_vm0, %v2663_v48, 0  ;;  %v1140_v28 = vsel %vm2601_vm7, %v2020_v0, %v1139_v2  ;;  %v1144_v63 = vsel %vm2601_vm7, %v2021_v14, %v1143_v16  ;;  %v1951_v30 = vrot.slane %v583_v20, 9  ;;  %v2054_v52 = vld [vmem:[%s2451_s5 + $0x28] sm:$0xf]  ;;  %v2748_v59 = vld [vmem:[%s2451_s5 + $0x1c] sm:$0x1] }
  0x3b   : > { %2206 = vmatpush3.bf16.msra.mxu0 %v2509_v47  ;;  %2201 = vmatprep.mubr.msk.bf16.mxu0 %vm397_vm3, %v2025_v61  ;;  %v624_v22 = vrot.slane %v2548_v44, 5  ;;  %v1940_v33 = vcombine.low %v2496_v37, %v2499_v41  ;;  %v2705_v47 = vsel %vm2601_vm7, %v1947_v8, %v608_v60  ;;  %v2709_v34 = vsel %vm2601_vm7, %v1948_v15, %v612_v10  ;;  %v2756_v2 = vld [vmem:[%s2451_s5 + $0x24] sm:$0x1]  ;;  %v2056_v20 = vld [vmem:[%s2451_s5 + $0x30] sm:$0xf] }
  0x3c   : > { %2309 = vmatprep.subr.msk.bf16.mxu0 %vm410_vm0, %v2064_v55  ;;  %v1941_v44 = vcombine.low %v2543_v36, %v2552_v51  ;;  %v2719_v37 = vsel %vm2601_vm7, %v1949_v24, %v616_v13  ;;  %v2723_v41 = vsel %vm2601_vm7, %v1950_v27, %v620_v23  ;;  %v2026_v40 = vcombine.low %v1140_v28, %v1144_v63  ;;  %v2052_v36 = vld [vmem:[%s2451_s5 + $0x20] sm:$0xf]  ;;  %v2767_v15 = vld [vmem:[%s2451_s5 + $0x2c] sm:$0x1]  ;;  %v2343_v27 = vld [vmem:[%s2451_s5 + $0x30] ss:$8 sps:$4 sm:$0xff]  }
  0x3d   : > { %v1942_v43 = vcombine.low %v2564_v62, %v2574_v11  ;;  %v1383_v12 = vshrl.u32 %v2048_v5, 16  ;;  %v1386_v50 = vshll.u32 %v2048_v5, 16  ;;  %v1956_v51 = vcombine.low %v2705_v47, %v2709_v34  ;;  %v2342_v23 = vld [vmem:[%s2451_s5 + $0x20] ss:$8 sps:$4 sm:$0xff]   ;;  %v2058_v5 = vld [vmem:[%s2451_s5 + $0x38] sm:$0xf] }
  0x3e   : > { %v2738_v45 = vsel %vm2601_vm7, %v1951_v30, %v624_v22  ;;  %v1952_v55 = vrot.slane %v584_v17, 9  ;;  %v1397_v49 = vshrl.u32 %v2050_v26, 16  ;;  %v1957_v62 = vcombine.low %v2719_v37, %v2723_v41  ;;  %v2778_v17 = vld [vmem:[%s2451_s5 + $0x34] sm:$0x1] }
  0x3f   : > { %v628_v11 = vrot.slane %v2558_v56, 5  ;;  %v1385_v57 = vrot.slane %v1383_v12, 4  ;;  %v1388_v6 = vrot.slane %v1386_v50, 5  ;;  %v1953_v7 = vrot.slane %v585_v35, 9  ;;  %v2060_v12 = vld [vmem:[%s2451_s5 + $0x40] sm:$0xf] }
  0x40   : > { %2158 = vmatmul.mubr.msk.bf16.vlgmr.msra.gmra.mrb[0].mxu1 %vm397_vm3, %v1940_v33  ;;  %v632_v58 = vrot.slane %v2579_v18, 5  ;;  %v1399_v60 = vrot.slane %v1397_v49, 4  ;;  %v1400_v61 = vshll.u32 %v2050_v26, 16  ;;  %v1954_v56 = vrot.slane %v2726_v21, 9  ;;  %v2788_v21 = vld [vmem:[%s2451_s5 + $0x3c] sm:$0x1] }
  0x41   : > { %2166 = vmatpush3.bf16.msra.mxu1 %v665_v9  ;;  %2161 = vmatprep.mubr.msk.bf16.mxu1 %vm397_vm3, %v1941_v44  ;;  %v1392_v0 = vshll.u32 %v2729_v39, 16  ;;  %v1411_v18 = vshrl.u32 %v2052_v36, 16  ;;  %v1414_v4 = vshll.u32 %v2052_v36, 16  ;;  %v1389_v10 = vor.u32 %v1388_v6, %v1385_v57  ;;  %v2062_v6 = vld [vmem:[%s2451_s5 + $0x48] sm:$0xf] }
  0x42   : > { %2202 = vmatmul.mubr.msk.bf16.gmra.mrb[4].mxu0 %vm397_vm3, %v2026_v40  ;;  %2304 = vmatprep.subr.msk.bf16.mxu1 %vm410_vm0, %v2663_v48  ;;  %v1402_v13 = vrot.slane %v1400_v61, 5  ;;  %v1425_v14 = vshrl.u32 %v2054_v52, 16  ;;  %v1428_v16 = vshll.u32 %v2054_v52, 16  ;;  %v2763_v48 = vsel %vm2601_vm7, %v1952_v55, %v628_v11 }
  0x43   : > { %2207 = vmatprep.mubr.msk.bf16.mxu0 %vm397_vm3, %v2341_v38  ;;  %v1406_v8 = vshll.u32 %v2748_v59, 16  ;;  %v1413_v24 = vrot.slane %v1411_v18, 4  ;;  %v1416_v9 = vrot.slane %v1414_v4, 5  ;;  %v636_v28 = vrot.slane %v2585_v25, 5  ;;  %v2785_v25 = vld [vmem:[%s2946_s1 + $0x20] sm:$0xf] }
  0x44   : > { %v1403_v63 = vor.u32 %v1402_v13, %v1399_v60  ;;  %v1427_v30 = vrot.slane %v1425_v14, 4  ;;  %v1430_v22 = vrot.slane %v1428_v16, 5  ;;  %v2774_v33 = vsel %vm2601_vm7, %v1953_v7, %v632_v58  ;;  %v2813_v13 = vld [vmem:[%s2451_s5 + $0x44] sm:$0x1] }
  0x45   : > { %v1394_v47 = vrot.slane %v1392_v0, 5  ;;  %v1420_v34 = vshll.u32 %v2756_v2, 16  ;;  %v1439_v35 = vshrl.u32 %v2056_v20, 16  ;;  %v1958_v26 = vcombine.low %v2738_v45, %v2763_v48 }
  0x46   : > { %v1390_v44 = vrot.slane %v1389_v10, 4  ;;  %v1417_v38 = vor.u32 %v1416_v9, %v1413_v24  ;;  %v1442_v40 = vshll.u32 %v2056_v20, 16  ;;  %v1404_v50 = vrot.slane %v1403_v63, 4  ;;  %v2816_v20 = vld [vmem:[%s2451_s5 + $0x4c] sm:$0x1] }
  0x47   : > { %v1408_v36 = vrot.slane %v1406_v8, 5  ;;  %v1441_v55 = vrot.slane %v1439_v35, 4  ;;  %v1453_v49 = vshrl.u32 %v2058_v5, 16  ;;  %v2795_v45 = vsel %vm2601_vm7, %v1954_v56, %v636_v28  ;;  %v2344_v8 = vld [vmem:[%s2451_s5 + $0x40] ss:$8 sps:$4 sm:$0xff]  }
  0x48   : > { %2162 = vmatmul.mubr.msk.bf16.gmra.mrb[4].mxu1 %vm397_vm3, %v1942_v43  ;;  %v1431_v52 = vor.u32 %v1430_v22, %v1427_v30  ;;  %v1434_v11 = vshll.u32 %v2767_v15, 16  ;;  %v1444_v57 = vrot.slane %v1442_v40, 5  ;;  %v2800_v7 = vrot.slane %v1420_v34, 5 }
  0x49   : > { %2167 = vmatprep.mubr.msk.bf16.mxu1 %vm397_vm3, %v1956_v51  ;;  %v1448_v43 = vshll.u32 %v2778_v17, 16  ;;  %v1455_v58 = vrot.slane %v1453_v49, 4  ;;  %v1456_v60 = vshll.u32 %v2058_v5, 16  ;;  %v1395_v51 = vsel %vm2490_vm4, %v1390_v44, %v1394_v47  ;;  %v1991_v49 = vld [vmem:[%s2451_s5 + $0x30] sm:$0xf] }
  0x4a   : > { %2208 = vmatmul.mubr.msk.bf16.vlgmr.msra.gmra.mrb[0].mxu0 %vm397_vm3, %v2342_v23  ;;  %v1418_v61 = vrot.slane %v1417_v38, 4  ;;  %v1445_v56 = vor.u32 %v1444_v57, %v1441_v55  ;;  %v1467_v0 = vshrl.u32 %v2060_v12, 16  ;;  %v1409_v18 = vsel %vm2490_vm4, %v1404_v50, %v1408_v36  ;;  %v2073_v38 = vld [vmem:[%s2451_s5 + $0x10] sm:$0xe]  ;;  %v2074_v50 = vld [vmem:[%s2451_s5 + $0x18] sm:$0xe] }
  0x4b   : > { %2216 = vmatpush3.bf16.msra.mxu0 %v2686_v46  ;;  %2211 = vmatprep.mubr.msk.bf16.mxu0 %vm397_vm3, %v2343_v27  ;;  %v1458_v4 = vrot.slane %v1456_v60, 5  ;;  %v1462_v10 = vshll.u32 %v2788_v21, 16  ;;  %v1470_v46 = vshll.u32 %v2060_v12, 16  ;;  %v1432_v14 = vrot.slane %v1431_v52, 4  ;;  %v2345_v57 = vld [vmem:[%s2451_s5 + $0x8] ss:$8 sps:$4 sm:$0xff]  }
  0x4c   : > { %2310 = vmatprep.subr.msk.bf16.mxu0 %vm410_vm0, %v2785_v25  ;;  %v1436_v16 = vrot.slane %v1434_v11, 5  ;;  %v1469_v23 = vrot.slane %v1467_v0, 4  ;;  %v1481_v48 = vshrl.u32 %v2062_v6, 16  ;;  %v1450_v24 = vrot.slane %v1448_v43, 5 }
  0x4d   : > { %v1459_v9 = vor.u32 %v1458_v4, %v1455_v58  ;;  %v1472_v27 = vrot.slane %v1470_v46, 5  ;;  %v1484_v28 = vshll.u32 %v2062_v6, 16  ;;  %v2065_v63 = vcombine.low %v1395_v51, %v1409_v18 }
  0x4e   : > { %v1446_v30 = vrot.slane %v1445_v56, 4  ;;  %v1476_v22 = vshll.u32 %v2813_v13, 16  ;;  %v1483_v5 = vrot.slane %v1481_v48, 4  ;;  %v1464_v34 = vrot.slane %v1462_v10, 5 }
  0x4f   : > { %v1460_v47 = vrot.slane %v1459_v9, 4  ;;  %v1486_v35 = vrot.slane %v1484_v28, 5  ;;  %v1490_v44 = vshll.u32 %v2816_v20, 16  ;;  %v1959_v40 = vcombine.low %v2774_v33, %v2795_v45  ;;  %v1995_v28 = vld [vmem:[%s2451_s5 + $0x40] sm:$0xf] }
  0x50   : > { %2168 = vmatmul.mubr.msk.bf16.vlgmr.msra.gmra.mrb[0].mxu1 %vm397_vm3, %v1957_v62  ;;  %v1473_v12 = vor.u32 %v1472_v27, %v1469_v23  ;;  %v1423_v37 = vsel %vm2490_vm4, %v1418_v61, %v2800_v7  ;;  %v1437_v41 = vsel %vm2490_vm4, %v1432_v14, %v1436_v16  ;;  %v1989_v62 = vld [vmem:[%s2451_s5 + $0x28] sm:$0xf]  ;;  %v1451_v33 = vsel %vm2490_vm4, %v1446_v30, %v1450_v24  ;;  %v1993_v27 = vld [vmem:[%s2451_s5 + $0x38] sm:$0xf] }
  0x51   : > { %2176 = vmatpush3.bf16.msra.mxu1 %v2690_v54  ;;  %2171 = vmatprep.mubr.msk.bf16.mxu1 %vm397_vm3, %v1958_v26  ;;  %v1487_v54 = vor.u32 %v1486_v35, %v1483_v5  ;;  %v1478_v26 = vrot.slane %v1476_v22, 5  ;;  %v2081_v36 = vrot.slane %v2073_v38, 9  ;;  %v1622_v55 = vrot.slane %v2729_v39, 5  ;;  %v2347_v38 = vld [vmem:[%s2451_s5 + $0x28] ss:$8 sps:$4 sm:$0xff]  }
  0x52   : > { %2212 = vmatmul.mubr.msk.bf16.gmra.mrb[4].mxu0 %vm397_vm3, %v2344_v8  ;;  %2306 = vmatprep.subr.msk.bf16.mxu1 %vm410_vm0, %v2424_v1  ;;  %v1465_v45 = vsel %vm2490_vm4, %v1460_v47, %v1464_v34  ;;  %v1492_v52 = vrot.slane %v1490_v44, 5  ;;  %v2082_v11 = vrot.slane %v2074_v50, 9  ;;  %v1626_v1 = vrot.slane %v2748_v59, 5  ;;  %v2075_v59 = vld [vmem:[%s2451_s5 + $0x20] sm:$0xe] }
  0x53   : > { %2217 = vmatprep.mubr.msk.bf16.mxu0 %vm397_vm3, %v2065_v63  ;;  %v1474_v6 = vrot.slane %v1473_v12, 4  ;;  %v1488_v7 = vrot.slane %v1487_v54, 4  ;;  %v932_v43 = vshrl.u32 %v1989_v62, 16  ;;  %v935_v58 = vshll.u32 %v1989_v62, 16  ;;  %v2346_v63 = vld [vmem:[%s2451_s5 + $0x18] ss:$8 sps:$4 sm:$0xff]  }
  0x54   : > { %v2066_v60 = vcombine.low %v1423_v37, %v1437_v41  ;;  %v946_v51 = vshrl.u32 %v1991_v49, 16  ;;  %v949_v61 = vshll.u32 %v1991_v49, 16  ;;  %v2067_v56 = vcombine.low %v1451_v33, %v1465_v45  ;;  %v2077_v44 = vld [vmem:[%s2451_s5 + $0x30] sm:$0xe] }
  0x55   : > { %v934_v39 = vrot.slane %v932_v43, 4  ;;  %v937_v0 = vrot.slane %v935_v58, 5  ;;  %v1679_v18 = vsel %vm410_vm0, %v2785_v25, 0  ;;  %v1479_v46 = vsel %vm2490_vm4, %v1474_v6, %v1478_v26  ;;  %v2076_v25 = vld [vmem:[%s2451_s5 + $0x28] sm:$0xe] }
  0x56   : > { %v948_v4 = vrot.slane %v946_v51, 4  ;;  %v951_v10 = vrot.slane %v949_v61, 5  ;;  %v1493_v14 = vsel %vm2490_vm4, %v1488_v7, %v1492_v52  ;;  %v1623_v16 = vsel %vm2601_vm7, %v2081_v36, %v1622_v55  ;;  %v2079_v6 = vld [vmem:[%s2451_s5 + $0x40] sm:$0xe]  ;;  %v2080_v7 = vld [vmem:[%s2451_s5 + $0x48] sm:$0xe] }
  0x57   : > { %v1627_v23 = vsel %vm2601_vm7, %v2082_v11, %v1626_v1  ;;  %v938_v48 = vor.u32 %v937_v0, %v934_v39  ;;  %v941_v8 = vshll.u32 %v2621_v42, 16  ;;  %v955_v9 = vshll.u32 %v2624_v29, 16  ;;  %v2078_v42 = vld [vmem:[%s2451_s5 + $0x38] sm:$0xe] }
  0x58   : > { %2172 = vmatmul.mubr.msk.bf16.gmra.mrb[4].mxu1 %vm397_vm3, %v1959_v40  ;;  %v952_v24 = vor.u32 %v951_v10, %v948_v4  ;;  %v2083_v30 = vrot.slane %v2075_v59, 9  ;;  %v1630_v22 = vrot.slane %v2756_v2, 5  ;;  %v2068_v5 = vcombine.low %v1479_v46, %v1493_v14 }
  0x59   : > { %2177 = vmatprep.mubr.msk.bf16.mxu1 %vm397_vm3, %v2345_v57  ;;  %v2090_v47 = vcombine.low %v1623_v16, %v1627_v23  ;;  %v2084_v34 = vrot.slane %v2076_v25, 9  ;;  %v1634_v35 = vrot.slane %v2767_v15, 5  ;;  %v960_v40 = vshrl.u32 %v1993_v27, 16  ;;  %v2348_v57 = vld [vmem:[%s2451_s5 + $0x38] ss:$8 sps:$4 sm:$0xff]   ;;  %s243_s5 = scalar_lea.vmem %s2949_s4, %s1928_s15 }
  0x5a   : > { %2218 = vmatmul.mubr.msk.bf16.vlgmr.msra.gmra.mrb[0].mxu0 %vm397_vm3, %v2066_v60  ;;  %v963_v12 = vshll.u32 %v1993_v27, 16  ;;  %v974_v29 = vshrl.u32 %v1995_v28, 16  ;;  %v977_v50 = vshll.u32 %v1995_v28, 16  ;;  %v939_v37 = vrot.slane %v938_v48, 4 }
  0x5b   : > { %2226 = vmatpush3.bf16.msra.mxu0 %v1679_v18  ;;  %2221 = vmatprep.mubr.msk.bf16.mxu0 %vm397_vm3, %v2067_v56  ;;  %v943_v41 = vrot.slane %v941_v8, 5  ;;  %v953_v54 = vrot.slane %v952_v24, 4  ;;  %v957_v62 = vrot.slane %v955_v9, 5  ;;  %v2085_v33 = vrot.slane %v2077_v44, 9 }
  0x5c   : > { %v1638_v26 = vrot.slane %v2778_v17, 5  ;;  %v2086_v2 = vrot.slane %v2078_v42, 9  ;;  %v1642_v36 = vrot.slane %v2788_v21, 5  ;;  %v962_v15 = vrot.slane %v960_v40, 4 }
  0x5d   : > { %v965_v55 = vrot.slane %v963_v12, 5  ;;  %v976_v49 = vrot.slane %v974_v29, 4  ;;  %v979_v45 = vrot.slane %v977_v50, 5  ;;  %v969_v52 = vshll.u32 %v2632_v31, 16 }
  0x5e   : > { %v944_v17 = vsel %vm2490_vm4, %v939_v37, %v943_v41  ;;  %v958_v21 = vsel %vm2490_vm4, %v953_v54, %v957_v62  ;;  %v1635_v11 = vsel %vm2601_vm7, %v2084_v34, %v1634_v35  ;;  %v1639_v1 = vsel %vm2601_vm7, %v2085_v33, %v1638_v26 }
  0x5f   : > { %v1643_v31 = vsel %vm2601_vm7, %v2086_v2, %v1642_v36  ;;  %v983_v43 = vshll.u32 %v2654_v19, 16  ;;  %v2000_v58 = vcombine.low %v944_v17, %v958_v21  ;;  %v966_v60 = vor.u32 %v965_v55, %v962_v15 }
  0x60   : > { %2178 = vmatmul.mubr.msk.bf16.vlgmr.msra.gmra.mrb[0].mxu1 %vm397_vm3, %v2346_v63  ;;  %v980_v51 = vor.u32 %v979_v45, %v976_v49  ;;  %v2092_v56 = vcombine.low %v1639_v1, %v1643_v31  ;;  %v2087_v39 = vrot.slane %v2079_v6, 9  ;;  %v1646_v0 = vrot.slane %v2813_v13, 5 }
  0x61   : > { %2236 = vmatpush3.bf16.msra.mxu1 %v2433_v3  ;;  %2181 = vmatprep.mubr.msk.bf16.mxu1 %vm397_vm3, %v2347_v38  ;;  %v1631_v3 = vsel %vm2601_vm7, %v2083_v30, %v1630_v22  ;;  %v2088_v18 = vrot.slane %v2080_v7, 9  ;;  %v1650_v59 = vrot.slane %v2816_v20, 5  ;;  %v971_v4 = vrot.slane %v969_v52, 5 }
  0x62   : > { %2222 = vmatmul.mubr.msk.bf16.gmra.mrb[4].mxu0 %vm397_vm3, %v2068_v5  ;;  %v2091_v61 = vcombine.low %v1631_v3, %v1635_v11  ;;  %v985_v10 = vrot.slane %v983_v43, 5  ;;  %v967_v46 = vrot.slane %v966_v60, 4  ;;  %v981_v19 = vrot.slane %v980_v51, 4 }
  0x63   : > { %2227 = vmatprep.mubr.msk.bf16.mxu0 %vm397_vm3, %v2090_v47  ;;  %v1647_v14 = vsel %vm2601_vm7, %v2087_v39, %v1646_v0  ;;  %v1651_v13 = vsel %vm2601_vm7, %v2088_v18, %v1650_v59 }
  0x64   : > { %v972_v20 = vsel %vm2490_vm4, %v967_v46, %v971_v4  ;;  %v986_v16 = vsel %vm2490_vm4, %v981_v19, %v985_v10  ;;  %v2093_v23 = vcombine.low %v1647_v14, %v1651_v13 }
  0x65   : > { %v2001_v25 = vcombine.low %v972_v20, %v986_v16 }
  0x68   : > { %2182 = vmatmul.mubr.msk.bf16.gmra.mrb[4].mxu1 %vm397_vm3, %v2348_v57 }
  0x69   : > { %2191 = vmatprep.mubr.msk.bf16.mxu1 %vm397_vm3, %v2000_v58 }
  0x6a   : > { %2228 = vmatmul.mubr.msk.bf16.vlgmr.msra.gmra.mrb[0].mxu0 %vm397_vm3, %v2091_v61 }
  0x6b   : > { %2231 = vmatprep.mubr.msk.bf16.mxu0 %vm397_vm3, %v2092_v56 }
  0x72   : > { %2232 = vmatmul.mubr.msk.bf16.gmra.mrb[4].mxu0 %vm397_vm3, %v2093_v23 }
  0x74   : > { %2192 = vmatmul.mubr.msk.bf16.vlgmr.msra.gmra.mrb[4].mxu1 %vm397_vm3, %v2001_v25 }
 0x133   : > { %v2179_v48 = vpop.f32.mrb[0].mxu1 }
 0x134   : > { %v820_v8 = vpop.f32.mrb[1].mxu1 }
 0x135   : > { %v2180_v24 = vpop.f32.mrb[2].mxu1 }
 0x136   : > { %v823_v9 = vpop.f32.mrb[3].mxu1 }
 0x13d   : > { %v2229_v32 = vpop.f32.mrb[0].mxu0 }
 0x13e   : > { %v2237_v53 = vadd.f32 %v2229_v32, %v2179_v48  ;;  %v1715_v27 = vpop.f32.mrb[1].mxu0 }
 0x13f   : > { %v2238_v28 = vadd.f32 %v1715_v27, %v820_v8  ;;  %v2230_v63 = vpop.f32.mrb[2].mxu0 }
 0x140   : > { %1756 = vst [vmem:[%s2919_s25 + $0x10] sm:$0xff] %v2237_v53  ;;  %v2239_v30 = vadd.f32 %v2230_v63, %v2180_v24  ;;  %v1718_v22 = vpop.f32.mrb[3].mxu0  ;;  %v1775_v44 = vmul.f32 %v2237_v53, %v2237_v53 }
 0x141   : > { %1754 = vst [vmem:[%s2919_s25] sm:$0xff] %v2238_v28  ;;  %v2240_v5 = vadd.f32 %v1718_v22, %v823_v9  ;;  %v1773_v47 = vmul.f32 %v2238_v28, %v2238_v28 }
 0x142   : > { %1757 = vst [vmem:[%s2919_s25 + $0x18] sm:$0xff] %v2239_v30  ;;  %v1776_v29 = vmul.f32 %v2239_v30, %v2239_v30 }
 0x143   : > { %1755 = vst [vmem:[%s2919_s25 + $0x8] sm:$0xff] %v2240_v5  ;;  %v1763_v34 = vadd.f32 %v2240_v5, %v2238_v28  ;;  %v1774_v35 = vmul.f32 %v2240_v5, %v2240_v5 }
 0x145   : > { %v1764_v42 = vadd.f32 %v2237_v53, %v1763_v34  ;;  %v1781_v38 = vadd.f32 %v1774_v35, %v1773_v47  ;;  %v2233_v40 = vpop.f32.mrb[4].mxu0 }
 0x146   : > { %v1731_v12 = vpop.f32.mrb[5].mxu0 }
 0x147   : > { %v1782_v50 = vadd.f32 %v1781_v38, %v1775_v44  ;;  %v2193_v37 = vpop.f32.mrb[4].mxu1  ;;  %v1765_v41 = vadd.f32 %v2239_v30, %v1764_v42  ;;  %v2234_v54 = vpop.f32.mrb[6].mxu0 }
 0x148   : > { %v2241_v62 = vadd.f32 %v2233_v40, %v2193_v37  ;;  %v1066_v33 = vpop.f32.mrb[5].mxu1  ;;  %v1734_v26 = vpop.f32.mrb[7].mxu0 }
 0x149   : > { %v2242_v2 = vadd.f32 %v1731_v12, %v1066_v33  ;;  %v1783_v36 = vadd.f32 %v1782_v50, %v1776_v29  ;;  %v2194_v15 = vpop.f32.mrb[6].mxu1 }
 0x14a   : > { %1760 = vst [vmem:[%s2919_s25 + $0x30] sm:$0xff] %v2241_v62  ;;  %v2243_v55 = vadd.f32 %v2234_v54, %v2194_v15  ;;  %v1069_v49 = vpop.f32.mrb[7].mxu1  ;;  %v1779_v1 = vmul.f32 %v2241_v62, %v2241_v62 }
 0x14b   : > { %1758 = vst [vmem:[%s2919_s25 + $0x20] sm:$0xff] %v2242_v2  ;;  %v1766_v45 = vadd.f32 %v2242_v2, %v1765_v41  ;;  %v1777_v52 = vmul.f32 %v2242_v2, %v2242_v2  ;;  %v2244_v17 = vadd.f32 %v1734_v26, %v1069_v49 }
 0x14c   : > { %1761 = vst [vmem:[%s2919_s25 + $0x38] sm:$0xff] %v2243_v55  ;;  %v1780_v6 = vmul.f32 %v2243_v55, %v2243_v55 }
 0x14d   : > { %v1784_v21 = vadd.f32 %v1783_v36, %v1777_v52  ;;  %1759 = vst [vmem:[%s2919_s25 + $0x28] sm:$0xff] %v2244_v17  ;;  %v1767_v3 = vadd.f32 %v2244_v17, %v1766_v45  ;;  %v1778_v11 = vmul.f32 %v2244_v17, %v2244_v17 }
 0x14f   : > { %v1768_v31 = vadd.f32 %v2241_v62, %v1767_v3  ;;  %v1785_v57 = vadd.f32 %v1784_v21, %v1778_v11 }
 0x151   : > { %v1769_v7 = vadd.f32 %v2243_v55, %v1768_v31  ;;  %v1786_v43 = vadd.f32 %v1785_v57, %v1779_v1 }
 0x153   : > { %v1787_v58 = vadd.f32 %v1786_v43, %v1780_v6  ;;  %1771 = vst [vmem:[%s239_s28] sm:$0xff] %v1769_v7 }
 0x155   : > { %1789 = vst [vmem:[%s243_s5] sm:$0xff] %v1787_v58 }
 0x156 PF: > { %s15_s17 = sadd.s32 1, %s2371_s17   ;;  %s2954_s15 = smov %s2367_s16 }
 0x157   : > { %p12_p6 = scmp.ge.s32.totalorder %s15_s17, 4   ;;  %s2955_s16 = smov %s2957_s18 }
 0x159   :  { %14 = sbr.rel (!%p12_p6) target bundleno = 2 (0x2), region = 96 }

</bundles_post_ra>
